<compile_context>
chip_gen: v5e
topology: v5e:2x2
jax: 0.10.0
libtpu: 0.0.40
codegen_flags: <defaults>
</compile_context>

<pallas_src>
import functools
import math

import numpy as np

import jax
import jax.numpy as jnp
from jax.experimental import pallas as pl
from jax.experimental.pallas import tpu as pltpu


# ---------------------------------------------------------------------------
# Fused kernel: conv1+tanh, conv2+tanh, conv3+clamp for one image.
# ---------------------------------------------------------------------------
def _espcn_fused_kernel(x_ref, t1_ref, b1_ref, t2_ref, b2_ref, t3_ref, b3_ref,
                        o_ref, p1_ref, p2_ref, p3_ref, *, H, W, C_IN, C1, C2):
    """One image, all three convs, activations never leave VMEM.

    x_ref  : (1, H, W*C_IN)                 lane-dense input slab (f32)
    t*_ref : (kh, W_pad*Cin, W*Cout)        block-Toeplitz weights (bf16 or f32)
    b*_ref : (1, W*Cout)                    per-column biases (f32)
    o_ref  : (1, H, W*C3)                   conv3 output, columns pre-permuted for
                                            PixelShuffle, clamped to [0,1] (f32)
    p*_ref : (H_pad, W_pad*Cin)             zero-padded activation slabs (f32, VMEM)
    """
    mxu_dt = t1_ref.dtype

    def conv(p_ref, kh, t_ref, b_ref):
        # kh row-band matmuls: lhs for row offset i is just padded[i:i+H, :].
        acc = None
        for i in range(kh):
            lhs = p_ref[i:i + H, :].astype(mxu_dt)
            d = jnp.dot(lhs, t_ref[i], preferred_element_type=jnp.float32)
            acc = d if acc is None else acc + d
        return acc + b_ref[...]                       # (H, W*Cout) f32

    # ---- layer 1: 5x5 conv, pad 2, tanh ----------------------------------
    p1_ref[...] = jnp.zeros(p1_ref.shape, p1_ref.dtype)      # halo + interior
    p1_ref[2:2 + H, 2 * C_IN:(2 + W) * C_IN] = x_ref[0]
    a1 = jnp.tanh(conv(p1_ref, 5, t1_ref, b1_ref))           # (H, W*C1)

    # ---- layer 2: 3x3 conv, pad 1, tanh ----------------------------------
    p2_ref[...] = jnp.zeros(p2_ref.shape, p2_ref.dtype)
    p2_ref[1:1 + H, C1:(1 + W) * C1] = a1
    a2 = jnp.tanh(conv(p2_ref, 3, t2_ref, b2_ref))            # (H, W*C2)

    # ---- layer 3: 3x3 conv, pad 1, clamp (commutes with PixelShuffle) ----
    p3_ref[...] = jnp.zeros(p3_ref.shape, p3_ref.dtype)
    p3_ref[1:1 + H, C2:(1 + W) * C2] = a2
    a3 = jnp.clip(conv(p3_ref, 3, t3_ref, b3_ref), 0.0, 1.0)  # (H, W*C3)

    o_ref[0] = a3


# ---------------------------------------------------------------------------
# Host-side weight preparation (run once, outside the steady-state forward).
# ---------------------------------------------------------------------------
def _build_toeplitz(w_hwio, W_out, pad, dtype):
    """HWIO conv weight -> per-row-offset block-Toeplitz matmul weights.

    Returns T of shape (kh, (W_out + 2*pad)*Cin, W_out*Cout) with
      T[i, wp*Cin + ci, w*Cout + co] = w[i, wp - w, ci, co]  if 0 <= wp - w < kw
                                     = 0                      otherwise
    """
    kh, kw, cin, cout = w_hwio.shape
    W_pad = W_out + 2 * pad
    sel = np.zeros((kw, W_pad, W_out), np.float32)
    for j in range(kw):
        sel[j, np.arange(W_out) + j, np.arange(W_out)] = 1.0
    t = jnp.einsum("jpw,ijcd->ipcwd", jnp.asarray(sel), w_hwio.astype(jnp.float32))
    return t.reshape(kh, W_pad * cin, W_out * cout).astype(dtype)


def prepare_espcn_params(params, W, upscale_factor, compute_dtype=jnp.bfloat16):
    """Pre-expand conv weights to block-Toeplitz form; tile/permute biases."""
    (w1, b1), (w2, b2), (w3, b3) = params
    C3 = w3.shape[-1]
    r = upscale_factor
    oc = C3 // (r * r)

    t1 = _build_toeplitz(w1, W, 2, compute_dtype)
    t2 = _build_toeplitz(w2, W, 1, compute_dtype)
    t3 = _build_toeplitz(w3, W, 1, compute_dtype)
    b1t = jnp.tile(b1.astype(jnp.float32), W).reshape(1, -1)
    b2t = jnp.tile(b2.astype(jnp.float32), W).reshape(1, -1)
    b3t = jnp.tile(b3.astype(jnp.float32), W).reshape(1, -1)

    # Permute conv3 output columns (w, c, i, j) -> (i, w, j, c) so the kernel's
    # (N, H, W*C3) output reshapes directly to (N, H*r, W*r, oc) (PixelShuffle
    # becomes a free reshape + one small NHWC->NCHW transpose).
    perm = np.arange(W * C3).reshape(W, oc, r, r).transpose(2, 0, 3, 1).reshape(-1)
    t3 = t3[:, :, perm]
    b3t = b3t[:, perm]
    return (t1, b1t, t2, b2t, t3, b3t)


# ---------------------------------------------------------------------------
# Forward pass (NCHW in / NCHW out, PyTorch convention).
# ---------------------------------------------------------------------------
@functools.partial(jax.jit, static_argnums=(2,))
def espcn_forward(x_nchw, prepared, upscale_factor):
    t1, b1t, t2, b2t, t3, b3t = prepared
    N, C_IN, H, W = x_nchw.shape
    r = upscale_factor
    C1 = t1.shape[-1] // W
    C2 = t2.shape[-1] // W
    C3 = t3.shape[-1] // W
    oc = C3 // (r * r)

    # Lane-dense input slab: NCHW -> (N, H, W*C_IN).
    x = jnp.transpose(x_nchw, (0, 2, 3, 1)).reshape(N, H, W * C_IN)

    kernel = functools.partial(_espcn_fused_kernel,
                               H=H, W=W, C_IN=C_IN, C1=C1, C2=C2)

    scratch_shapes = [
        pltpu.VMEM((H + 4, (W + 4) * C_IN), jnp.float32),   # conv1 padded input
        pltpu.VMEM((H + 2, (W + 2) * C1), jnp.float32),     # conv2 padded input
        pltpu.VMEM((H + 2, (W + 2) * C2), jnp.float32),     # conv3 padded input
    ]

    # VMEM budget: double-buffered operand/result blocks + scratch + headroom
    # (instead of a flat 32 MiB over-reservation).
    def _nbytes(a):
        return int(np.prod(a.shape)) * jnp.dtype(a.dtype).itemsize

    operand_bytes = sum(_nbytes(a) for a in (t1, b1t, t2, b2t, t3, b3t))
    operand_bytes += H * W * C_IN * 4 + H * W * C3 * 4
    scratch_bytes = 4 * ((H + 4) * (W + 4) * C_IN
                         + (H + 2) * (W + 2) * C1
                         + (H + 2) * (W + 2) * C2)
    vmem_limit = int(2 * operand_bytes + scratch_bytes + (4 << 20))

    y = pl.pallas_call(
        kernel,
        out_shape=jax.ShapeDtypeStruct((N, H, W * C3), jnp.float32),
        grid=(N,),
        in_specs=[
            pl.BlockSpec((1, H, W * C_IN), lambda n: (n, 0, 0)),
            pl.BlockSpec(t1.shape, lambda n: (0, 0, 0)),
            pl.BlockSpec(b1t.shape, lambda n: (0, 0)),
            pl.BlockSpec(t2.shape, lambda n: (0, 0, 0)),
            pl.BlockSpec(b2t.shape, lambda n: (0, 0)),
            pl.BlockSpec(t3.shape, lambda n: (0, 0, 0)),
            pl.BlockSpec(b3t.shape, lambda n: (0, 0)),
        ],
        out_specs=pl.BlockSpec((1, H, W * C3), lambda n: (n, 0, 0)),
        scratch_shapes=scratch_shapes,
        compiler_params=pltpu.CompilerParams(
            dimension_semantics=("parallel",),
            vmem_limit_bytes=vmem_limit,
        ),
    )(x, t1, b1t, t2, b2t, t3, b3t)

    # PixelShuffle: kernel output columns are already in (r, W, r, oc) order,
    # so this is a pure reshape + one NHWC->NCHW transpose of the small result.
    y = y.reshape(N, H * r, W * r, oc)
    return jnp.transpose(y, (0, 3, 1, 2))


# ---------------------------------------------------------------------------
# Parameter init mimicking the torch module (__init__ distributions):
# layers whose in_channels == 32 -> N(0, 0.001); otherwise
# N(0, sqrt(2 / (out_channels * kh * kw))); biases zero.  Weights are HWIO.
# ---------------------------------------------------------------------------
def _conv_init(key, kh, kw, cin, cout):
    if cin == 32:
        std = 0.001
    else:
        std = math.sqrt(2.0 / (cout * kh * kw))
    w = std * jax.random.normal(key, (kh, kw, cin, cout), jnp.float32)
    b = jnp.zeros((cout,), jnp.float32)
    return w, b


def make_espcn_params(key, in_channels, out_channels, channels, upscale_factor):
    hidden = channels // 2
    c3 = int(out_channels * upscale_factor ** 2)
    k1, k2, k3 = jax.random.split(key, 3)
    return (_conv_init(k1, 5, 5, in_channels, channels),
            _conv_init(k2, 3, 3, channels, hidden),
            _conv_init(k3, 3, 3, hidden, c3))


# ---------------------------------------------------------------------------
# Pure-JAX reference (numerical self-check against the Pallas kernel).
# ---------------------------------------------------------------------------
def espcn_reference(x_nchw, params, upscale_factor):
    (w1, b1), (w2, b2), (w3, b3) = params

    def conv(v, w, b, pad):
        y = jax.lax.conv_general_dilated(
            v, w, window_strides=(1, 1), padding=[(pad, pad), (pad, pad)],
            dimension_numbers=("NHWC", "HWIO", "NHWC"),
            precision=jax.lax.Precision.HIGHEST)
        return y + b

    x = jnp.transpose(x_nchw, (0, 2, 3, 1))
    x = jnp.tanh(conv(x, w1, b1, 2))
    x = jnp.tanh(conv(x, w2, b2, 1))
    x = conv(x, w3, b3, 1)
    x = jnp.transpose(x, (0, 3, 1, 2))                   # NCHW
    N, C, H, W = x.shape
    r = upscale_factor
    oc = C // (r * r)
    x = x.reshape(N, oc, r, r, H, W)
    x = jnp.transpose(x, (0, 1, 4, 2, 5, 3)).reshape(N, oc, H * r, W * r)
    return jnp.clip(x, 0.0, 1.0)


if __name__ == "__main__":
    in_channels, out_channels, channels, upscale_factor = 4, 4, 32, 2
    N, H, W = 2, 16, 16
    hidden = channels // 2
    c3 = out_channels * upscale_factor ** 2

    key = jax.random.PRNGKey(0)
    kp, kc, kx = jax.random.split(key, 3)
    x = jax.random.uniform(kx, (N, in_channels, H, W), jnp.float32)

    # --- correctness check vs. pure-JAX reference --------------------------
    ks = jax.random.split(kc, 6)
    chk_params = (
        (0.05 * jax.random.normal(ks[0], (5, 5, in_channels, channels), jnp.float32),
         0.05 * jax.random.normal(ks[1], (channels,), jnp.float32)),
        (0.05 * jax.random.normal(ks[2], (3, 3, channels, hidden), jnp.float32),
         0.05 * jax.random.normal(ks[3], (hidden,), jnp.float32)),
        (0.05 * jax.random.normal(ks[4], (3, 3, hidden, c3), jnp.float32),
         0.05 * jax.random.normal(ks[5], (c3,), jnp.float32)),
    )
    y_ref = jax.block_until_ready(espcn_reference(x, chk_params, upscale_factor))

    # tight-tolerance f32 debug path (catches tap-ordering / layout bugs)
    prep_f32 = prepare_espcn_params(chk_params, W, upscale_factor, jnp.float32)
    y_f32 = jax.block_until_ready(espcn_forward(x, prep_f32, upscale_factor))
    err_f32 = float(jnp.max(jnp.abs(y_f32 - y_ref)))
    assert err_f32 < 1e-3, f"f32 kernel/reference mismatch, max abs err = {err_f32}"

    # bf16 production path (loose tolerance)
    prep_bf16 = prepare_espcn_params(chk_params, W, upscale_factor, jnp.bfloat16)
    y_bf16 = jax.block_until_ready(espcn_forward(x, prep_bf16, upscale_factor))
    err_bf16 = float(jnp.max(jnp.abs(y_bf16 - y_ref)))
    assert err_bf16 < 5e-2, f"bf16 kernel/reference mismatch, max abs err = {err_bf16}"

    # --- run with the module-faithful init ---------------------------------
    params = make_espcn_params(kp, in_channels, out_channels, channels,
                               upscale_factor)
    prep = prepare_espcn_params(params, W, upscale_factor, jnp.bfloat16)
    y = jax.block_until_ready(espcn_forward(x, prep, upscale_factor))

    expected_shape = (N, out_channels, H * upscale_factor, W * upscale_factor)
    assert y.shape == expected_shape, (y.shape, expected_shape)
    assert bool(jnp.all(jnp.isfinite(y)))
    assert bool(jnp.all((y >= 0.0) & (y <= 1.0)))
    print("KERNEL_OK")
</pallas_src>

<mosaic_0001>
module attributes {stable_mosaic.version = 11 : i64} {
  func.func @_espcn_fused_kernel(%arg0: i32, %arg1: memref<1x16x64xf32, #tpu.memory_space<vmem>>, %arg2: memref<5x80x512xf32, #tpu.memory_space<vmem>>, %arg3: memref<1x512xf32, #tpu.memory_space<vmem>>, %arg4: memref<3x576x256xf32, #tpu.memory_space<vmem>>, %arg5: memref<1x256xf32, #tpu.memory_space<vmem>>, %arg6: memref<3x288x256xf32, #tpu.memory_space<vmem>>, %arg7: memref<1x256xf32, #tpu.memory_space<vmem>>, %arg8: memref<1x16x256xf32, #tpu.memory_space<vmem>>, %arg9: memref<20x80xf32, #tpu.memory_space<vmem>>, %arg10: memref<18x576xf32, #tpu.memory_space<vmem>>, %arg11: memref<18x288xf32, #tpu.memory_space<vmem>>) attributes {dimension_semantics = [#tpu.dimension_semantics<parallel>], iteration_bounds = array<i64: 2>, scalar_prefetch = 0 : i64, scratch_operands = 3 : i64, tpu.core_type = #tpu.core_type<tc>, window_params = [{transform_indices = @transform_0, window_bounds = array<i64: 1, 16, 64>}, {pipeline_mode = #tpu.pipeline_mode<synchronous>, transform_indices = @transform_1, window_bounds = array<i64: 5, 80, 512>}, {pipeline_mode = #tpu.pipeline_mode<synchronous>, transform_indices = @transform_2, window_bounds = array<i64: 1, 512>}, {pipeline_mode = #tpu.pipeline_mode<synchronous>, transform_indices = @transform_3, window_bounds = array<i64: 3, 576, 256>}, {pipeline_mode = #tpu.pipeline_mode<synchronous>, transform_indices = @transform_4, window_bounds = array<i64: 1, 256>}, {pipeline_mode = #tpu.pipeline_mode<synchronous>, transform_indices = @transform_5, window_bounds = array<i64: 3, 288, 256>}, {pipeline_mode = #tpu.pipeline_mode<synchronous>, transform_indices = @transform_6, window_bounds = array<i64: 1, 256>}, {transform_indices = @transform_7, window_bounds = array<i64: 1, 16, 256>}]} {
    %cst = arith.constant 0.000000e+00 : f32
    %0 = vector.broadcast %cst : f32 to vector<20x80xf32>
    %c0 = arith.constant 0 : index
    %c0_0 = arith.constant 0 : index
    %1 = vector.load %arg9[%c0, %c0_0] : memref<20x80xf32, #tpu.memory_space<vmem>>, vector<20x80xf32>
    tpu.vector_store %arg9[%c0, %c0_0], %0 {strides = array<i32>} : memref<20x80xf32, #tpu.memory_space<vmem>>, vector<20x80xf32>,
    %c0_1 = arith.constant 0 : index
    %c0_2 = arith.constant 0 : index
    %c0_3 = arith.constant 0 : index
    %2 = vector.load %arg1[%c0_1, %c0_2, %c0_3] : memref<1x16x64xf32, #tpu.memory_space<vmem>>, vector<1x16x64xf32>
    %3 = vector.shape_cast %2 : vector<1x16x64xf32> to vector<16x64xf32>
    %c2 = arith.constant 2 : index
    %c8 = arith.constant 8 : index
    %4 = vector.load %arg9[%c2, %c8] : memref<20x80xf32, #tpu.memory_space<vmem>>, vector<16x64xf32>
    tpu.vector_store %arg9[%c2, %c8], %3 {strides = array<i32>} : memref<20x80xf32, #tpu.memory_space<vmem>>, vector<16x64xf32>,
    %c0_4 = arith.constant 0 : index
    %c0_5 = arith.constant 0 : index
    %5 = vector.load %arg9[%c0_4, %c0_5] : memref<20x80xf32, #tpu.memory_space<vmem>>, vector<16x80xf32>
    %c0_6 = arith.constant 0 : index
    %c0_7 = arith.constant 0 : index
    %c0_8 = arith.constant 0 : index
    %6 = vector.load %arg2[%c0_6, %c0_7, %c0_8] : memref<5x80x512xf32, #tpu.memory_space<vmem>>, vector<1x80x512xf32>
    %7 = vector.shape_cast %6 : vector<1x80x512xf32> to vector<80x512xf32>
    %cst_9 = arith.constant dense<0.000000e+00> : vector<16x512xf32>
    %8 = tpu.matmul %5, %7, %cst_9 {dimension_numbers = #tpu.dot_dimension_numbers<[1], [0], [0], [1], [0, 0, 1, 1], [], []>} : vector<16x80xf32>, vector<80x512xf32>, vector<16x512xf32> -> vector<16x512xf32>
    %c1 = arith.constant 1 : index
    %c0_10 = arith.constant 0 : index
    %9 = vector.load %arg9[%c1, %c0_10] : memref<20x80xf32, #tpu.memory_space<vmem>>, vector<16x80xf32>
    %c1_11 = arith.constant 1 : index
    %c0_12 = arith.constant 0 : index
    %c0_13 = arith.constant 0 : index
    %10 = vector.load %arg2[%c1_11, %c0_12, %c0_13] : memref<5x80x512xf32, #tpu.memory_space<vmem>>, vector<1x80x512xf32>
    %11 = vector.shape_cast %10 : vector<1x80x512xf32> to vector<80x512xf32>
    %cst_14 = arith.constant dense<0.000000e+00> : vector<16x512xf32>
    %12 = tpu.matmul %9, %11, %cst_14 {dimension_numbers = #tpu.dot_dimension_numbers<[1], [0], [0], [1], [0, 0, 1, 1], [], []>} : vector<16x80xf32>, vector<80x512xf32>, vector<16x512xf32> -> vector<16x512xf32>
    %13 = arith.addf %8, %12 : vector<16x512xf32>
    %c2_15 = arith.constant 2 : index
    %c0_16 = arith.constant 0 : index
    %14 = vector.load %arg9[%c2_15, %c0_16] : memref<20x80xf32, #tpu.memory_space<vmem>>, vector<16x80xf32>
    %c2_17 = arith.constant 2 : index
    %c0_18 = arith.constant 0 : index
    %c0_19 = arith.constant 0 : index
    %15 = vector.load %arg2[%c2_17, %c0_18, %c0_19] : memref<5x80x512xf32, #tpu.memory_space<vmem>>, vector<1x80x512xf32>
    %16 = vector.shape_cast %15 : vector<1x80x512xf32> to vector<80x512xf32>
    %cst_20 = arith.constant dense<0.000000e+00> : vector<16x512xf32>
    %17 = tpu.matmul %14, %16, %cst_20 {dimension_numbers = #tpu.dot_dimension_numbers<[1], [0], [0], [1], [0, 0, 1, 1], [], []>} : vector<16x80xf32>, vector<80x512xf32>, vector<16x512xf32> -> vector<16x512xf32>
    %18 = arith.addf %13, %17 : vector<16x512xf32>
    %c3 = arith.constant 3 : index
    %c0_21 = arith.constant 0 : index
    %19 = vector.load %arg9[%c3, %c0_21] : memref<20x80xf32, #tpu.memory_space<vmem>>, vector<16x80xf32>
    %c3_22 = arith.constant 3 : index
    %c0_23 = arith.constant 0 : index
    %c0_24 = arith.constant 0 : index
    %20 = vector.load %arg2[%c3_22, %c0_23, %c0_24] : memref<5x80x512xf32, #tpu.memory_space<vmem>>, vector<1x80x512xf32>
    %21 = vector.shape_cast %20 : vector<1x80x512xf32> to vector<80x512xf32>
    %cst_25 = arith.constant dense<0.000000e+00> : vector<16x512xf32>
    %22 = tpu.matmul %19, %21, %cst_25 {dimension_numbers = #tpu.dot_dimension_numbers<[1], [0], [0], [1], [0, 0, 1, 1], [], []>} : vector<16x80xf32>, vector<80x512xf32>, vector<16x512xf32> -> vector<16x512xf32>
    %23 = arith.addf %18, %22 : vector<16x512xf32>
    %c4 = arith.constant 4 : index
    %c0_26 = arith.constant 0 : index
    %24 = vector.load %arg9[%c4, %c0_26] : memref<20x80xf32, #tpu.memory_space<vmem>>, vector<16x80xf32>
    %c4_27 = arith.constant 4 : index
    %c0_28 = arith.constant 0 : index
    %c0_29 = arith.constant 0 : index
    %25 = vector.load %arg2[%c4_27, %c0_28, %c0_29] : memref<5x80x512xf32, #tpu.memory_space<vmem>>, vector<1x80x512xf32>
    %26 = vector.shape_cast %25 : vector<1x80x512xf32> to vector<80x512xf32>
    %cst_30 = arith.constant dense<0.000000e+00> : vector<16x512xf32>
    %27 = tpu.matmul %24, %26, %cst_30 {dimension_numbers = #tpu.dot_dimension_numbers<[1], [0], [0], [1], [0, 0, 1, 1], [], []>} : vector<16x80xf32>, vector<80x512xf32>, vector<16x512xf32> -> vector<16x512xf32>
    %28 = arith.addf %23, %27 : vector<16x512xf32>
    %c0_31 = arith.constant 0 : index
    %c0_32 = arith.constant 0 : index
    %29 = vector.load %arg3[%c0_31, %c0_32] : memref<1x512xf32, #tpu.memory_space<vmem>>, vector<1x512xf32>
    %30 = vector.broadcast %29 : vector<1x512xf32> to vector<16x512xf32>
    %31 = arith.addf %28, %30 : vector<16x512xf32>
    %32 = math.tanh %31 : vector<16x512xf32>
    %cst_33 = arith.constant 0.000000e+00 : f32
    %33 = vector.broadcast %cst_33 : f32 to vector<18x576xf32>
    %c0_34 = arith.constant 0 : index
    %c0_35 = arith.constant 0 : index
    %34 = vector.load %arg10[%c0_34, %c0_35] : memref<18x576xf32, #tpu.memory_space<vmem>>, vector<18x576xf32>
    tpu.vector_store %arg10[%c0_34, %c0_35], %33 {strides = array<i32>} : memref<18x576xf32, #tpu.memory_space<vmem>>, vector<18x576xf32>,
    %c1_36 = arith.constant 1 : index
    %c32 = arith.constant 32 : index
    %35 = vector.load %arg10[%c1_36, %c32] : memref<18x576xf32, #tpu.memory_space<vmem>>, vector<16x512xf32>
    tpu.vector_store %arg10[%c1_36, %c32], %32 {strides = array<i32>} : memref<18x576xf32, #tpu.memory_space<vmem>>, vector<16x512xf32>,
    %c0_37 = arith.constant 0 : index
    %c0_38 = arith.constant 0 : index
    %36 = vector.load %arg10[%c0_37, %c0_38] : memref<18x576xf32, #tpu.memory_space<vmem>>, vector<16x576xf32>
    %c0_39 = arith.constant 0 : index
    %c0_40 = arith.constant 0 : index
    %c0_41 = arith.constant 0 : index
    %37 = vector.load %arg4[%c0_39, %c0_40, %c0_41] : memref<3x576x256xf32, #tpu.memory_space<vmem>>, vector<1x576x256xf32>
    %38 = vector.shape_cast %37 : vector<1x576x256xf32> to vector<576x256xf32>
    %cst_42 = arith.constant dense<0.000000e+00> : vector<16x256xf32>
    %39 = tpu.matmul %36, %38, %cst_42 {dimension_numbers = #tpu.dot_dimension_numbers<[1], [0], [0], [1], [0, 0, 1, 1], [], []>} : vector<16x576xf32>, vector<576x256xf32>, vector<16x256xf32> -> vector<16x256xf32>
    %c1_43 = arith.constant 1 : index
    %c0_44 = arith.constant 0 : index
    %40 = vector.load %arg10[%c1_43, %c0_44] : memref<18x576xf32, #tpu.memory_space<vmem>>, vector<16x576xf32>
    %c1_45 = arith.constant 1 : index
    %c0_46 = arith.constant 0 : index
    %c0_47 = arith.constant 0 : index
    %41 = vector.load %arg4[%c1_45, %c0_46, %c0_47] : memref<3x576x256xf32, #tpu.memory_space<vmem>>, vector<1x576x256xf32>
    %42 = vector.shape_cast %41 : vector<1x576x256xf32> to vector<576x256xf32>
    %cst_48 = arith.constant dense<0.000000e+00> : vector<16x256xf32>
    %43 = tpu.matmul %40, %42, %cst_48 {dimension_numbers = #tpu.dot_dimension_numbers<[1], [0], [0], [1], [0, 0, 1, 1], [], []>} : vector<16x576xf32>, vector<576x256xf32>, vector<16x256xf32> -> vector<16x256xf32>
    %44 = arith.addf %39, %43 : vector<16x256xf32>
    %c2_49 = arith.constant 2 : index
    %c0_50 = arith.constant 0 : index
    %45 = vector.load %arg10[%c2_49, %c0_50] : memref<18x576xf32, #tpu.memory_space<vmem>>, vector<16x576xf32>
    %c2_51 = arith.constant 2 : index
    %c0_52 = arith.constant 0 : index
    %c0_53 = arith.constant 0 : index
    %46 = vector.load %arg4[%c2_51, %c0_52, %c0_53] : memref<3x576x256xf32, #tpu.memory_space<vmem>>, vector<1x576x256xf32>
    %47 = vector.shape_cast %46 : vector<1x576x256xf32> to vector<576x256xf32>
    %cst_54 = arith.constant dense<0.000000e+00> : vector<16x256xf32>
    %48 = tpu.matmul %45, %47, %cst_54 {dimension_numbers = #tpu.dot_dimension_numbers<[1], [0], [0], [1], [0, 0, 1, 1], [], []>} : vector<16x576xf32>, vector<576x256xf32>, vector<16x256xf32> -> vector<16x256xf32>
    %49 = arith.addf %44, %48 : vector<16x256xf32>
    %c0_55 = arith.constant 0 : index
    %c0_56 = arith.constant 0 : index
    %50 = vector.load %arg5[%c0_55, %c0_56] : memref<1x256xf32, #tpu.memory_space<vmem>>, vector<1x256xf32>
    %51 = vector.broadcast %50 : vector<1x256xf32> to vector<16x256xf32>
    %52 = arith.addf %49, %51 : vector<16x256xf32>
    %53 = math.tanh %52 : vector<16x256xf32>
    %cst_57 = arith.constant 0.000000e+00 : f32
    %54 = vector.broadcast %cst_57 : f32 to vector<18x288xf32>
    %c0_58 = arith.constant 0 : index
    %c0_59 = arith.constant 0 : index
    %55 = vector.load %arg11[%c0_58, %c0_59] : memref<18x288xf32, #tpu.memory_space<vmem>>, vector<18x288xf32>
    tpu.vector_store %arg11[%c0_58, %c0_59], %54 {strides = array<i32>} : memref<18x288xf32, #tpu.memory_space<vmem>>, vector<18x288xf32>,
    %c1_60 = arith.constant 1 : index
    %c16 = arith.constant 16 : index
    %56 = vector.load %arg11[%c1_60, %c16] : memref<18x288xf32, #tpu.memory_space<vmem>>, vector<16x256xf32>
    tpu.vector_store %arg11[%c1_60, %c16], %53 {strides = array<i32>} : memref<18x288xf32, #tpu.memory_space<vmem>>, vector<16x256xf32>,
    %c0_61 = arith.constant 0 : index
    %c0_62 = arith.constant 0 : index
    %57 = vector.load %arg11[%c0_61, %c0_62] : memref<18x288xf32, #tpu.memory_space<vmem>>, vector<16x288xf32>
    %c0_63 = arith.constant 0 : index
    %c0_64 = arith.constant 0 : index
    %c0_65 = arith.constant 0 : index
    %58 = vector.load %arg6[%c0_63, %c0_64, %c0_65] : memref<3x288x256xf32, #tpu.memory_space<vmem>>, vector<1x288x256xf32>
    %59 = vector.shape_cast %58 : vector<1x288x256xf32> to vector<288x256xf32>
    %cst_66 = arith.constant dense<0.000000e+00> : vector<16x256xf32>
    %60 = tpu.matmul %57, %59, %cst_66 {dimension_numbers = #tpu.dot_dimension_numbers<[1], [0], [0], [1], [0, 0, 1, 1], [], []>} : vector<16x288xf32>, vector<288x256xf32>, vector<16x256xf32> -> vector<16x256xf32>
    %c1_67 = arith.constant 1 : index
    %c0_68 = arith.constant 0 : index
    %61 = vector.load %arg11[%c1_67, %c0_68] : memref<18x288xf32, #tpu.memory_space<vmem>>, vector<16x288xf32>
    %c1_69 = arith.constant 1 : index
    %c0_70 = arith.constant 0 : index
    %c0_71 = arith.constant 0 : index
    %62 = vector.load %arg6[%c1_69, %c0_70, %c0_71] : memref<3x288x256xf32, #tpu.memory_space<vmem>>, vector<1x288x256xf32>
    %63 = vector.shape_cast %62 : vector<1x288x256xf32> to vector<288x256xf32>
    %cst_72 = arith.constant dense<0.000000e+00> : vector<16x256xf32>
    %64 = tpu.matmul %61, %63, %cst_72 {dimension_numbers = #tpu.dot_dimension_numbers<[1], [0], [0], [1], [0, 0, 1, 1], [], []>} : vector<16x288xf32>, vector<288x256xf32>, vector<16x256xf32> -> vector<16x256xf32>
    %65 = arith.addf %60, %64 : vector<16x256xf32>
    %c2_73 = arith.constant 2 : index
    %c0_74 = arith.constant 0 : index
    %66 = vector.load %arg11[%c2_73, %c0_74] : memref<18x288xf32, #tpu.memory_space<vmem>>, vector<16x288xf32>
    %c2_75 = arith.constant 2 : index
    %c0_76 = arith.constant 0 : index
    %c0_77 = arith.constant 0 : index
    %67 = vector.load %arg6[%c2_75, %c0_76, %c0_77] : memref<3x288x256xf32, #tpu.memory_space<vmem>>, vector<1x288x256xf32>
    %68 = vector.shape_cast %67 : vector<1x288x256xf32> to vector<288x256xf32>
    %cst_78 = arith.constant dense<0.000000e+00> : vector<16x256xf32>
    %69 = tpu.matmul %66, %68, %cst_78 {dimension_numbers = #tpu.dot_dimension_numbers<[1], [0], [0], [1], [0, 0, 1, 1], [], []>} : vector<16x288xf32>, vector<288x256xf32>, vector<16x256xf32> -> vector<16x256xf32>
    %70 = arith.addf %65, %69 : vector<16x256xf32>
    %c0_79 = arith.constant 0 : index
    %c0_80 = arith.constant 0 : index
    %71 = vector.load %arg7[%c0_79, %c0_80] : memref<1x256xf32, #tpu.memory_space<vmem>>, vector<1x256xf32>
    %72 = vector.broadcast %71 : vector<1x256xf32> to vector<16x256xf32>
    %73 = arith.addf %70, %72 : vector<16x256xf32>
    %cst_81 = arith.constant 0.000000e+00 : f32
    %cst_82 = arith.constant 1.000000e+00 : f32
    %74 = vector.broadcast %cst_81 : f32 to vector<16x256xf32>
    %75 = arith.maximumf %74, %73 : vector<16x256xf32>
    %76 = vector.broadcast %cst_82 : f32 to vector<16x256xf32>
    %77 = arith.minimumf %76, %75 : vector<16x256xf32>
    %c0_83 = arith.constant 0 : index
    %c0_84 = arith.constant 0 : index
    %c0_85 = arith.constant 0 : index
    %78 = vector.load %arg8[%c0_83, %c0_84, %c0_85] : memref<1x16x256xf32, #tpu.memory_space<vmem>>, vector<1x16x256xf32>
    %79 = vector.shape_cast %78 : vector<1x16x256xf32> to vector<16x256xf32>
    %80 = vector.shape_cast %77 : vector<16x256xf32> to vector<1x16x256xf32>
    tpu.vector_store %arg8[%c0_83, %c0_84, %c0_85], %80 {strides = array<i32>} : memref<1x16x256xf32, #tpu.memory_space<vmem>>, vector<1x16x256xf32>,
    return
  }
  func.func @transform_0(%arg0: i32) -> (i32, i32, i32) {
    %c0_i32 = arith.constant 0 : i32
    %c0_i32_0 = arith.constant 0 : i32
    %c0_i32_1 = arith.constant 0 : i32
    return %arg0, %c0_i32, %c0_i32_0 : i32, i32, i32
  }
  func.func @transform_1(%arg0: i32) -> (i32, i32, i32) {
    %c0_i32 = arith.constant 0 : i32
    %c0_i32_0 = arith.constant 0 : i32
    %c0_i32_1 = arith.constant 0 : i32
    %c0_i32_2 = arith.constant 0 : i32
    return %c0_i32, %c0_i32_0, %c0_i32_1 : i32, i32, i32
  }
  func.func @transform_2(%arg0: i32) -> (i32, i32) {
    %c0_i32 = arith.constant 0 : i32
    %c0_i32_0 = arith.constant 0 : i32
    %c0_i32_1 = arith.constant 0 : i32
    return %c0_i32, %c0_i32_0 : i32, i32
  }
  func.func @transform_3(%arg0: i32) -> (i32, i32, i32) {
    %c0_i32 = arith.constant 0 : i32
    %c0_i32_0 = arith.constant 0 : i32
    %c0_i32_1 = arith.constant 0 : i32
    %c0_i32_2 = arith.constant 0 : i32
    return %c0_i32, %c0_i32_0, %c0_i32_1 : i32, i32, i32
  }
  func.func @transform_4(%arg0: i32) -> (i32, i32) {
    %c0_i32 = arith.constant 0 : i32
    %c0_i32_0 = arith.constant 0 : i32
    %c0_i32_1 = arith.constant 0 : i32
    return %c0_i32, %c0_i32_0 : i32, i32
  }
  func.func @transform_5(%arg0: i32) -> (i32, i32, i32) {
    %c0_i32 = arith.constant 0 : i32
    %c0_i32_0 = arith.constant 0 : i32
    %c0_i32_1 = arith.constant 0 : i32
    %c0_i32_2 = arith.constant 0 : i32
    return %c0_i32, %c0_i32_0, %c0_i32_1 : i32, i32, i32
  }
  func.func @transform_6(%arg0: i32) -> (i32, i32) {
    %c0_i32 = arith.constant 0 : i32
    %c0_i32_0 = arith.constant 0 : i32
    %c0_i32_1 = arith.constant 0 : i32
    return %c0_i32, %c0_i32_0 : i32, i32
  }
  func.func @transform_7(%arg0: i32) -> (i32, i32, i32) {
    %c0_i32 = arith.constant 0 : i32
    %c0_i32_0 = arith.constant 0 : i32
    %c0_i32_1 = arith.constant 0 : i32
    return %arg0, %c0_i32, %c0_i32_0 : i32, i32, i32
  }
}

</mosaic_0001>

<bundles_post_ra>
// kernel: espcn_forward.1
= control target key start
LH: loop header
LB: loop body
LE: loop exit
PB: predicated region body
PF: predicated region fallthrough
CT: control target
= control target key end

     0   :  { %12 = vsyncpa [#allocation6], 0  ;;  %s4440_s0 = inlined_call_operand.vmem [shape: f32[2,16,64], index: 0, kind: input, shape index: {}]   ;;  %s4441_s1 = inlined_call_operand.hbm [shape: f32[5,80,512], index: 1, kind: input, shape index: {}]   ;;  %s4442_s2 = inlined_call_operand.hbm [shape: f32[1,512], index: 2, kind: input, shape index: {}]   ;;  %s4443_s3 = inlined_call_operand.hbm [shape: f32[3,576,256], index: 3, kind: input, shape index: {}]   ;;  %s4444_s4 = inlined_call_operand.hbm [shape: f32[1,256], index: 4, kind: input, shape index: {}]   ;;  %s4445_s5 = inlined_call_operand.hbm [shape: f32[3,288,256], index: 5, kind: input, shape index: {}]   ;;  %s4446_s6 = inlined_call_operand.hbm [shape: f32[1,256], index: 6, kind: input, shape index: {}]   ;;  %s4447_s7 = inlined_call_operand.vmem [shape: f32[2,16,256], index: 7, kind: output, shape index: {}]  }
   0x1   :  { %13 = vsyncpa [#allocation8], 0 }
   0x2   :  { %14 = vsyncpa [#allocation11], 0 }
   0x3   :  { %15 = vsyncpa [#allocation14], 0  ;;  %s3900_s24 = smov 0  }
   0x4 LB: > { %s230_s27 = sshll.u32 %s4442_s2, 4  ;;  %s3909_s28 = sadd.s32 4294967295, %s3844_s24   ;;  %s3844_s24 = sphi %s3900_s24, %s21_s24   ;;  %s231_s27 = int_to_ptr.hbm [resolvable:$true] %s230_s27 }
   0x5   : > { %p3448_p0 = scmp.ge.s32.totalorder %s3844_s24, 1  ;;  %p204_p1 = scmp.lt.s32.totalorder %s3844_s24, 3 }
   0x6   : > { %p3578_p2 = scmp.eq.s32.totalorder %s3909_s28, 0  ;;  %s3846_s30 = smov [#allocation7]  }
   0x7   : > { %p3914_p3 = pnand %p3448_p0, %p204_p1  ;;  %s232_s8 = sshll.u32 %s3846_s30, 4  ;;  %s233_s8 = int_to_ptr.vmem [resolvable:$true] %s232_s8 }
   0x8   : > { %s256_s11 = sshll.u32 %s4444_s4, 4  ;;  %s215_s14 = sshll.u32 %s4441_s1, 4  ;;  %s257_s11 = int_to_ptr.hbm [resolvable:$true] %s256_s11  ;;  %s216_s14 = int_to_ptr.hbm [resolvable:$true] %s215_s14 }
   0x9   : > { %p3559_p4 = pneg %p3914_p3  ;;  %s3847_s16 = smov [#allocation10]  }
   0xa   : > { %s258_s17 = sshll.u32 %s3847_s16, 4  ;;  %s3848_s18 = smov [#allocation5]   ;;  %s259_s17 = int_to_ptr.vmem [resolvable:$true] %s258_s17 }
   0xb   : > { %p3928_p5 = pnand %p3578_p2, %p3559_p4  ;;  %s217_s19 = sshll.u32 %s3848_s18, 4  ;;  %s218_s19 = int_to_ptr.vmem [resolvable:$true] %s217_s19 }
   0xc   : > { %s3849_s20 = smov 512   ;;  %s3850_s21 = smov 32  }
   0xd   : > { %3565 = dma.hbm_to_vmem [thread:$0]  (!%p3928_p5), %s231_s27, 64, %s233_s8, [#allocation8]  }
   0xe   : > { %3571 = dma.hbm_to_vmem [thread:$0]  (!%p3928_p5), %s257_s11, 32, %s259_s17, [#allocation11]  }
   0xf   : > { %3562 = dma.hbm_to_vmem [thread:$0]  (!%p3928_p5), %s216_s14, 25600, %s218_s19, [#allocation6], %s3849_s20, %s3849_s20, %s3850_s21  }
  0x10   : > { %s241_s25 = sshll.u32 %s4443_s3, 4  ;;  %s3851_s26 = smov [#allocation9]   ;;  %s242_s25 = int_to_ptr.hbm [resolvable:$true] %s241_s25 }
  0x11   : > { %s243_s30 = sshll.u32 %s3851_s26, 4  ;;  %s267_s9 = sshll.u32 %s4445_s5, 4  ;;  %s244_s30 = int_to_ptr.vmem [resolvable:$true] %s243_s30  ;;  %s268_s9 = int_to_ptr.hbm [resolvable:$true] %s267_s9 }
  0x12   : > { %s3852_s10 = smov 256   ;;  %s3853_s11 = smov 16  }
  0x13   : > { %3568 = dma.hbm_to_vmem [thread:$0]  (!%p3928_p5), %s242_s25, 55296, %s244_s30, [#allocation8], %s3852_s10, %s3852_s10, %s3853_s11  }
  0x14   : > { %s3854_s12 = smov [#allocation12]   ;;  %s282_s17 = sshll.u32 %s4446_s6, 4  ;;  %s283_s17 = int_to_ptr.hbm [resolvable:$true] %s282_s17 }
  0x15   : > { %s269_s13 = sshll.u32 %s3854_s12, 4  ;;  %s3855_s18 = smov [#allocation13]   ;;  %s270_s13 = int_to_ptr.vmem [resolvable:$true] %s269_s13 }
  0x16   : > { %3574 = dma.hbm_to_vmem [thread:$0]  (!%p3928_p5), %s268_s9, 27648, %s270_s13, [#allocation11], %s3852_s10, %s3852_s10, %s3853_s11  }
  0x17   : > { %s284_s19 = sshll.u32 %s3855_s18, 4  ;;  %305 = sbr.rel (%p3914_p3) target bundleno = 1218 (0x4c2), region = 48  ;;  %s285_s19 = int_to_ptr.vmem [resolvable:$true] %s284_s19 }
  0x18   : > { %3577 = dma.hbm_to_vmem [thread:$0]  (!%p3928_p5), %s283_s17, 32, %s285_s19, [#allocation14]  }
  0x1c   : > { %3827 = dma.done.wait (%p3578_p2), [#allocation6], 25600  }
  0x1d   : > { %3829 = vsyncadd (%p3578_p2), [#allocation6], 4294941696 }
  0x1e   : > { %3831 = dma.done.wait (%p3578_p2), [#allocation8], 55360  }
  0x1f   : > { %3833 = vsyncadd (%p3578_p2), [#allocation8], 4294911936 }
  0x20   : > { %3835 = dma.done.wait (%p3578_p2), [#allocation11], 27680  }
  0x21   : > { %3837 = vsyncadd (%p3578_p2), [#allocation11], 4294939616 }
  0x22   : > { %3839 = dma.done.wait (%p3578_p2), [#allocation14], 32  }
  0x23   : > { %3841 = vsyncadd (%p3578_p2), [#allocation14], 4294967264  ;;  %p363_p6 = scmp.lt.s32.totalorder %s3909_s28, 1  ;;  %vm373_vm0 = vcmask 654336   ;;  %v3856_v0 = vmov 0.0   ;;  %v472_v2 = vld [vmem:[#allocation5 + $0x260] sm:$0xff] }
  0x24   : > { %374 = vst.msk [vmem:[#allocation2] sm:$0xff] %vm373_vm0, %v3856_v0  ;;  %s3857_s22 = smov 8   ;;  %488 = vmatpush.msra.mxu0 %v472_v2  ;;  %v473_v3 = vld [vmem:[#allocation5 + $0x268] sm:$0xff]  ;;  %v474_v4 = vld [vmem:[#allocation5 + $0x270] sm:$0xff]  ;;  %v475_v5 = vld [vmem:[#allocation5 + $0x278] sm:$0xff]  ;;  %vm376_vm1 = vcmask 650240  }
  0x25   : > { %s4451_s28 = smov (!%p363_p6, %s3909_s28), 1  ;;  %375 = vst.msk [vmem:[#allocation2 + $0x8] sm:$0xff] %vm373_vm0, %v3856_v0  ;;  %511 = vmatpush.msra.mxu1 %v473_v3  ;;  %534 = vmatpush.msra.mxu2 %v474_v4  ;;  %v468_v6 = vld [vmem:[#allocation5 + $0x240] sm:$0xff]  ;;  %v469_v7 = vld [vmem:[#allocation5 + $0x248] sm:$0xff]  ;;  %v470_v8 = vld [vmem:[#allocation5 + $0x250] sm:$0xff]  ;;  %vm388_vm2 = vcmask 588864  }
  0x26   : > { %1145 = vst [vmem:[#allocation3] sm:$0xff] %v3856_v0  ;;  %s3533_s29 = sshll.u32 %s4451_s28, 4  ;;  %557 = vmatpush.msra.mxu3 %v475_v5  ;;  %489 = vmatpush.msra.mxu0 %v468_v6  ;;  %v471_v9 = vld [vmem:[#allocation5 + $0x258] sm:$0xff]  ;;  %v464_v10 = vld [vmem:[#allocation5 + $0x220] sm:$0xff]  ;;  %v465_v11 = vld [vmem:[#allocation5 + $0x228] sm:$0xff]  ;;  %s3858_s23 = smov 32  }
  0x27   : > { %1146 = vst [vmem:[#allocation3 + $0x8] sm:$0xff] %v3856_v0  ;;  %s3985_s21 = scalar_lea.vmem %s4440_s0, %s3533_s29  ;;  %512 = vmatpush.msra.mxu1 %v469_v7  ;;  %535 = vmatpush.msra.mxu2 %v470_v8  ;;  %v466_v12 = vld [vmem:[#allocation5 + $0x230] sm:$0xff]  ;;  %v467_v13 = vld [vmem:[#allocation5 + $0x238] sm:$0xff]  ;;  %v460_v14 = vld [vmem:[#allocation5 + $0x200] sm:$0xff]  ;;  %vm1170_vm3 = vcmask 1040384   ;;  %vm1149_vm4 = vcmask 523264  }
  0x28   : > { %1147 = vst [vmem:[#allocation3 + $0x10] sm:$0xff] %v3856_v0  ;;  %v378_v1 = vld [vmem:[%s3985_s21] sm:$0xff]  ;;  %558 = vmatpush.msra.mxu3 %v471_v9  ;;  %490 = vmatpush.msra.mxu0 %v464_v10  ;;  %v462_v16 = vld [vmem:[#allocation5 + $0x210] sm:$0xff]  ;;  %v463_v18 = vld [vmem:[#allocation5 + $0x218] sm:$0xff]  ;;  %vm1207_vm5 = vcmask 261120   ;;  %vm1160_vm6 = vcmask 517120  }
  0x29   : > { %1148 = vst [vmem:[#allocation3 + $0x18] sm:$0xff] %v3856_v0  ;;  %382 = vrot.lane.b32.xlu0 %v378_v1, %s3857_s22  ;;  %v461_v15 = vld [vmem:[#allocation5 + $0x208] sm:$0xff]  ;;  %v379_v17 = vld [vmem:[%s3985_s21 + $0x8] sm:$0xff]  ;;  %513 = vmatpush.msra.mxu1 %v465_v11  ;;  %v456_v19 = vld [vmem:[#allocation5 + $0x1e0] sm:$0xff]  ;;  %vm1232_vm7 = vcmask 1047809   ;;  %vm1237_vm8 = vcmask 261121  }
  0x2a   : > { %1151 = vst [vmem:[#allocation3 + $0x28] sm:$0xff] %v3856_v0  ;;  %536 = vmatpush.msra.mxu2 %v466_v12  ;;  %559 = vmatpush.msra.mxu3 %v467_v13  ;;  %v457_v20 = vld [vmem:[#allocation5 + $0x1e8] sm:$0xff]  ;;  %v458_v21 = vld [vmem:[#allocation5 + $0x1f0] sm:$0xff]  ;;  %v459_v22 = vld [vmem:[#allocation5 + $0x1f8] sm:$0xff]  ;;  %vm1250_vm9 = vcmask 253952   ;;  %vm1576_vm10 = vcmask 1046528  }
  0x2b   : > { %1156 = vst [vmem:[#allocation3 + $0x50] sm:$0x3] %v3856_v0  ;;  %491 = vmatpush.msra.mxu0 %v460_v14  ;;  %514 = vmatpush.msra.mxu1 %v461_v15  ;;  %v452_v23 = vld [vmem:[#allocation5 + $0x1c0] sm:$0xff]  ;;  %v453_v24 = vld [vmem:[#allocation5 + $0x1c8] sm:$0xff]  ;;  %v454_v25 = vld [vmem:[#allocation5 + $0x1d0] sm:$0xff]  ;;  %vm1245_vm11 = vcmask 1040640  }
  0x2c   : > { %1157 = vst [vmem:[#allocation3 + $0x58] sm:$0x3] %v3856_v0  ;;  %537 = vmatpush.msra.mxu2 %v462_v16  ;;  %560 = vmatpush.msra.mxu3 %v463_v18  ;;  %v455_v26 = vld [vmem:[#allocation5 + $0x1d8] sm:$0xff]  ;;  %v448_v27 = vld [vmem:[#allocation5 + $0x1a0] sm:$0xff]  ;;  %v449_v28 = vld [vmem:[#allocation5 + $0x1a8] sm:$0xff]  ;;  %vm1239_vm12 = vcmask 1047808  }
  0x2d   : > { %1158 = vst [vmem:[#allocation3 + $0x60] sm:$0x3] %v3856_v0  ;;  %492 = vmatpush.msra.mxu0 %v456_v19  ;;  %515 = vmatpush.msra.mxu1 %v457_v20  ;;  %v450_v29 = vld [vmem:[#allocation5 + $0x1b0] sm:$0xff]  ;;  %v451_v30 = vld [vmem:[#allocation5 + $0x1b8] sm:$0xff]  ;;  %v444_v31 = vld [vmem:[#allocation5 + $0x180] sm:$0xff]  ;;  %vm2244_vm13 = vcmask 1045504  }
  0x2e   : > { %1159 = vst [vmem:[#allocation3 + $0x68] sm:$0x3] %v3856_v0  ;;  %538 = vmatpush.msra.mxu2 %v458_v21  ;;  %561 = vmatpush.msra.mxu3 %v459_v22  ;;  %v445_v32 = vld [vmem:[#allocation5 + $0x188] sm:$0xff]  ;;  %v446_v33 = vld [vmem:[#allocation5 + $0x190] sm:$0xff]  ;;  %v447_v34 = vld [vmem:[#allocation5 + $0x198] sm:$0xff]  ;;  %s3859_s25 = smov 16  }
  0x2f   : > { %2530 = vst [vmem:[#allocation4] sm:$0xff] %v3856_v0  ;;  %493 = vmatpush.msra.mxu0 %v452_v23  ;;  %516 = vmatpush.msra.mxu1 %v453_v24  ;;  %v440_v35 = vld [vmem:[#allocation5 + $0x160] sm:$0xff]  ;;  %v441_v36 = vld [vmem:[#allocation5 + $0x168] sm:$0xff]  ;;  %v442_v37 = vld [vmem:[#allocation5 + $0x170] sm:$0xff]  ;;  %vm2575_vm14 = vcmask 1047681   ;;  %vm2538_vm15 = vcmask 254976  }
  0x30   : > { %2531 = vst [vmem:[#allocation4 + $0x8] sm:$0xff] %v3856_v0  ;;  %539 = vmatpush.msra.mxu2 %v454_v25  ;;  %562 = vmatpush.msra.mxu3 %v455_v26  ;;  %v443_v38 = vld [vmem:[#allocation5 + $0x178] sm:$0xff]  ;;  %v436_v39 = vld [vmem:[#allocation5 + $0x140] sm:$0xff]  ;;  %v437_v40 = vld [vmem:[#allocation5 + $0x148] sm:$0xff]  ;;  %s3534_s26 = sshll.u32 %s4451_s28, 5 }
  0x31   : > { %2533 = vst [vmem:[#allocation4 + $0x18] sm:$0xff] %v3856_v0  ;;  %384 = vrot.lane.b32.xlu0 %v379_v17, %s3857_s22  ;;  %494 = vmatpush.msra.mxu0 %v448_v27  ;;  %v438_v41 = vld [vmem:[#allocation5 + $0x150] sm:$0xff]  ;;  %v439_v42 = vld [vmem:[#allocation5 + $0x158] sm:$0xff]  ;;  %v429_v43 = vld [vmem:[#allocation5 + $0x120] sm:$0xff]  ;;  %s4431_s8 = scalar_lea.vmem %s4447_s7, %s3534_s26 }
  0x32   : > { %2536 = vst [vmem:[#allocation4 + $0x30] sm:$0x3] %v3856_v0  ;;  %517 = vmatpush.msra.mxu1 %v449_v28  ;;  %540 = vmatpush.msra.mxu2 %v450_v29  ;;  %v430_v44 = vld [vmem:[#allocation5 + $0x128] sm:$0xff]  ;;  %v431_v45 = vld [vmem:[#allocation5 + $0x130] sm:$0xff]  ;;  %v432_v46 = vld [vmem:[#allocation5 + $0x138] sm:$0xff] }
  0x33   : > { %2537 = vst [vmem:[#allocation4 + $0x38] sm:$0x3] %v3856_v0  ;;  %563 = vmatpush.msra.mxu3 %v451_v30  ;;  %495 = vmatpush.msra.mxu0 %v444_v31  ;;  %v425_v47 = vld [vmem:[#allocation5 + $0x100] sm:$0xff]  ;;  %v426_v48 = vld [vmem:[#allocation5 + $0x108] sm:$0xff]  ;;  %v427_v49 = vld [vmem:[#allocation5 + $0x110] sm:$0xff] }
  0x34   : > { %518 = vmatpush.msra.mxu1 %v445_v32  ;;  %541 = vmatpush.msra.mxu2 %v446_v33  ;;  %v428_v50 = vld [vmem:[#allocation5 + $0x118] sm:$0xff]  ;;  %v421_v51 = vld [vmem:[#allocation5 + $0xe0] sm:$0xff]  ;;  %v422_v52 = vld [vmem:[#allocation5 + $0xe8] sm:$0xff]  ;;  %377 = vst.msk [vmem:[#allocation2 + $0x10] sm:$0xf] %vm376_vm1, %v3856_v0  ;;  %vm2584_vm1 = vcmask 1040512  }
  0x35   : > { %564 = vmatpush.msra.mxu3 %v447_v34  ;;  %496 = vmatpush.msra.mxu0 %v440_v35  ;;  %v423_v53 = vld [vmem:[#allocation5 + $0xf0] sm:$0xff]  ;;  %v424_v54 = vld [vmem:[#allocation5 + $0xf8] sm:$0xff]  ;;  %v417_v55 = vld [vmem:[#allocation5 + $0xc0] sm:$0xff] }
  0x36   : > { %519 = vmatpush.msra.mxu1 %v441_v36  ;;  %542 = vmatpush.msra.mxu2 %v442_v37  ;;  %v418_v56 = vld [vmem:[#allocation5 + $0xc8] sm:$0xff]  ;;  %v419_v57 = vld [vmem:[#allocation5 + $0xd0] sm:$0xff]  ;;  %v420_v58 = vld [vmem:[#allocation5 + $0xd8] sm:$0xff] }
  0x37   : > { %565 = vmatpush.msra.mxu3 %v443_v38  ;;  %497 = vmatpush.msra.mxu0 %v436_v39  ;;  %v413_v59 = vld [vmem:[#allocation5 + $0xa0] sm:$0xff]  ;;  %v414_v60 = vld [vmem:[#allocation5 + $0xa8] sm:$0xff]  ;;  %v415_v61 = vld [vmem:[#allocation5 + $0xb0] sm:$0xff] }
  0x38   : > { %520 = vmatpush.msra.mxu1 %v437_v40  ;;  %543 = vmatpush.msra.mxu2 %v438_v41  ;;  %v416_v62 = vld [vmem:[#allocation5 + $0xb8] sm:$0xff]  ;;  %v409_v63 = vld [vmem:[#allocation5 + $0x80] sm:$0xff]  ;;  %v410_v1 = vld [vmem:[#allocation5 + $0x88] sm:$0xff] }
  0x39   : > { %566 = vmatpush.msra.mxu3 %v439_v42  ;;  %586 = vmatpush.msrb.mxu0 %v429_v43  ;;  %v411_v2 = vld [vmem:[#allocation5 + $0x90] sm:$0xff]  ;;  %v412_v3 = vld [vmem:[#allocation5 + $0x98] sm:$0xff]  ;;  %v405_v0 = vld [vmem:[#allocation5 + $0x60] sm:$0xff] }
  0x3a   : > { %609 = vmatpush.msrb.mxu1 %v430_v44  ;;  %632 = vmatpush.msrb.mxu2 %v431_v45  ;;  %v406_v4 = vld [vmem:[#allocation5 + $0x68] sm:$0xff]  ;;  %v407_v5 = vld [vmem:[#allocation5 + $0x70] sm:$0xff]  ;;  %v408_v6 = vld [vmem:[#allocation5 + $0x78] sm:$0xff] }
  0x3b   : > { %655 = vmatpush.msrb.mxu3 %v432_v46  ;;  %587 = vmatpush.msrb.mxu0 %v425_v47  ;;  %v401_v7 = vld [vmem:[#allocation5 + $0x40] sm:$0xff]  ;;  %v402_v8 = vld [vmem:[#allocation5 + $0x48] sm:$0xff]  ;;  %v403_v9 = vld [vmem:[#allocation5 + $0x50] sm:$0xff] }
  0x3c   : > { %610 = vmatpush.msrb.mxu1 %v426_v48  ;;  %633 = vmatpush.msrb.mxu2 %v427_v49  ;;  %v404_v10 = vld [vmem:[#allocation5 + $0x58] sm:$0xff]  ;;  %v397_v11 = vld [vmem:[#allocation5 + $0x20] sm:$0xff]  ;;  %v398_v12 = vld [vmem:[#allocation5 + $0x28] sm:$0xff] }
  0x3d   : > { %656 = vmatpush.msrb.mxu3 %v428_v50  ;;  %588 = vmatpush.msrb.mxu0 %v421_v51  ;;  %v399_v13 = vld [vmem:[#allocation5 + $0x30] sm:$0xff]  ;;  %v400_v14 = vld [vmem:[#allocation5 + $0x38] sm:$0xff]  ;;  %v393_v15 = vld [vmem:[#allocation5] sm:$0xff] }
  0x3e   : > { %611 = vmatpush.msrb.mxu1 %v422_v52  ;;  %634 = vmatpush.msrb.mxu2 %v423_v53  ;;  %v394_v16 = vld [vmem:[#allocation5 + $0x8] sm:$0xff]  ;;  %v395_v17 = vld [vmem:[#allocation5 + $0x10] sm:$0xff]  ;;  %v396_v18 = vld [vmem:[#allocation5 + $0x18] sm:$0xff] }
  0x3f   : > { %657 = vmatpush.msrb.mxu3 %v424_v54  ;;  %589 = vmatpush.msrb.mxu0 %v417_v55  ;;  %v711_v22 = vld [vmem:[#allocation5 + $0x3a0] sm:$0xff]  ;;  %v712_v23 = vld [vmem:[#allocation5 + $0x3a8] sm:$0xff]  ;;  %v713_v24 = vld [vmem:[#allocation5 + $0x3b0] sm:$0xff] }
  0x40   : > { %612 = vmatpush.msrb.mxu1 %v418_v56  ;;  %635 = vmatpush.msrb.mxu2 %v419_v57  ;;  %v714_v25 = vld [vmem:[#allocation5 + $0x3b8] sm:$0xff]  ;;  %v707_v26 = vld [vmem:[#allocation5 + $0x380] sm:$0xff]  ;;  %v708_v27 = vld [vmem:[#allocation5 + $0x388] sm:$0xff] }
  0x41   : > { %658 = vmatpush.msrb.mxu3 %v420_v58  ;;  %590 = vmatpush.msrb.mxu0 %v413_v59  ;;  %v709_v28 = vld [vmem:[#allocation5 + $0x390] sm:$0xff]  ;;  %v710_v29 = vld [vmem:[#allocation5 + $0x398] sm:$0xff]  ;;  %v703_v30 = vld [vmem:[#allocation5 + $0x360] sm:$0xff] }
  0x42   : > { %613 = vmatpush.msrb.mxu1 %v414_v60  ;;  %636 = vmatpush.msrb.mxu2 %v415_v61  ;;  %v704_v31 = vld [vmem:[#allocation5 + $0x368] sm:$0xff]  ;;  %v705_v32 = vld [vmem:[#allocation5 + $0x370] sm:$0xff]  ;;  %v706_v33 = vld [vmem:[#allocation5 + $0x378] sm:$0xff] }
  0x43   : > { %659 = vmatpush.msrb.mxu3 %v416_v62  ;;  %591 = vmatpush.msrb.mxu0 %v409_v63  ;;  %v699_v35 = vld [vmem:[#allocation5 + $0x340] sm:$0xff]  ;;  %v700_v36 = vld [vmem:[#allocation5 + $0x348] sm:$0xff]  ;;  %v701_v37 = vld [vmem:[#allocation5 + $0x350] sm:$0xff] }
  0x44   : > { %614 = vmatpush.msrb.mxu1 %v410_v1  ;;  %637 = vmatpush.msrb.mxu2 %v411_v2  ;;  %v702_v38 = vld [vmem:[#allocation5 + $0x358] sm:$0xff]  ;;  %v695_v39 = vld [vmem:[#allocation5 + $0x320] sm:$0xff]  ;;  %v696_v40 = vld [vmem:[#allocation5 + $0x328] sm:$0xff] }
  0x45   : > { %660 = vmatpush.msrb.mxu3 %v412_v3  ;;  %592 = vmatpush.msrb.mxu0 %v405_v0  ;;  %v697_v41 = vld [vmem:[#allocation5 + $0x330] sm:$0xff]  ;;  %v698_v42 = vld [vmem:[#allocation5 + $0x338] sm:$0xff]  ;;  %v691_v43 = vld [vmem:[#allocation5 + $0x300] sm:$0xff] }
  0x46   : > { %615 = vmatpush.msrb.mxu1 %v406_v4  ;;  %638 = vmatpush.msrb.mxu2 %v407_v5  ;;  %v692_v44 = vld [vmem:[#allocation5 + $0x308] sm:$0xff]  ;;  %v693_v45 = vld [vmem:[#allocation5 + $0x310] sm:$0xff]  ;;  %v694_v46 = vld [vmem:[#allocation5 + $0x318] sm:$0xff] }
  0x47   : > { %661 = vmatpush.msrb.mxu3 %v408_v6  ;;  %593 = vmatpush.msrb.mxu0 %v401_v7  ;;  %v687_v48 = vld [vmem:[#allocation5 + $0x2e0] sm:$0xff]  ;;  %v688_v49 = vld [vmem:[#allocation5 + $0x2e8] sm:$0xff]  ;;  %v689_v50 = vld [vmem:[#allocation5 + $0x2f0] sm:$0xff] }
  0x48   : > { %616 = vmatpush.msrb.mxu1 %v402_v8  ;;  %639 = vmatpush.msrb.mxu2 %v403_v9  ;;  %v690_v51 = vld [vmem:[#allocation5 + $0x2f8] sm:$0xff]  ;;  %v683_v52 = vld [vmem:[#allocation5 + $0x2c0] sm:$0xff]  ;;  %v684_v53 = vld [vmem:[#allocation5 + $0x2c8] sm:$0xff] }
  0x49   : > { %662 = vmatpush.msrb.mxu3 %v404_v10  ;;  %594 = vmatpush.msrb.mxu0 %v397_v11  ;;  %v685_v54 = vld [vmem:[#allocation5 + $0x2d0] sm:$0xff]  ;;  %v686_v55 = vld [vmem:[#allocation5 + $0x2d8] sm:$0xff]  ;;  %v679_v56 = vld [vmem:[#allocation5 + $0x2a0] sm:$0xff] }
  0x4a   : > { %617 = vmatpush.msrb.mxu1 %v398_v12  ;;  %640 = vmatpush.msrb.mxu2 %v399_v13  ;;  %v680_v57 = vld [vmem:[#allocation5 + $0x2a8] sm:$0xff]  ;;  %v681_v58 = vld [vmem:[#allocation5 + $0x2b0] sm:$0xff]  ;;  %v682_v59 = vld [vmem:[#allocation5 + $0x2b8] sm:$0xff] }
  0x4b   : > { %663 = vmatpush.msrb.mxu3 %v400_v14  ;;  %595 = vmatpush.msrb.mxu0 %v393_v15  ;;  %v675_v61 = vld [vmem:[#allocation5 + $0x280] sm:$0xff]  ;;  %v676_v62 = vld [vmem:[#allocation5 + $0x288] sm:$0xff]  ;;  %v677_v63 = vld [vmem:[#allocation5 + $0x290] sm:$0xff] }
  0x4c   : > { %618 = vmatpush.msrb.mxu1 %v394_v16  ;;  %641 = vmatpush.msrb.mxu2 %v395_v17  ;;  %v678_v1 = vld [vmem:[#allocation5 + $0x298] sm:$0xff]  ;;  %v860_v2 = vld [vmem:[#allocation5 + $0x4e0] sm:$0xff]  ;;  %v861_v3 = vld [vmem:[#allocation5 + $0x4e8] sm:$0xff] }
  0x4d   : > { %664 = vmatpush.msrb.mxu3 %v396_v18  ;;  %v862_v0 = vld [vmem:[#allocation5 + $0x4f0] sm:$0xff]  ;;  %v863_v4 = vld [vmem:[#allocation5 + $0x4f8] sm:$0xff]  ;;  %v856_v5 = vld [vmem:[#allocation5 + $0x4c0] sm:$0xff] }
  0x4e   : > { %v857_v6 = vld [vmem:[#allocation5 + $0x4c8] sm:$0xff]  ;;  %v858_v7 = vld [vmem:[#allocation5 + $0x4d0] sm:$0xff]  ;;  %v859_v8 = vld [vmem:[#allocation5 + $0x4d8] sm:$0xff] }
  0x4f   : > { %v852_v9 = vld [vmem:[#allocation5 + $0x4a0] sm:$0xff]  ;;  %v853_v10 = vld [vmem:[#allocation5 + $0x4a8] sm:$0xff]  ;;  %v854_v11 = vld [vmem:[#allocation5 + $0x4b0] sm:$0xff] }
  0x50   : > { %v855_v12 = vld [vmem:[#allocation5 + $0x4b8] sm:$0xff]  ;;  %v848_v14 = vld [vmem:[#allocation5 + $0x480] sm:$0xff]  ;;  %v849_v15 = vld [vmem:[#allocation5 + $0x488] sm:$0xff] }
  0x51   : > { %v850_v16 = vld [vmem:[#allocation5 + $0x490] sm:$0xff]  ;;  %v851_v17 = vld [vmem:[#allocation5 + $0x498] sm:$0xff]  ;;  %v844_v18 = vld [vmem:[#allocation5 + $0x460] sm:$0xff] }
  0x9b   : > { %v383_v19 = vpop.permute.xlu0 %382 }
  0x9c   : > { %389 = vst.msk [vmem:[#allocation2 + $0x2] sm:$0xff] %vm388_vm2, %v383_v19  ;;  %v845_v19 = vld [vmem:[#allocation5 + $0x468] sm:$0xff] }
  0xa3   : > { %v385_v20 = vpop.permute.xlu0 %384  ;;  %v433_v21 = vld [vmem:[#allocation2 + $0x1] sm:$0xff] }
  0xa4   : > { %390 = vst.msk [vmem:[#allocation2 + $0xa] sm:$0xff] %vm388_vm2, %v385_v20  ;;  %3467 = vmatmul.msk.f32.vlgmr.msra.gmra.mxu0 %vm373_vm0, %v433_v21  ;;  %3469 = vmatmul.msk.f32.vlgmr.msra.gmra.mxu1 %vm373_vm0, %v433_v21  ;;  %v391_v47 = vld [vmem:[#allocation2] sm:$0xff]  ;;  %v846_v20 = vld [vmem:[#allocation5 + $0x470] sm:$0xff]  ;;  %vm2562_vm2 = vcmask 130048  }
  0xa5   : > { %3471 = vmatmul.msk.f32.vlgmr.msra.gmra.mxu2 %vm373_vm0, %v433_v21  ;;  %3473 = vmatmul.msk.f32.vlgmr.msra.gmra.mxu3 %vm373_vm0, %v433_v21  ;;  %v672_v13 = vld [vmem:[#allocation2 + $0x2] sm:$0xff]  ;;  %v847_v21 = vld [vmem:[#allocation5 + $0x478] sm:$0xff] }
  0xa6   : > { %727 = vmatpush.msra.mxu0 %v711_v22  ;;  %750 = vmatpush.msra.mxu1 %v712_v23  ;;  %v840_v22 = vld [vmem:[#allocation5 + $0x440] sm:$0xff]  ;;  %v841_v23 = vld [vmem:[#allocation5 + $0x448] sm:$0xff] }
  0xa7   : > { %773 = vmatpush.msra.mxu2 %v713_v24  ;;  %796 = vmatpush.msra.mxu3 %v714_v25  ;;  %v842_v24 = vld [vmem:[#allocation5 + $0x450] sm:$0xff]  ;;  %v843_v25 = vld [vmem:[#allocation5 + $0x458] sm:$0xff] }
  0xa8   : > { %728 = vmatpush.msra.mxu0 %v707_v26  ;;  %751 = vmatpush.msra.mxu1 %v708_v27  ;;  %v836_v26 = vld [vmem:[#allocation5 + $0x420] sm:$0xff]  ;;  %v837_v27 = vld [vmem:[#allocation5 + $0x428] sm:$0xff] }
  0xa9   : > { %774 = vmatpush.msra.mxu2 %v709_v28  ;;  %797 = vmatpush.msra.mxu3 %v710_v29  ;;  %v838_v28 = vld [vmem:[#allocation5 + $0x430] sm:$0xff]  ;;  %v839_v29 = vld [vmem:[#allocation5 + $0x438] sm:$0xff] }
  0xaa   : > { %729 = vmatpush.msra.mxu0 %v703_v30  ;;  %752 = vmatpush.msra.mxu1 %v704_v31  ;;  %v832_v31 = vld [vmem:[#allocation5 + $0x400] sm:$0xff] }
  0xab   : > { %v434_v34 = vld [vmem:[#allocation2 + $0x9] sm:$0xff]  ;;  %775 = vmatpush.msra.mxu2 %v705_v32  ;;  %798 = vmatpush.msra.mxu3 %v706_v33  ;;  %v833_v32 = vld [vmem:[#allocation5 + $0x408] sm:$0xff] }
  0xac   : > { %3468 = vmatmul.msk.f32.gmra.mxu0 %vm373_vm0, %v434_v34  ;;  %3470 = vmatmul.msk.f32.gmra.mxu1 %vm373_vm0, %v434_v34  ;;  %v392_v60 = vld [vmem:[#allocation2 + $0x8] sm:$0xff] }
  0xad   : > { %3472 = vmatmul.msk.f32.gmra.mxu2 %vm373_vm0, %v434_v34  ;;  %3474 = vmatmul.msk.f32.gmra.mxu3 %vm373_vm0, %v434_v34  ;;  %v673_v30 = vld [vmem:[#allocation2 + $0xa] sm:$0xff] }
  0xae   : > { %730 = vmatpush.msra.mxu0 %v699_v35  ;;  %753 = vmatpush.msra.mxu1 %v700_v36  ;;  %v834_v33 = vld [vmem:[#allocation5 + $0x410] sm:$0xff]  ;;  %v835_v34 = vld [vmem:[#allocation5 + $0x418] sm:$0xff]  ;;  %v828_v35 = vld [vmem:[#allocation5 + $0x3e0] sm:$0xff] }
  0xaf   : > { %776 = vmatpush.msra.mxu2 %v701_v37  ;;  %799 = vmatpush.msra.mxu3 %v702_v38  ;;  %v829_v36 = vld [vmem:[#allocation5 + $0x3e8] sm:$0xff]  ;;  %v830_v37 = vld [vmem:[#allocation5 + $0x3f0] sm:$0xff]  ;;  %v831_v38 = vld [vmem:[#allocation5 + $0x3f8] sm:$0xff] }
  0xb0   : > { %731 = vmatpush.msra.mxu0 %v695_v39  ;;  %754 = vmatpush.msra.mxu1 %v696_v40  ;;  %v824_v39 = vld [vmem:[#allocation5 + $0x3c0] sm:$0xff]  ;;  %v825_v40 = vld [vmem:[#allocation5 + $0x3c8] sm:$0xff] }
  0xb1   : > { %777 = vmatpush.msra.mxu2 %v697_v41  ;;  %800 = vmatpush.msra.mxu3 %v698_v42  ;;  %v826_v41 = vld [vmem:[#allocation5 + $0x3d0] sm:$0xff]  ;;  %v827_v42 = vld [vmem:[#allocation5 + $0x3d8] sm:$0xff] }
  0xb2   : > { %732 = vmatpush.msra.mxu0 %v691_v43  ;;  %755 = vmatpush.msra.mxu1 %v692_v44  ;;  %v1009_v43 = vld [vmem:[#allocation5 + $0x620] sm:$0xff]  ;;  %v1010_v44 = vld [vmem:[#allocation5 + $0x628] sm:$0xff] }
  0xb3   : > { %778 = vmatpush.msra.mxu2 %v693_v45  ;;  %801 = vmatpush.msra.mxu3 %v694_v46  ;;  %v1011_v45 = vld [vmem:[#allocation5 + $0x630] sm:$0xff]  ;;  %v1012_v46 = vld [vmem:[#allocation5 + $0x638] sm:$0xff] }
  0xb4   : > { %3475 = vmatmul.msk.f32.vlgmr.msrb.gmra.mxu0 %vm373_vm0, %v391_v47  ;;  %3477 = vmatmul.msk.f32.vlgmr.msrb.gmra.mxu1 %vm373_vm0, %v391_v47 }
  0xb5   : > { %3479 = vmatmul.msk.f32.vlgmr.msrb.gmra.mxu2 %vm373_vm0, %v391_v47  ;;  %3481 = vmatmul.msk.f32.vlgmr.msrb.gmra.mxu3 %vm373_vm0, %v391_v47  ;;  %v1005_v47 = vld [vmem:[#allocation5 + $0x600] sm:$0xff] }
  0xb6   : > { %733 = vmatpush.msra.mxu0 %v687_v48  ;;  %756 = vmatpush.msra.mxu1 %v688_v49  ;;  %v1006_v48 = vld [vmem:[#allocation5 + $0x608] sm:$0xff]  ;;  %v1007_v49 = vld [vmem:[#allocation5 + $0x610] sm:$0xff] }
  0xb7   : > { %779 = vmatpush.msra.mxu2 %v689_v50  ;;  %802 = vmatpush.msra.mxu3 %v690_v51  ;;  %v1008_v50 = vld [vmem:[#allocation5 + $0x618] sm:$0xff]  ;;  %v821_v51 = vld [vmem:[#allocation2 + $0x3] sm:$0xff] }
  0xb8   : > { %734 = vmatpush.msra.mxu0 %v683_v52  ;;  %757 = vmatpush.msra.mxu1 %v684_v53  ;;  %v1001_v52 = vld [vmem:[#allocation5 + $0x5e0] sm:$0xff]  ;;  %v1002_v53 = vld [vmem:[#allocation5 + $0x5e8] sm:$0xff] }
  0xb9   : > { %780 = vmatpush.msra.mxu2 %v685_v54  ;;  %803 = vmatpush.msra.mxu3 %v686_v55  ;;  %v1003_v54 = vld [vmem:[#allocation5 + $0x5f0] sm:$0xff]  ;;  %v1004_v55 = vld [vmem:[#allocation5 + $0x5f8] sm:$0xff] }
  0xba   : > { %735 = vmatpush.msra.mxu0 %v679_v56  ;;  %758 = vmatpush.msra.mxu1 %v680_v57  ;;  %v997_v56 = vld [vmem:[#allocation5 + $0x5c0] sm:$0xff]  ;;  %v998_v57 = vld [vmem:[#allocation5 + $0x5c8] sm:$0xff] }
  0xbb   : > { %781 = vmatpush.msra.mxu2 %v681_v58  ;;  %804 = vmatpush.msra.mxu3 %v682_v59  ;;  %v999_v58 = vld [vmem:[#allocation5 + $0x5d0] sm:$0xff]  ;;  %v1000_v59 = vld [vmem:[#allocation5 + $0x5d8] sm:$0xff] }
  0xbc   : > { %3476 = vmatmul.msk.f32.gmra.mxu0 %vm373_vm0, %v392_v60  ;;  %3478 = vmatmul.msk.f32.gmra.mxu1 %vm373_vm0, %v392_v60 }
  0xbd   : > { %3480 = vmatmul.msk.f32.gmra.mxu2 %vm373_vm0, %v392_v60  ;;  %3482 = vmatmul.msk.f32.gmra.mxu3 %vm373_vm0, %v392_v60  ;;  %v993_v60 = vld [vmem:[#allocation5 + $0x5a0] sm:$0xff] }
  0xbe   : > { %736 = vmatpush.msra.mxu0 %v675_v61  ;;  %759 = vmatpush.msra.mxu1 %v676_v62  ;;  %v994_v61 = vld [vmem:[#allocation5 + $0x5a8] sm:$0xff]  ;;  %v995_v62 = vld [vmem:[#allocation5 + $0x5b0] sm:$0xff] }
  0xbf   : > { %782 = vmatpush.msra.mxu2 %v677_v63  ;;  %805 = vmatpush.msra.mxu3 %v678_v1  ;;  %v996_v63 = vld [vmem:[#allocation5 + $0x5b8] sm:$0xff]  ;;  %v989_v1 = vld [vmem:[#allocation5 + $0x580] sm:$0xff] }
  0xc0   : > { %876 = vmatpush.msrb.mxu0 %v860_v2  ;;  %899 = vmatpush.msrb.mxu1 %v861_v3  ;;  %v990_v2 = vld [vmem:[#allocation5 + $0x588] sm:$0xff]  ;;  %v991_v3 = vld [vmem:[#allocation5 + $0x590] sm:$0xff] }
  0xc1   : > { %922 = vmatpush.msrb.mxu2 %v862_v0  ;;  %945 = vmatpush.msrb.mxu3 %v863_v4  ;;  %v992_v0 = vld [vmem:[#allocation5 + $0x598] sm:$0xff] }
  0xc2   : > { %877 = vmatpush.msrb.mxu0 %v856_v5  ;;  %900 = vmatpush.msrb.mxu1 %v857_v6  ;;  %v822_v4 = vld [vmem:[#allocation2 + $0xb] sm:$0xff]  ;;  %v985_v5 = vld [vmem:[#allocation5 + $0x560] sm:$0xff]  ;;  %v986_v6 = vld [vmem:[#allocation5 + $0x568] sm:$0xff] }
  0xc3   : > { %923 = vmatpush.msrb.mxu2 %v858_v7  ;;  %946 = vmatpush.msrb.mxu3 %v859_v8  ;;  %v987_v7 = vld [vmem:[#allocation5 + $0x570] sm:$0xff]  ;;  %v988_v8 = vld [vmem:[#allocation5 + $0x578] sm:$0xff] }
  0xc4   : > { %878 = vmatpush.msrb.mxu0 %v852_v9  ;;  %901 = vmatpush.msrb.mxu1 %v853_v10  ;;  %v981_v9 = vld [vmem:[#allocation5 + $0x540] sm:$0xff]  ;;  %v982_v10 = vld [vmem:[#allocation5 + $0x548] sm:$0xff] }
  0xc5   : > { %924 = vmatpush.msrb.mxu2 %v854_v11  ;;  %947 = vmatpush.msrb.mxu3 %v855_v12  ;;  %v983_v11 = vld [vmem:[#allocation5 + $0x550] sm:$0xff]  ;;  %v984_v12 = vld [vmem:[#allocation5 + $0x558] sm:$0xff] }
  0xc6   : > { %3483 = vmatmul.msk.f32.vlgmr.msra.gmra.mxu0 %vm373_vm0, %v672_v13  ;;  %3485 = vmatmul.msk.f32.vlgmr.msra.gmra.mxu1 %vm373_vm0, %v672_v13 }
  0xc7   : > { %3487 = vmatmul.msk.f32.vlgmr.msra.gmra.mxu2 %vm373_vm0, %v672_v13  ;;  %3489 = vmatmul.msk.f32.vlgmr.msra.gmra.mxu3 %vm373_vm0, %v672_v13  ;;  %v977_v13 = vld [vmem:[#allocation5 + $0x520] sm:$0xff] }
  0xc8   : > { %879 = vmatpush.msrb.mxu0 %v848_v14  ;;  %902 = vmatpush.msrb.mxu1 %v849_v15  ;;  %v978_v14 = vld [vmem:[#allocation5 + $0x528] sm:$0xff]  ;;  %v979_v15 = vld [vmem:[#allocation5 + $0x530] sm:$0xff] }
  0xc9   : > { %925 = vmatpush.msrb.mxu2 %v850_v16  ;;  %948 = vmatpush.msrb.mxu3 %v851_v17  ;;  %v980_v16 = vld [vmem:[#allocation5 + $0x538] sm:$0xff]  ;;  %v973_v17 = vld [vmem:[#allocation5 + $0x500] sm:$0xff] }
  0xca   : > { %880 = vmatpush.msrb.mxu0 %v844_v18  ;;  %903 = vmatpush.msrb.mxu1 %v845_v19  ;;  %v974_v18 = vld [vmem:[#allocation5 + $0x508] sm:$0xff]  ;;  %v975_v19 = vld [vmem:[#allocation5 + $0x510] sm:$0xff] }
  0xcb   : > { %926 = vmatpush.msrb.mxu2 %v846_v20  ;;  %949 = vmatpush.msrb.mxu3 %v847_v21  ;;  %v976_v20 = vld [vmem:[#allocation5 + $0x518] sm:$0xff]  ;;  %v970_v21 = vld [vmem:[#allocation2 + $0x4] sm:$0xff] }
  0xcc   : > { %881 = vmatpush.msrb.mxu0 %v840_v22  ;;  %904 = vmatpush.msrb.mxu1 %v841_v23  ;;  %v971_v22 = vld [vmem:[#allocation2 + $0xc] sm:$0xff] }
  0xcd   : > { %927 = vmatpush.msrb.mxu2 %v842_v24  ;;  %950 = vmatpush.msrb.mxu3 %v843_v25 }
  0xce   : > { %882 = vmatpush.msrb.mxu0 %v836_v26  ;;  %905 = vmatpush.msrb.mxu1 %v837_v27 }
  0xcf   : > { %928 = vmatpush.msrb.mxu2 %v838_v28  ;;  %951 = vmatpush.msrb.mxu3 %v839_v29 }
  0xd0   : > { %3484 = vmatmul.msk.f32.gmra.mxu0 %vm373_vm0, %v673_v30  ;;  %3486 = vmatmul.msk.f32.gmra.mxu1 %vm373_vm0, %v673_v30 }
  0xd1   : > { %3488 = vmatmul.msk.f32.gmra.mxu2 %vm373_vm0, %v673_v30  ;;  %3490 = vmatmul.msk.f32.gmra.mxu3 %vm373_vm0, %v673_v30 }
  0xd2   : > { %883 = vmatpush.msrb.mxu0 %v832_v31  ;;  %906 = vmatpush.msrb.mxu1 %v833_v32 }
  0xd3   : > { %929 = vmatpush.msrb.mxu2 %v834_v33  ;;  %952 = vmatpush.msrb.mxu3 %v835_v34 }
  0xd4   : > { %884 = vmatpush.msrb.mxu0 %v828_v35  ;;  %907 = vmatpush.msrb.mxu1 %v829_v36 }
  0xd5   : > { %930 = vmatpush.msrb.mxu2 %v830_v37  ;;  %953 = vmatpush.msrb.mxu3 %v831_v38 }
  0xd6   : > { %885 = vmatpush.msrb.mxu0 %v824_v39  ;;  %908 = vmatpush.msrb.mxu1 %v825_v40 }
  0xd7   : > { %931 = vmatpush.msrb.mxu2 %v826_v41  ;;  %954 = vmatpush.msrb.mxu3 %v827_v42 }
  0xd8   : > { %1025 = vmatpush.msra.mxu0 %v1009_v43  ;;  %1048 = vmatpush.msra.mxu1 %v1010_v44 }
  0xd9   : > { %1071 = vmatpush.msra.mxu2 %v1011_v45  ;;  %1094 = vmatpush.msra.mxu3 %v1012_v46 }
  0xda   : > { %1026 = vmatpush.msra.mxu0 %v1005_v47  ;;  %1049 = vmatpush.msra.mxu1 %v1006_v48 }
  0xdb   : > { %1072 = vmatpush.msra.mxu2 %v1007_v49  ;;  %1095 = vmatpush.msra.mxu3 %v1008_v50 }
  0xdc   : > { %3491 = vmatmul.msk.f32.vlgmr.msrb.gmra.mxu0 %vm373_vm0, %v821_v51  ;;  %3493 = vmatmul.msk.f32.vlgmr.msrb.gmra.mxu1 %vm373_vm0, %v821_v51 }
  0xdd   : > { %3495 = vmatmul.msk.f32.vlgmr.msrb.gmra.mxu2 %vm373_vm0, %v821_v51  ;;  %3497 = vmatmul.msk.f32.vlgmr.msrb.gmra.mxu3 %vm373_vm0, %v821_v51 }
  0xde   : > { %1027 = vmatpush.msra.mxu0 %v1001_v52  ;;  %1050 = vmatpush.msra.mxu1 %v1002_v53 }
  0xdf   : > { %1073 = vmatpush.msra.mxu2 %v1003_v54  ;;  %1096 = vmatpush.msra.mxu3 %v1004_v55 }
  0xe0   : > { %1028 = vmatpush.msra.mxu0 %v997_v56  ;;  %1051 = vmatpush.msra.mxu1 %v998_v57 }
  0xe1   : > { %1074 = vmatpush.msra.mxu2 %v999_v58  ;;  %1097 = vmatpush.msra.mxu3 %v1000_v59  ;;  %v4054_v58 = vld [vmem:[#allocation7] sm:$0xf] }
  0xe2   : > { %1029 = vmatpush.msra.mxu0 %v993_v60  ;;  %1052 = vmatpush.msra.mxu1 %v994_v61 }
  0xe3   : > { %1075 = vmatpush.msra.mxu2 %v995_v62  ;;  %1098 = vmatpush.msra.mxu3 %v996_v63  ;;  %v1123_v62 = vperm.slane %v4054_v58, 2 }
  0xe4   : > { %1030 = vmatpush.msra.mxu0 %v989_v1  ;;  %1053 = vmatpush.msra.mxu1 %v990_v2 }
  0xe5   : > { %1076 = vmatpush.msra.mxu2 %v991_v3  ;;  %1099 = vmatpush.msra.mxu3 %v992_v0 }
  0xe6   : > { %3492 = vmatmul.msk.f32.gmra.mxu0 %vm373_vm0, %v822_v4  ;;  %3494 = vmatmul.msk.f32.gmra.mxu1 %vm373_vm0, %v822_v4 }
  0xe7   : > { %3496 = vmatmul.msk.f32.gmra.mxu2 %vm373_vm0, %v822_v4  ;;  %3498 = vmatmul.msk.f32.gmra.mxu3 %vm373_vm0, %v822_v4 }
  0xe8   : > { %1031 = vmatpush.msra.mxu0 %v985_v5  ;;  %1054 = vmatpush.msra.mxu1 %v986_v6 }
  0xe9   : > { %1077 = vmatpush.msra.mxu2 %v987_v7  ;;  %1100 = vmatpush.msra.mxu3 %v988_v8 }
  0xea   : > { %1032 = vmatpush.msra.mxu0 %v981_v9  ;;  %1055 = vmatpush.msra.mxu1 %v982_v10  ;;  %v1124_v10 = vperm.slane %v4054_v58, 3 }
  0xeb   : > { %1078 = vmatpush.msra.mxu2 %v983_v11  ;;  %1101 = vmatpush.msra.mxu3 %v984_v12 }
  0xec   : > { %1033 = vmatpush.msra.mxu0 %v977_v13  ;;  %1056 = vmatpush.msra.mxu1 %v978_v14 }
  0xed   : > { %1079 = vmatpush.msra.mxu2 %v979_v15  ;;  %1102 = vmatpush.msra.mxu3 %v980_v16 }
  0xee   : > { %1034 = vmatpush.msra.mxu0 %v973_v17  ;;  %1057 = vmatpush.msra.mxu1 %v974_v18 }
  0xef   : > { %1080 = vmatpush.msra.mxu2 %v975_v19  ;;  %1103 = vmatpush.msra.mxu3 %v976_v20 }
  0xf0   : > { %3499 = vmatmul.msk.f32.vlgmr.msra.gmra.mxu0 %vm373_vm0, %v970_v21  ;;  %3501 = vmatmul.msk.f32.vlgmr.msra.gmra.mxu1 %vm373_vm0, %v970_v21 }
  0xf1   : > { %3503 = vmatmul.msk.f32.vlgmr.msra.gmra.mxu2 %vm373_vm0, %v970_v21  ;;  %3505 = vmatmul.msk.f32.vlgmr.msra.gmra.mxu3 %vm373_vm0, %v970_v21 }
  0xf8   : > { %3500 = vmatmul.msk.f32.gmra.mxu0 %vm373_vm0, %v971_v22  ;;  %3502 = vmatmul.msk.f32.gmra.mxu1 %vm373_vm0, %v971_v22 }
  0xf9   : > { %3504 = vmatmul.msk.f32.gmra.mxu2 %vm373_vm0, %v971_v22  ;;  %3506 = vmatmul.msk.f32.gmra.mxu3 %vm373_vm0, %v971_v22  ;;  %v1122_v22 = vperm.slane %v4054_v58, 1  ;;  %vm2580_vm0 = vcmask 1047680  }
 0x121   : > { %v4044_v25 = vpop.f32.mrf.mxu0  ;;  %v522_v26 = vpop.f32.mrf.mxu1 }
 0x128   : > { %v545_v23 = vpop.f32.mrf.mxu2  ;;  %v568_v24 = vpop.f32.mrf.mxu3 }
 0x129   : > { %v502_v29 = vpop.f32.mrf.mxu0  ;;  %v4046_v30 = vpop.f32.mrf.mxu1 }
 0x130   : > { %v548_v27 = vpop.f32.mrf.mxu2  ;;  %v571_v28 = vpop.f32.mrf.mxu3 }
 0x131   : > { %v597_v33 = vpop.f32.mrf.mxu0  ;;  %v620_v34 = vpop.f32.mrf.mxu1 }
 0x132   : > { %v621_v5 = vadd.f32 %v620_v34, %v522_v26 }
 0x138   : > { %v643_v31 = vpop.f32.mrf.mxu2  ;;  %v666_v32 = vpop.f32.mrf.mxu3 }
 0x139   : > { %v600_v37 = vpop.f32.mrf.mxu0  ;;  %v4048_v38 = vpop.f32.mrf.mxu1  ;;  %v644_v53 = vadd.f32 %v643_v31, %v545_v23  ;;  %v667_v59 = vadd.f32 %v666_v32, %v568_v24 }
 0x13a   : > { %v601_v24 = vadd.f32 %v600_v37, %v502_v29  ;;  %v1509_v29 = vld [vmem:[#allocation9 + $0x760] sm:$0xff] }
 0x140   : > { %v646_v35 = vpop.f32.mrf.mxu2  ;;  %v669_v36 = vpop.f32.mrf.mxu3 }
 0x141   : > { %v647_v2 = vadd.f32 %v646_v35, %v548_v27  ;;  %v670_v3 = vadd.f32 %v669_v36, %v571_v28  ;;  %v598_v28 = vadd.f32 %v597_v33, %v4044_v25  ;;  %v624_v33 = vadd.f32 %v4048_v38, %v4046_v30  ;;  %v1443_v30 = vld [vmem:[#allocation9 + $0x550] sm:$0xff] }
 0x143   : > { %v738_v41 = vpop.f32.mrf.mxu0  ;;  %v761_v42 = vpop.f32.mrf.mxu1 }
 0x144   : > { %v814_v11 = vadd.f32 %v761_v42, %v621_v5  ;;  %v813_v35 = vadd.f32 %v738_v41, %v598_v28  ;;  %v1507_v42 = vld [vmem:[#allocation9 + $0x750] sm:$0xff]  ;;  %v1501_v5 = vld [vmem:[#allocation9 + $0x720] sm:$0xff] }
 0x145   : > { %v1543_v41 = vld [vmem:[#allocation9 + $0x870] sm:$0xff] }
 0x146   : > { %1683 = vmatpush.msrb.mxu3 %v1543_v41  ;;  %v1435_v28 = vld [vmem:[#allocation9 + $0x510] sm:$0xff]  ;;  %v1485_v41 = vld [vmem:[#allocation9 + $0x6a0] sm:$0xff] }
 0x14a   : > { %v784_v39 = vpop.f32.mrf.mxu2  ;;  %v807_v40 = vpop.f32.mrf.mxu3 }
 0x14b   : > { %v815_v55 = vadd.f32 %v784_v39, %v644_v53  ;;  %v816_v1 = vadd.f32 %v807_v40, %v667_v59  ;;  %v1511_v40 = vld [vmem:[#allocation9 + $0x770] sm:$0xff] }
 0x14c   : > { %1660 = vmatpush.msrb.mxu2 %v1511_v40  ;;  %v1489_v40 = vld [vmem:[#allocation9 + $0x6c0] sm:$0xff] }
 0x14d   : > { %v741_v45 = vpop.f32.mrf.mxu0  ;;  %v4050_v46 = vpop.f32.mrf.mxu1 }
 0x14e   : > { %v817_v31 = vadd.f32 %v741_v45, %v601_v24  ;;  %v1445_v45 = vld [vmem:[#allocation9 + $0x560] sm:$0xff]  ;;  %1661 = vmatpush.msrb.mxu2 %v1509_v29  ;;  %v818_v53 = vadd.f32 %v4050_v46, %v624_v33  ;;  %v1503_v46 = vld [vmem:[#allocation9 + $0x730] sm:$0xff] }
 0x14f   : > { %v1529_v29 = vld [vmem:[#allocation9 + $0x800] sm:$0xff] }
 0x150   : > { %1662 = vmatpush.msrb.mxu2 %v1507_v42  ;;  %v1465_v42 = vld [vmem:[#allocation9 + $0x600] sm:$0xff] }
 0x151   : > { %v1429_v33 = vld [vmem:[#allocation9 + $0x4e0] sm:$0xff] }
 0x154   : > { %v787_v43 = vpop.f32.mrf.mxu2  ;;  %v810_v44 = vpop.f32.mrf.mxu3 }
 0x155   : > { %v819_v6 = vadd.f32 %v787_v43, %v647_v2  ;;  %v820_v7 = vadd.f32 %v810_v44, %v670_v3  ;;  %v1447_v43 = vld [vmem:[#allocation9 + $0x570] sm:$0xff]  ;;  %v1441_v2 = vld [vmem:[#allocation9 + $0x540] sm:$0xff] }
 0x156   : > { %1614 = vmatpush.msrb.mxu0 %v1447_v43  ;;  %v1475_v3 = vld [vmem:[#allocation9 + $0x650] sm:$0xff] }
 0x157   : > { %v1487_v43 = vld [vmem:[#allocation9 + $0x6b0] sm:$0xff] }
 0x158   : > { %1615 = vmatpush.msrb.mxu0 %v1445_v45  ;;  %v1525_v45 = vld [vmem:[#allocation9 + $0x7e0] sm:$0xff] }
 0x159   : > { %v887_v49 = vpop.f32.mrf.mxu0  ;;  %v910_v50 = vpop.f32.mrf.mxu1 }
 0x15a   : > { %v963_v17 = vadd.f32 %v910_v50, %v814_v11  ;;  %v962_v37 = vadd.f32 %v887_v49, %v813_v35  ;;  %v1541_v49 = vld [vmem:[#allocation9 + $0x860] sm:$0xff]  ;;  %1616 = vmatpush.msrb.mxu0 %v1443_v30  ;;  %v1535_v11 = vld [vmem:[#allocation9 + $0x830] sm:$0xff] }
 0x15b   : > { %1684 = vmatpush.msrb.mxu3 %v1541_v49  ;;  %v1433_v35 = vld [vmem:[#allocation9 + $0x500] sm:$0xff]  ;;  %v1459_v49 = vld [vmem:[#allocation9 + $0x5d0] sm:$0xff] }
 0x15c   : > { %1617 = vmatpush.msrb.mxu0 %v1441_v2  ;;  %v1423_v30 = vld [vmem:[#allocation9 + $0x4b0] sm:$0xff] }
 0x15d   : > { %v1515_v2 = vld [vmem:[#allocation9 + $0x790] sm:$0xff] }
 0x160   : > { %v933_v47 = vpop.f32.mrf.mxu2  ;;  %v956_v48 = vpop.f32.mrf.mxu3 }
 0x161   : > { %v964_v57 = vadd.f32 %v933_v47, %v815_v55  ;;  %v965_v0 = vadd.f32 %v956_v48, %v816_v1  ;;  %v1479_v47 = vld [vmem:[#allocation9 + $0x670] sm:$0xff] }
 0x162   : > { %1637 = vmatpush.msrb.mxu1 %v1479_v47  ;;  %v1427_v47 = vld [vmem:[#allocation9 + $0x4d0] sm:$0xff] }
 0x163   : > { %v890_v54 = vpop.f32.mrf.mxu0  ;;  %v4052_v56 = vpop.f32.mrf.mxu1 }
 0x164   : > { %v966_v39 = vadd.f32 %v890_v54, %v817_v31  ;;  %v1505_v54 = vld [vmem:[#allocation9 + $0x740] sm:$0xff] }
 0x165   : > { %1663 = vmatpush.msrb.mxu2 %v1505_v54  ;;  %v1469_v31 = vld [vmem:[#allocation9 + $0x620] sm:$0xff] }
 0x166   : > { %v1521_v54 = vld [vmem:[#allocation9 + $0x7c0] sm:$0xff] }
 0x167   : > { %1664 = vmatpush.msrb.mxu2 %v1503_v46  ;;  %v1419_v46 = vld [vmem:[#allocation9 + $0x490] sm:$0xff] }
 0x169   : > { %1665 = vmatpush.msrb.mxu2 %v1501_v5  ;;  %v1513_v5 = vld [vmem:[#allocation9 + $0x780] sm:$0xff] }
 0x16a   : > { %v936_v51 = vpop.f32.mrf.mxu2  ;;  %v959_v52 = vpop.f32.mrf.mxu3 }
 0x16b   : > { %v968_v12 = vadd.f32 %v936_v51, %v819_v6  ;;  %v969_v13 = vadd.f32 %v959_v52, %v820_v7  ;;  %v1121_v51 = vperm.slane %v4054_v58, 0  ;;  %v1537_v6 = vld [vmem:[#allocation9 + $0x840] sm:$0xff]  ;;  %v1439_v7 = vld [vmem:[#allocation9 + $0x530] sm:$0xff] }
 0x16c   : > { %1618 = vmatpush.msrb.mxu0 %v1439_v7  ;;  %v1493_v58 = vld [vmem:[#allocation9 + $0x6e0] sm:$0xff] }
 0x16d   : > { %v1036_v8 = vpop.f32.mrf.mxu0  ;;  %v1059_v14 = vpop.f32.mrf.mxu1  ;;  %v1449_v7 = vld [vmem:[#allocation9 + $0x580] sm:$0xff] }
 0x16e   : > { %v1112_v21 = vadd.f32 %v1059_v14, %v963_v17  ;;  %v1111_v50 = vadd.f32 %v1036_v8, %v962_v37  ;;  %v1473_v8 = vld [vmem:[#allocation9 + $0x640] sm:$0xff]  ;;  %v1495_v17 = vld [vmem:[#allocation9 + $0x6f0] sm:$0xff] }
 0x16f   : > { %v1437_v14 = vld [vmem:[#allocation9 + $0x520] sm:$0xff]  ;;  %v1431_v37 = vld [vmem:[#allocation9 + $0x4f0] sm:$0xff] }
 0x170   : > { %v1130_v32 = vadd.f32 %v1122_v22, %v1112_v21  ;;  %v1129_v1 = vadd.f32 %v1121_v51, %v1111_v50  ;;  %1619 = vmatpush.msrb.mxu0 %v1437_v14  ;;  %v1483_v50 = vld [vmem:[#allocation9 + $0x690] sm:$0xff]  ;;  %v1540_v14 = vld [vmem:[#allocation9 + $0x858] sm:$0xff] }
 0x172   : > { %1620 = vmatpush.msrb.mxu0 %v1435_v28  ;;  %v1549_v28 = vld [vmem:[#allocation9 + $0x8a0] sm:$0xff] }
 0x174   : > { %v1082_v60 = vpop.f32.mrf.mxu2  ;;  %v1105_v61 = vpop.f32.mrf.mxu3  ;;  %1621 = vmatpush.msrb.mxu0 %v1433_v35  ;;  %v1547_v35 = vld [vmem:[#allocation9 + $0x890] sm:$0xff] }
 0x175   : > { %v1113_v63 = vadd.f32 %v1082_v60, %v964_v57  ;;  %v1114_v9 = vadd.f32 %v1105_v61, %v965_v0  ;;  %v1039_v36 = vpop.f32.mrf.mxu0  ;;  %v1062_v38 = vpop.f32.mrf.mxu1  ;;  %v1477_v57 = vld [vmem:[#allocation9 + $0x660] sm:$0xff]  ;;  %v967_v60 = vadd.f32 %v4052_v56, %v818_v53 }
 0x176   : > { %v1115_v44 = vadd.f32 %v1039_v36, %v966_v39  ;;  %1638 = vmatpush.msrb.mxu1 %v1477_v57  ;;  %v1467_v36 = vld [vmem:[#allocation9 + $0x610] sm:$0xff]  ;;  %v4085_v39 = vld [vmem:[#allocation3] sm:$0xff]  ;;  %1622 = vmatpush.msrb.mxu0 %v1431_v37  ;;  %v1458_v37 = vld [vmem:[#allocation9 + $0x5c8] sm:$0xff] }
 0x177   : > { %v1131_v4 = vadd.f32 %v1123_v62, %v1113_v63  ;;  %v1132_v20 = vadd.f32 %v1124_v10, %v1114_v9  ;;  %v1539_v63 = vld [vmem:[#allocation9 + $0x850] sm:$0xff]  ;;  %1155 = vst.msk [vmem:[#allocation3 + $0x48] sm:$0xff] %vm1149_vm4, %v4085_v39  ;;  %v1481_v53 = vld [vmem:[#allocation9 + $0x680] sm:$0xff] }
 0x178   : > { %v1133_v61 = vadd.f32 %v1121_v51, %v1115_v44  ;;  %1685 = vmatpush.msrb.mxu3 %v1539_v63  ;;  %v1499_v9 = vld [vmem:[#allocation9 + $0x710] sm:$0xff]  ;;  %1639 = vmatpush.msrb.mxu1 %v1475_v3  ;;  %1150 = vst.msk [vmem:[#allocation3 + $0x20] sm:$0xff] %vm1149_vm4, %v4085_v39  ;;  %v1453_v63 = vld [vmem:[#allocation9 + $0x5a0] sm:$0xff] }
 0x179   : > { %3612 = vtanh.f32 %v1131_v4  ;;  %v1116_v4 = vadd.f32 %v1062_v38, %v967_v60  ;;  %1666 = vmatpush.msrb.mxu2 %v1499_v9  ;;  %2532 = vst.msk [vmem:[#allocation4 + $0x10] sm:$0xff] %vm1207_vm5, %v4085_v39  ;;  %v1463_v44 = vld [vmem:[#allocation9 + $0x5f0] sm:$0xff]  ;;  %1623 = vmatpush.msrb.mxu0 %v1429_v33  ;;  %v1457_v38 = vld [vmem:[#allocation9 + $0x5c0] sm:$0xff]  ;;  %v1448_v9 = vld [vmem:[#allocation9 + $0x578] sm:$0xff] }
 0x17a   : > { %1686 = vmatpush.msrb.mxu3 %v1537_v6  ;;  %1640 = vmatpush.msrb.mxu1 %v1473_v8  ;;  %2535 = vst.msk [vmem:[#allocation4 + $0x28] sm:$0xff] %vm1207_vm5, %v4085_v39  ;;  %v1523_v51 = vld [vmem:[#allocation9 + $0x7d0] sm:$0xff]  ;;  %v1421_v60 = vld [vmem:[#allocation9 + $0x4a0] sm:$0xff]  ;;  %v1544_v6 = vld [vmem:[#allocation9 + $0x878] sm:$0xff] }
 0x17b   : > { %1624 = vmatpush.msrb.mxu0 %v1427_v47  ;;  %v1519_v57 = vld [vmem:[#allocation9 + $0x7b0] sm:$0xff]  ;;  %v1417_v3 = vld [vmem:[#allocation9 + $0x480] sm:$0xff]  ;;  %v1472_v8 = vld [vmem:[#allocation9 + $0x638] sm:$0xff]  ;;  %1161 = vst.msk [vmem:[#allocation3 + $0x70] sm:$0x3] %vm1160_vm6, %v4085_v39 }
 0x17c   : > { %v1085_v15 = vpop.f32.mrf.mxu2  ;;  %v1108_v16 = vpop.f32.mrf.mxu3  ;;  %1687 = vmatpush.msrb.mxu3 %v1535_v11  ;;  %v1557_v11 = vld [vmem:[#allocation9 + $0x8e0] sm:$0xff]  ;;  %v1436_v39 = vld [vmem:[#allocation9 + $0x518] sm:$0xff]  ;;  %v1454_v47 = vld [vmem:[#allocation9 + $0x5a8] sm:$0xff] }
 0x17d   : > { %v1117_v18 = vadd.f32 %v1085_v15, %v968_v12  ;;  %v1118_v19 = vadd.f32 %v1108_v16, %v969_v13  ;;  %v1134_v12 = vadd.f32 %v1122_v22, %v1116_v4  ;;  %v1497_v13 = vld [vmem:[#allocation9 + $0x700] sm:$0xff]  ;;  %v1471_v16 = vld [vmem:[#allocation9 + $0x630] sm:$0xff]  ;;  %v1474_v4 = vld [vmem:[#allocation9 + $0x648] sm:$0xff] }
 0x17e   : > { %1667 = vmatpush.msrb.mxu2 %v1497_v13  ;;  %1641 = vmatpush.msrb.mxu1 %v1471_v16  ;;  %v1446_v13 = vld [vmem:[#allocation9 + $0x568] sm:$0xff]  ;;  %v1468_v16 = vld [vmem:[#allocation9 + $0x618] sm:$0xff] }
 0x17f   : > { %v1135_v23 = vadd.f32 %v1123_v62, %v1117_v18  ;;  %v1136_v26 = vadd.f32 %v1124_v10, %v1118_v19  ;;  %v3613_v27 = vpop.eup %3612  ;;  %v1533_v18 = vld [vmem:[#allocation9 + $0x820] sm:$0xff]  ;;  %v1456_v33 = vld [vmem:[#allocation9 + $0x5b8] sm:$0xff] }
 0x180   : > { %v1173_v34 = vrot.slane %v3613_v27, 7  ;;  %1668 = vmatpush.msrb.mxu2 %v1495_v17  ;;  %1688 = vmatpush.msrb.mxu3 %v1533_v18  ;;  %v1444_v17 = vld [vmem:[#allocation9 + $0x558] sm:$0xff]  ;;  %v1538_v18 = vld [vmem:[#allocation9 + $0x848] sm:$0xff] }
 0x181   : > { %3614 = vtanh.f32 %v1135_v23  ;;  %1642 = vmatpush.msrb.mxu1 %v1469_v31  ;;  %v1462_v31 = vld [vmem:[#allocation9 + $0x5e8] sm:$0xff] }
 0x182   : > { %3616 = vtanh.f32 %v1132_v20  ;;  %1187 = vrot.lane.b32.xlu1 %v1173_v34, %s3858_s23  ;;  %1669 = vmatpush.msrb.mxu2 %v1493_v58  ;;  %v1466_v58 = vld [vmem:[#allocation9 + $0x608] sm:$0xff] }
 0x183   : > { %3618 = vtanh.f32 %v1136_v26  ;;  %1643 = vmatpush.msrb.mxu1 %v1467_v36  ;;  %v1460_v36 = vld [vmem:[#allocation9 + $0x5d8] sm:$0xff] }
 0x184   : > { %3620 = vtanh.f32 %v1130_v32  ;;  %v1491_v32 = vld [vmem:[#allocation9 + $0x6d0] sm:$0xff] }
 0x185   : > { %3622 = vtanh.f32 %v1133_v61  ;;  %1670 = vmatpush.msrb.mxu2 %v1491_v32  ;;  %1644 = vmatpush.msrb.mxu1 %v1465_v42  ;;  %v1455_v61 = vld [vmem:[#allocation9 + $0x5b0] sm:$0xff]  ;;  %v1438_v32 = vld [vmem:[#allocation9 + $0x528] sm:$0xff] }
 0x186   : > { %3624 = vtanh.f32 %v1129_v1  ;;  %v1476_v1 = vld [vmem:[#allocation9 + $0x658] sm:$0xff]  ;;  %v1434_v42 = vld [vmem:[#allocation9 + $0x508] sm:$0xff] }
 0x187   : > { %v3615_v25 = vpop.eup %3614  ;;  %3626 = vtanh.f32 %v1134_v12  ;;  %1671 = vmatpush.msrb.mxu2 %v1489_v40  ;;  %1645 = vmatpush.msrb.mxu1 %v1463_v44  ;;  %v1470_v12 = vld [vmem:[#allocation9 + $0x628] sm:$0xff]  ;;  %v1432_v44 = vld [vmem:[#allocation9 + $0x4f8] sm:$0xff] }
 0x188   : > { %v3617_v48 = vpop.eup %3616  ;;  %v1179_v52 = vrot.slane %v3615_v25, 7  ;;  %v1527_v25 = vld [vmem:[#allocation9 + $0x7f0] sm:$0xff]  ;;  %v1530_v40 = vld [vmem:[#allocation9 + $0x808] sm:$0xff] }
 0x189   : > { %v3619_v59 = vpop.eup %3618  ;;  %v1174_v62 = vrot.slane %v3617_v48, 7  ;;  %1672 = vmatpush.msrb.mxu2 %v1487_v43  ;;  %v1461_v48 = vld [vmem:[#allocation9 + $0x5e0] sm:$0xff]  ;;  %v1528_v43 = vld [vmem:[#allocation9 + $0x7f8] sm:$0xff] }
 0x18a   : > { %1203 = vrot.lane.b32.xlu0 %v1179_v52, %s3858_s23  ;;  %v1180_v55 = vsel %vm1170_vm3, %v1173_v34, %v1179_v52  ;;  %v3621_v0 = vpop.eup %3620  ;;  %v1181_v56 = vrot.slane %v3619_v59, 7  ;;  %v1531_v34 = vld [vmem:[#allocation9 + $0x810] sm:$0xff]  ;;  %1646 = vmatpush.msrb.mxu1 %v1461_v48  ;;  %v1425_v52 = vld [vmem:[#allocation9 + $0x4c0] sm:$0xff]  ;;  %v1478_v59 = vld [vmem:[#allocation9 + $0x668] sm:$0xff] }
 0x18b   : > { %1195 = vrot.lane.b32.xlu2 %v1180_v55, %s3858_s23  ;;  %1189 = vrot.lane.b32.xlu1 %v1174_v62, %s3858_s23  ;;  %v1172_v10 = vrot.slane %v3621_v0, 7  ;;  %v3623_v19 = vpop.eup %3622  ;;  %v1480_v55 = vld [vmem:[#allocation9 + $0x678] sm:$0xff]  ;;  %v1451_v0 = vld [vmem:[#allocation9 + $0x590] sm:$0xff]  ;;  %v1430_v48 = vld [vmem:[#allocation9 + $0x4e8] sm:$0xff] }
 0x18c   : > { %v1182_v15 = vsel %vm1170_vm3, %v1174_v62, %v1181_v56  ;;  %v3625_v20 = vpop.eup %3624  ;;  %v1175_v21 = vrot.slane %v3623_v19, 7  ;;  %1689 = vmatpush.msrb.mxu3 %v1531_v34  ;;  %1673 = vmatpush.msrb.mxu2 %v1485_v41  ;;  %v1517_v62 = vld [vmem:[#allocation9 + $0x7a0] sm:$0xff]  ;;  %v1532_v34 = vld [vmem:[#allocation9 + $0x818] sm:$0xff] }
 0x18d   : > { %v1171_v22 = vrot.slane %v3625_v20, 7  ;;  %v3627_v23 = vpop.eup %3626  ;;  %1625 = vmatpush.msrb.mxu0 %v1425_v52  ;;  %1647 = vmatpush.msrb.mxu1 %v1459_v49  ;;  %v1553_v19 = vld [vmem:[#allocation9 + $0x8c0] sm:$0xff]  ;;  %v1442_v20 = vld [vmem:[#allocation9 + $0x548] sm:$0xff]  ;;  %v1428_v52 = vld [vmem:[#allocation9 + $0x4d8] sm:$0xff] }
 0x18e   : > { %v1177_v26 = vrot.slane %v3627_v23, 7  ;;  %1690 = vmatpush.msrb.mxu3 %v1529_v29  ;;  %1674 = vmatpush.msrb.mxu2 %v1483_v50  ;;  %v1464_v23 = vld [vmem:[#allocation9 + $0x5f8] sm:$0xff]  ;;  %v1545_v29 = vld [vmem:[#allocation9 + $0x880] sm:$0xff]  ;;  %v1522_v49 = vld [vmem:[#allocation9 + $0x7c8] sm:$0xff] }
 0x18f   : > { %v1176_v24 = vsel %vm1170_vm3, %v1171_v22, %v1175_v21  ;;  %1626 = vmatpush.msrb.mxu0 %v1423_v30  ;;  %1648 = vmatpush.msrb.mxu1 %v1457_v38  ;;  %v1524_v50 = vld [vmem:[#allocation9 + $0x7d8] sm:$0xff] }
 0x190   : > { %v1178_v27 = vsel %vm1170_vm3, %v1172_v10, %v1177_v26  ;;  %1691 = vmatpush.msrb.mxu3 %v1527_v25  ;;  %1675 = vmatpush.msrb.mxu2 %v1481_v53  ;;  %v1450_v53 = vld [vmem:[#allocation9 + $0x588] sm:$0xff]  ;;  %v1520_v30 = vld [vmem:[#allocation9 + $0x7b8] sm:$0xff] }
 0x191   : > { %1627 = vmatpush.msrb.mxu0 %v1421_v60  ;;  %1649 = vmatpush.msrb.mxu1 %v1455_v61  ;;  %v1422_v60 = vld [vmem:[#allocation9 + $0x4a8] sm:$0xff]  ;;  %v1516_v61 = vld [vmem:[#allocation9 + $0x798] sm:$0xff] }
 0x192   : > { %1185 = vrot.lane.b32.xlu0 %v1172_v10, %s3858_s23  ;;  %1692 = vmatpush.msrb.mxu3 %v1525_v45  ;;  %v1542_v10 = vld [vmem:[#allocation9 + $0x868] sm:$0xff] }
 0x193   : > { %1197 = vrot.lane.b32.xlu2 %v1182_v15, %s3858_s23  ;;  %1205 = vrot.lane.b32.xlu1 %v1181_v56, %s3858_s23  ;;  %v1559_v56 = vld [vmem:[#allocation9 + $0x8f0] sm:$0xff]  ;;  %v1526_v45 = vld [vmem:[#allocation9 + $0x7e8] sm:$0xff] }
 0x194   : > { %1693 = vmatpush.msrb.mxu3 %v1523_v51  ;;  %1752 = vmatpush.msra.mxu2 %v1480_v55  ;;  %v1555_v15 = vld [vmem:[#allocation9 + $0x8d0] sm:$0xff]  ;;  %v1452_v51 = vld [vmem:[#allocation9 + $0x598] sm:$0xff] }
 0x195   : > { %1628 = vmatpush.msrb.mxu0 %v1419_v46  ;;  %1650 = vmatpush.msrb.mxu1 %v1453_v63  ;;  %v1424_v55 = vld [vmem:[#allocation9 + $0x4b8] sm:$0xff]  ;;  %v1514_v46 = vld [vmem:[#allocation9 + $0x788] sm:$0xff] }
 0x196   : > { %1694 = vmatpush.msrb.mxu3 %v1521_v54  ;;  %1753 = vmatpush.msra.mxu2 %v1478_v59  ;;  %v1426_v54 = vld [vmem:[#allocation9 + $0x4c8] sm:$0xff] }
 0x197   : > { %1629 = vmatpush.msrb.mxu0 %v1417_v3  ;;  %1651 = vmatpush.msrb.mxu1 %v1451_v0 }
 0x198   : > { %1695 = vmatpush.msrb.mxu3 %v1519_v57  ;;  %1754 = vmatpush.msra.mxu2 %v1476_v1  ;;  %v1518_v57 = vld [vmem:[#allocation9 + $0x7a8] sm:$0xff] }
 0x199   : > { %1798 = vmatpush.msra.mxu0 %v1544_v6  ;;  %1652 = vmatpush.msrb.mxu1 %v1449_v7  ;;  %v1418_v1 = vld [vmem:[#allocation9 + $0x488] sm:$0xff] }
 0x19a   : > { %1199 = vrot.lane.b32.xlu0 %v1175_v21, %s3858_s23  ;;  %1696 = vmatpush.msrb.mxu3 %v1517_v62  ;;  %v1536_v21 = vld [vmem:[#allocation9 + $0x838] sm:$0xff] }
 0x19b   : > { %1183 = vrot.lane.b32.xlu2 %v1171_v22, %s3858_s23  ;;  %1191 = vrot.lane.b32.xlu1 %v1176_v24, %s3858_s23  ;;  %v1551_v22 = vld [vmem:[#allocation9 + $0x8b0] sm:$0xff]  ;;  %v1440_v24 = vld [vmem:[#allocation9 + $0x538] sm:$0xff] }
 0x19c   : > { %1697 = vmatpush.msrb.mxu3 %v1515_v2  ;;  %1755 = vmatpush.msra.mxu2 %v1474_v4  ;;  %v1420_v62 = vld [vmem:[#allocation9 + $0x498] sm:$0xff] }
 0x19d   : > { %1729 = vmatpush.msra.mxu1 %v1448_v9  ;;  %1799 = vmatpush.msra.mxu0 %v1542_v10 }
 0x19e   : > { %1698 = vmatpush.msrb.mxu3 %v1513_v5  ;;  %1756 = vmatpush.msra.mxu2 %v1472_v8 }
 0x19f   : > { %1730 = vmatpush.msra.mxu1 %v1446_v13  ;;  %1800 = vmatpush.msra.mxu0 %v1540_v14  ;;  %v1510_v14 = vld [vmem:[#allocation9 + $0x768] sm:$0xff] }
 0x1a0   : > { %1714 = vmatpush.msra.mxu3 %v1559_v56  ;;  %1757 = vmatpush.msra.mxu2 %v1470_v12  ;;  %v1512_v12 = vld [vmem:[#allocation9 + $0x778] sm:$0xff] }
 0x1a1   : > { %1731 = vmatpush.msra.mxu1 %v1444_v17  ;;  %1801 = vmatpush.msra.mxu0 %v1538_v18  ;;  %v1508_v17 = vld [vmem:[#allocation9 + $0x758] sm:$0xff] }
 0x1a2   : > { %1715 = vmatpush.msra.mxu3 %v1557_v11  ;;  %1758 = vmatpush.msra.mxu2 %v1468_v16 }
 0x1a3   : > { %1193 = vrot.lane.b32.xlu2 %v1178_v27, %s3858_s23  ;;  %1201 = vrot.lane.b32.xlu1 %v1177_v26, %s3858_s23  ;;  %v1534_v26 = vld [vmem:[#allocation9 + $0x828] sm:$0xff] }
 0x1a4   : > { %1716 = vmatpush.msra.mxu3 %v1555_v15  ;;  %1759 = vmatpush.msra.mxu2 %v1466_v58 }
 0x1a5   : > { %1732 = vmatpush.msra.mxu1 %v1442_v20  ;;  %1802 = vmatpush.msra.mxu0 %v1536_v21 }
 0x1a6   : > { %1717 = vmatpush.msra.mxu3 %v1553_v19  ;;  %1760 = vmatpush.msra.mxu2 %v1464_v23  ;;  %v1506_v23 = vld [vmem:[#allocation9 + $0x748] sm:$0xff] }
 0x1a7   : > { %1733 = vmatpush.msra.mxu1 %v1440_v24  ;;  %1803 = vmatpush.msra.mxu0 %v1534_v26  ;;  %v1292_v26 = vld [vmem:[#allocation9 + $0xf0] sm:$0xff] }
 0x1a8   : > { %1718 = vmatpush.msra.mxu3 %v1551_v22  ;;  %1761 = vmatpush.msra.mxu2 %v1462_v31 }
 0x1a9   : > { %1734 = vmatpush.msra.mxu1 %v1438_v32  ;;  %1804 = vmatpush.msra.mxu0 %v1532_v34  ;;  %v1504_v32 = vld [vmem:[#allocation9 + $0x738] sm:$0xff]  ;;  %v1290_v34 = vld [vmem:[#allocation9 + $0xe0] sm:$0xff] }
 0x1aa   : > { %1719 = vmatpush.msra.mxu3 %v1549_v28  ;;  %1762 = vmatpush.msra.mxu2 %v1460_v36 }
 0x1ab   : > { %1735 = vmatpush.msra.mxu1 %v1436_v39  ;;  %1805 = vmatpush.msra.mxu0 %v1530_v40  ;;  %v1560_v39 = vld [vmem:[#allocation9 + $0x8f8] sm:$0xff]  ;;  %v1502_v40 = vld [vmem:[#allocation9 + $0x728] sm:$0xff] }
 0x1ac   : > { %1720 = vmatpush.msra.mxu3 %v1547_v35  ;;  %1763 = vmatpush.msra.mxu2 %v1458_v37 }
 0x1ad   : > { %1736 = vmatpush.msra.mxu1 %v1434_v42  ;;  %1806 = vmatpush.msra.mxu0 %v1528_v43  ;;  %v1558_v43 = vld [vmem:[#allocation9 + $0x8e8] sm:$0xff] }
 0x1ae   : > { %1721 = vmatpush.msra.mxu3 %v1545_v29  ;;  %1764 = vmatpush.msra.mxu2 %v1456_v33  ;;  %v1288_v29 = vld [vmem:[#allocation9 + $0xd0] sm:$0xff]  ;;  %v1286_v33 = vld [vmem:[#allocation9 + $0xc0] sm:$0xff] }
 0x1af   : > { %1737 = vmatpush.msra.mxu1 %v1432_v44  ;;  %1807 = vmatpush.msra.mxu0 %v1526_v45 }
 0x1b0   : > { %1765 = vmatpush.msra.mxu2 %v1454_v47 }
 0x1b1   : > { %1738 = vmatpush.msra.mxu1 %v1430_v48  ;;  %1808 = vmatpush.msra.mxu0 %v1524_v50  ;;  %v1556_v50 = vld [vmem:[#allocation9 + $0x8d8] sm:$0xff] }
 0x1b2   : > { %1766 = vmatpush.msra.mxu2 %v1452_v51 }
 0x1b3   : > { %1739 = vmatpush.msra.mxu1 %v1428_v52  ;;  %1809 = vmatpush.msra.mxu0 %v1522_v49  ;;  %v1498_v49 = vld [vmem:[#allocation9 + $0x708] sm:$0xff] }
 0x1b4   : > { %1767 = vmatpush.msra.mxu2 %v1450_v53 }
 0x1b5   : > { %1740 = vmatpush.msra.mxu1 %v1426_v54  ;;  %1810 = vmatpush.msra.mxu0 %v1520_v30  ;;  %v1356_v30 = vld [vmem:[#allocation9 + $0x2f0] sm:$0xff] }
 0x1b7   : > { %1741 = vmatpush.msra.mxu1 %v1424_v55  ;;  %1811 = vmatpush.msra.mxu0 %v1518_v57  ;;  %v1496_v57 = vld [vmem:[#allocation9 + $0x6f8] sm:$0xff] }
 0x1b9   : > { %1742 = vmatpush.msra.mxu1 %v1422_v60  ;;  %1812 = vmatpush.msra.mxu0 %v1516_v61  ;;  %v1354_v61 = vld [vmem:[#allocation9 + $0x2e0] sm:$0xff] }
 0x1bb   : > { %1743 = vmatpush.msra.mxu1 %v1420_v62  ;;  %1813 = vmatpush.msra.mxu0 %v1514_v46  ;;  %v1554_v62 = vld [vmem:[#allocation9 + $0x8c8] sm:$0xff] }
 0x1bc   : > { %v1494_v46 = vld [vmem:[#allocation9 + $0x6e8] sm:$0xff] }
 0x1bd   : > { %1744 = vmatpush.msra.mxu1 %v1418_v1 }
 0x1e5   : > { %v4096_v27 = vpop.permute.xlu2 %1195 }
 0x1ed   : > { %v1198_v25 = vpop.permute.xlu2 %1197 }
 0x1ee   : > { %v4100_v41 = vsel %vm1207_vm5, %v4096_v27, %v1198_v25  ;;  %1244 = vst.msk [vmem:[#allocation3 + $0x48] sm:$0xff] %vm1207_vm5, %v1198_v25  ;;  %v1500_v25 = vld [vmem:[#allocation9 + $0x718] sm:$0xff] }
 0x1ef   : > { %1243 = vst [vmem:[#allocation3 + $0x40] sm:$0xff] %v4100_v41  ;;  %v1587_v11 = vrot.slane %v4100_v41, 1 }
 0x1f4   : > { %v1188_v59 = vpop.permute.xlu1 %1187 }
 0x1f5   : > { %v1184_v38 = vpop.permute.xlu2 %1183  ;;  %v4143_v44 = vld [vmem:[#allocation3 + $0x48] sm:$0xff] }
 0x1f6   : > { %1233 = vst.msk [vmem:[#allocation3] sm:$0xfe] %vm1232_vm7, %v1184_v38 }
 0x1fc   : > { %v4104_v63 = vpop.permute.xlu0 %1203 }
 0x1fd   : > { %v1194_v2 = vpop.permute.xlu2 %1193  ;;  %v1190_v0 = vpop.permute.xlu1 %1189  ;;  %v1406_v42 = vld [vmem:[#allocation3] sm:$0xfe] }
 0x1fe   : > { %v4108_v3 = vsel %vm1207_vm5, %v1194_v2, %v4096_v27  ;;  %v1210_v4 = vsel %vm1207_vm5, %v1188_v59, %v1190_v0  ;;  %1238 = vst.msk [vmem:[#allocation3 + $0x20] sm:$0xfe] %vm1237_vm8, %v1190_v0  ;;  %v1577_v53 = vrot.slane %v1406_v42, 1  ;;  %v1552_v0 = vld [vmem:[#allocation9 + $0x8b8] sm:$0xff]  ;;  %v1482_v42 = vld [vmem:[#allocation9 + $0x688] sm:$0xff] }
 0x1ff   : > { %1242 = vst [vmem:[#allocation3 + $0x38] sm:$0xff] %v4108_v3  ;;  %v1584_v20 = vrot.slane %v4108_v3, 1 }
 0x200   : > { %1236 = vst [vmem:[#allocation3 + $0x18] sm:$0xfe] %v1210_v4  ;;  %v1492_v4 = vld [vmem:[#allocation9 + $0x6d8] sm:$0xff] }
 0x204   : > { %v1186_v5 = vpop.permute.xlu0 %1185 }
 0x205   : > { %v1208_v6 = vsel %vm1207_vm5, %v1184_v38, %v1186_v5  ;;  %v1209_v56 = vsel %vm1207_vm5, %v1186_v5, %v1188_v59  ;;  %v1206_v7 = vpop.permute.xlu1 %1205  ;;  %v1410_v37 = vld [vmem:[#allocation3 + $0x20] sm:$0xfe]  ;;  %v1590_v38 = vrot.slane %v4143_v44, 1  ;;  %v1284_v59 = vld [vmem:[#allocation9 + $0xb0] sm:$0xff] }
 0x206   : > { %1234 = vst [vmem:[#allocation3 + $0x8] sm:$0xfe] %v1208_v6  ;;  %v1216_v8 = vsel %vm1207_vm5, %v4104_v63, %v1206_v7  ;;  %v1589_v48 = vrot.slane %v1410_v37, 1  ;;  %v1280_v5 = vld [vmem:[#allocation9 + $0x90] sm:$0xff]  ;;  %v1270_v37 = vld [vmem:[#allocation9 + $0x40] sm:$0xff] }
 0x207   : > { %1235 = vst [vmem:[#allocation3 + $0x10] sm:$0xfe] %v1209_v56  ;;  %v1409_v9 = vld [vmem:[#allocation3 + $0x18] sm:$0xfe]  ;;  %v1350_v56 = vld [vmem:[#allocation9 + $0x2c0] sm:$0xff] }
 0x208   : > { %1251 = vst.msk [vmem:[#allocation3 + $0x70] sm:$0x1] %vm1250_vm9, %v1206_v7  ;;  %v1586_v10 = vrot.slane %v1409_v9, 1  ;;  %v4157_v60 = vsel %vm1576_vm10, %v1589_v48, %v1590_v38  ;;  %v1490_v9 = vld [vmem:[#allocation9 + $0x6c8] sm:$0xff]  ;;  %v1322_v48 = vld [vmem:[#allocation9 + $0x1e0] sm:$0xff] }
 0x209   : > { %1249 = vst [vmem:[#allocation3 + $0x68] sm:$0x1] %v1216_v8  ;;  %v1550_v8 = vld [vmem:[#allocation9 + $0x8a8] sm:$0xff] }
 0x20a   : > { %v4118_v13 = vsel %vm1576_vm10, %v1586_v10, %v1587_v11  ;;  %v1278_v10 = vld [vmem:[#allocation9 + $0x80] sm:$0xff] }
 0x20b   : > { %1699 = vmatmul.f32.vlgmr.msrb.gmra.mxu3 %v4118_v13 }
 0x20c   : > { %v1200_v15 = vpop.permute.xlu0 %1199  ;;  %1775 = vmatpush.msrb.mxu3 %v1512_v12 }
 0x20d   : > { %1246 = vst.msk [vmem:[#allocation3 + $0x50] sm:$0x1] %vm1245_vm11, %v1200_v15  ;;  %v1407_v16 = vld [vmem:[#allocation3 + $0x8] sm:$0xfe]  ;;  %v1192_v19 = vpop.permute.xlu1 %1191 }
 0x20e   : > { %v1408_v18 = vld [vmem:[#allocation3 + $0x10] sm:$0xfe]  ;;  %1776 = vmatpush.msrb.mxu3 %v1510_v14  ;;  %v1580_v21 = vrot.slane %v1407_v16, 1  ;;  %v4123_v22 = vsel %vm1207_vm5, %v1192_v19, %v1194_v2  ;;  %1240 = vst.msk [vmem:[#allocation3 + $0x28] sm:$0xff] %vm1239_vm12, %v1192_v19 }
 0x20f   : > { %v1583_v58 = vrot.slane %v1408_v18, 1  ;;  %1241 = vst [vmem:[#allocation3 + $0x30] sm:$0xff] %v4123_v22  ;;  %v1581_v31 = vrot.slane %v4123_v22, 1  ;;  %v1352_v2 = vld [vmem:[#allocation9 + $0x2d0] sm:$0xff]  ;;  %v1415_v6 = vld [vmem:[#allocation3 + $0x70] sm:$0x1] }
 0x210   : > { %v1414_v24 = vld [vmem:[#allocation3 + $0x68] sm:$0x1]  ;;  %1777 = vmatpush.msrb.mxu3 %v1508_v17  ;;  %v1348_v16 = vld [vmem:[#allocation9 + $0x2b0] sm:$0xff] }
 0x211   : > { %v4129_v27 = vsel %vm1576_vm10, %v1583_v58, %v1584_v20  ;;  %v1598_v28 = vrot.slane %v1414_v24, 1  ;;  %v4139_v36 = vsel %vm1576_vm10, %v1580_v21, %v1581_v31  ;;  %v1276_v58 = vld [vmem:[#allocation9 + $0x70] sm:$0xff]  ;;  %v1346_v24 = vld [vmem:[#allocation9 + $0x2a0] sm:$0xff] }
 0x212   : > { %1676 = vmatmul.f32.vlgmr.msrb.gmra.mxu2 %v4129_v27  ;;  %1778 = vmatpush.msrb.mxu3 %v1506_v23  ;;  %v1488_v23 = vld [vmem:[#allocation9 + $0x6b8] sm:$0xff] }
 0x213   : > { %v4134_v35 = vsel %vm1576_vm10, %v1587_v11, %v1598_v28  ;;  %1849 = vmatpush.msrb.mxu2 %v1292_v26  ;;  %1653 = vmatmul.f32.vlgmr.msrb.gmra.mxu1 %v4139_v36  ;;  %v1274_v28 = vld [vmem:[#allocation9 + $0x60] sm:$0xff] }
 0x214   : > { %1702 = vmatmul.f32.gmra.mxu3 %v4134_v35  ;;  %1829 = vmatpush.msrb.mxu1 %v1560_v39  ;;  %v1411_v1 = vld [vmem:[#allocation3 + $0x50] sm:$0x1] }
 0x215   : > { %1779 = vmatpush.msrb.mxu3 %v1504_v32  ;;  %1850 = vmatpush.msrb.mxu2 %v1290_v34  ;;  %v1202_v45 = vpop.permute.xlu1 %1201  ;;  %v4145_v47 = vld [vmem:[#allocation3 + $0x28] sm:$0xff]  ;;  %v1592_v7 = vrot.slane %v1411_v1, 1  ;;  %v1344_v34 = vld [vmem:[#allocation9 + $0x290] sm:$0xff] }
 0x216   : > { %v1214_v51 = vsel %vm1207_vm5, %v1200_v15, %v1202_v45  ;;  %v1215_v52 = vsel %vm1207_vm5, %v1202_v45, %v4104_v63  ;;  %v1578_v54 = vrot.slane %v4145_v47, 1  ;;  %1830 = vmatpush.msrb.mxu1 %v1558_v43  ;;  %v1282_v63 = vld [vmem:[#allocation9 + $0xa0] sm:$0xff]  ;;  %v1600_v15 = vrot.slane %v1415_v6, 1  ;;  %v1486_v32 = vld [vmem:[#allocation9 + $0x6a8] sm:$0xff]  ;;  %v1340_v43 = vld [vmem:[#allocation9 + $0x270] sm:$0xff] }
 0x217   : > { %1780 = vmatpush.msrb.mxu3 %v1502_v40  ;;  %1851 = vmatpush.msrb.mxu2 %v1288_v29  ;;  %1247 = vst [vmem:[#allocation3 + $0x58] sm:$0x1] %v1214_v51  ;;  %v1546_v39 = vld [vmem:[#allocation9 + $0x888] sm:$0xff]  ;;  %v1484_v40 = vld [vmem:[#allocation9 + $0x698] sm:$0xff]  ;;  %v1342_v29 = vld [vmem:[#allocation9 + $0x280] sm:$0xff] }
 0x218   : > { %1248 = vst [vmem:[#allocation3 + $0x60] sm:$0x1] %v1215_v52  ;;  %v4153_v55 = vsel %vm1576_vm10, %v1577_v53, %v1578_v54  ;;  %1831 = vmatpush.msrb.mxu1 %v1556_v50  ;;  %v4162_v18 = vsel %vm1576_vm10, %v1578_v54, %v1592_v7  ;;  %v4178_v26 = vsel %vm1576_vm10, %v1590_v38, %v1600_v15  ;;  %v1388_v45 = vld [vmem:[#allocation9 + $0x3f0] sm:$0xff]  ;;  %v1338_v50 = vld [vmem:[#allocation9 + $0x260] sm:$0xff] }
 0x219   : > { %1781 = vmatpush.msrb.mxu3 %v1500_v25  ;;  %1852 = vmatpush.msrb.mxu2 %v1286_v33  ;;  %v1324_v25 = vld [vmem:[#allocation9 + $0x1f0] sm:$0xff]  ;;  %v1266_v51 = vld [vmem:[#allocation9 + $0x20] sm:$0xff] }
 0x21a   : > { %1630 = vmatmul.f32.vlgmr.msrb.gmra.mxu0 %v4153_v55  ;;  %1832 = vmatpush.msrb.mxu1 %v1554_v62  ;;  %v1268_v33 = vld [vmem:[#allocation9 + $0x30] sm:$0xff]  ;;  %v1386_v52 = vld [vmem:[#allocation9 + $0x3e0] sm:$0xff] }
 0x21b   : > { %1782 = vmatpush.msrb.mxu3 %v1498_v49  ;;  %1895 = vmatpush.msrb.mxu0 %v1356_v30  ;;  %v1320_v49 = vld [vmem:[#allocation9 + $0x1d0] sm:$0xff]  ;;  %v1318_v30 = vld [vmem:[#allocation9 + $0x1c0] sm:$0xff] }
 0x21c   : > { %3507 = vmatmul.msk.f32.vlgmr.msra.gmra.mxu3 %vm1149_vm4, %v4157_v60  ;;  %1853 = vmatpush.msrb.mxu2 %v1284_v59  ;;  %v1336_v53 = vld [vmem:[#allocation9 + $0x250] sm:$0xff]  ;;  %v1334_v38 = vld [vmem:[#allocation9 + $0x240] sm:$0xff] }
 0x21d   : > { %1783 = vmatpush.msrb.mxu3 %v1496_v57  ;;  %1896 = vmatpush.msrb.mxu0 %v1354_v61  ;;  %v1384_v54 = vld [vmem:[#allocation9 + $0x3d0] sm:$0xff]  ;;  %v1314_v62 = vld [vmem:[#allocation9 + $0x1a0] sm:$0xff] }
 0x21e   : > { %1854 = vmatpush.msrb.mxu2 %v1282_v63  ;;  %v1412_v11 = vld [vmem:[#allocation3 + $0x58] sm:$0x1]  ;;  %1833 = vmatpush.msrb.mxu1 %v1552_v0  ;;  %v1402_v63 = vld [vmem:[#allocation9 + $0x460] sm:$0xff] }
 0x21f   : > { %1784 = vmatpush.msrb.mxu3 %v1494_v46  ;;  %1897 = vmatpush.msrb.mxu0 %v1352_v2  ;;  %v1594_v12 = vrot.slane %v1412_v11, 1  ;;  %v1413_v14 = vld [vmem:[#allocation3 + $0x60] sm:$0x1]  ;;  %v1332_v57 = vld [vmem:[#allocation9 + $0x230] sm:$0xff]  ;;  %v1330_v46 = vld [vmem:[#allocation9 + $0x220] sm:$0xff] }
 0x220   : > { %1855 = vmatpush.msrb.mxu2 %v1280_v5  ;;  %v1596_v17 = vrot.slane %v1413_v14, 1  ;;  %1834 = vmatpush.msrb.mxu1 %v1550_v8  ;;  %v1404_v59 = vld [vmem:[#allocation9 + $0x470] sm:$0xff]  ;;  %v1378_v1 = vld [vmem:[#allocation9 + $0x3a0] sm:$0xff]  ;;  %v1325_v8 = vld [vmem:[#allocation9 + $0x1f8] sm:$0xff] }
 0x221   : > { %1785 = vmatpush.msrb.mxu3 %v1492_v4  ;;  %1898 = vmatpush.msrb.mxu0 %v1350_v56  ;;  %v4167_v19 = vsel %vm1576_vm10, %v1581_v31, %v1594_v12  ;;  %v1548_v31 = vld [vmem:[#allocation9 + $0x898] sm:$0xff]  ;;  %v1380_v61 = vld [vmem:[#allocation9 + $0x3b0] sm:$0xff]  ;;  %v1310_v5 = vld [vmem:[#allocation9 + $0x180] sm:$0xff] }
 0x222   : > { %1856 = vmatpush.msrb.mxu2 %v1278_v10  ;;  %1633 = vmatmul.f32.gmra.mxu0 %v4162_v18  ;;  %v4174_v21 = vsel %vm1576_vm10, %v1584_v20, %v1596_v17  ;;  %v1272_v20 = vld [vmem:[#allocation9 + $0x50] sm:$0xff]  ;;  %v1326_v6 = vld [vmem:[#allocation9 + $0x200] sm:$0xff]  ;;  %v1323_v14 = vld [vmem:[#allocation9 + $0x1e8] sm:$0xff] }
 0x223   : > { %1786 = vmatpush.msrb.mxu3 %v1490_v9  ;;  %1656 = vmatmul.f32.gmra.mxu1 %v4167_v19  ;;  %v1312_v2 = vld [vmem:[#allocation9 + $0x190] sm:$0xff]  ;;  %v1398_v56 = vld [vmem:[#allocation9 + $0x440] sm:$0xff] }
 0x224   : > { %1899 = vmatpush.msrb.mxu0 %v1348_v16  ;;  %1679 = vmatmul.f32.gmra.mxu2 %v4174_v21  ;;  %v1328_v0 = vld [vmem:[#allocation9 + $0x210] sm:$0xff]  ;;  %v1374_v7 = vld [vmem:[#allocation9 + $0x380] sm:$0xff] }
 0x225   : > { %3508 = vmatmul.msk.f32.gmra.mxu3 %vm1149_vm4, %v4178_v26  ;;  %1857 = vmatpush.msrb.mxu2 %v1276_v58  ;;  %v1376_v4 = vld [vmem:[#allocation9 + $0x390] sm:$0xff]  ;;  %v4193_v15 = vld [vmem:[#allocation3] sm:$0xff] }
 0x226   : > { %1787 = vmatpush.msrb.mxu3 %v1488_v23  ;;  %1900 = vmatpush.msrb.mxu0 %v1346_v24  ;;  %v1308_v9 = vld [vmem:[#allocation9 + $0x170] sm:$0xff]  ;;  %v1306_v16 = vld [vmem:[#allocation9 + $0x160] sm:$0xff]  ;;  %v1319_v24 = vld [vmem:[#allocation9 + $0x1c8] sm:$0xff] }
 0x227   : > { %1858 = vmatpush.msrb.mxu2 %v1274_v28  ;;  %1835 = vmatpush.msrb.mxu1 %v1548_v31  ;;  %v1396_v10 = vld [vmem:[#allocation9 + $0x430] sm:$0xff]  ;;  %v1394_v17 = vld [vmem:[#allocation9 + $0x420] sm:$0xff] }
 0x228   : > { %1788 = vmatpush.msrb.mxu3 %v1486_v32  ;;  %1901 = vmatpush.msrb.mxu0 %v1344_v34  ;;  %v4190_v11 = vld [vmem:[#allocation3 + $0x10] sm:$0xff]  ;;  %v1302_v28 = vld [vmem:[#allocation9 + $0x140] sm:$0xff]  ;;  %v1389_v34 = vld [vmem:[#allocation9 + $0x3f8] sm:$0xff] }
 0x229   : > { %1859 = vmatpush.msrb.mxu2 %v1272_v20  ;;  %1836 = vmatpush.msrb.mxu1 %v1546_v39  ;;  %v1372_v12 = vld [vmem:[#allocation9 + $0x370] sm:$0xff]  ;;  %v1390_v31 = vld [vmem:[#allocation9 + $0x400] sm:$0xff] }
 0x22a   : > { %1789 = vmatpush.msrb.mxu3 %v1484_v40  ;;  %1902 = vmatpush.msrb.mxu0 %v1342_v29  ;;  %v1304_v58 = vld [vmem:[#allocation9 + $0x150] sm:$0xff]  ;;  %v1366_v32 = vld [vmem:[#allocation9 + $0x340] sm:$0xff]  ;;  %v1315_v40 = vld [vmem:[#allocation9 + $0x1a8] sm:$0xff] }
 0x22b   : > { %1860 = vmatpush.msrb.mxu2 %v1270_v37  ;;  %1814 = vmatmul.f32.vlgmr.msra.gmra.mxu0 %v4118_v13  ;;  %v1264_v13 = vld [vmem:[#allocation9 + $0x10] sm:$0xff]  ;;  %v1387_v29 = vld [vmem:[#allocation9 + $0x3e8] sm:$0xff]  ;;  %v1298_v37 = vld [vmem:[#allocation9 + $0x120] sm:$0xff] }
 0x22c   : > { %1790 = vmatpush.msrb.mxu3 %v1482_v42  ;;  %1903 = vmatpush.msrb.mxu0 %v1340_v43  ;;  %v1368_v23 = vld [vmem:[#allocation9 + $0x350] sm:$0xff]  ;;  %v1362_v42 = vld [vmem:[#allocation9 + $0x320] sm:$0xff]  ;;  %v1313_v43 = vld [vmem:[#allocation9 + $0x198] sm:$0xff] }
 0x22d   : > { %1745 = vmatmul.f32.vlgmr.msra.gmra.mxu1 %v4153_v55  ;;  %1768 = vmatmul.f32.vlgmr.msra.gmra.mxu2 %v4139_v36  ;;  %v1262_v55 = vld [vmem:[#allocation9] sm:$0xff]  ;;  %v1300_v20 = vld [vmem:[#allocation9 + $0x130] sm:$0xff] }
 0x22e   : > { %1872 = vmatpush.msra.mxu3 %v1324_v25  ;;  %1861 = vmatpush.msrb.mxu2 %v1268_v33  ;;  %v1382_v36 = vld [vmem:[#allocation9 + $0x3c0] sm:$0xff]  ;;  %v1364_v39 = vld [vmem:[#allocation9 + $0x330] sm:$0xff]  ;;  %v1385_v25 = vld [vmem:[#allocation9 + $0x3d8] sm:$0xff] }
 0x22f   : > { %1791 = vmatmul.f32.vlgmr.msrb.gmra.mxu3 %v4129_v27  ;;  %1918 = vmatpush.msra.mxu1 %v1388_v45  ;;  %v1316_v27 = vld [vmem:[#allocation9 + $0x1b0] sm:$0xff] }
 0x230   : > { %1873 = vmatpush.msra.mxu3 %v1322_v48  ;;  %1904 = vmatpush.msrb.mxu0 %v1338_v50  ;;  %v1296_v33 = vld [vmem:[#allocation9 + $0x110] sm:$0xff]  ;;  %v1311_v48 = vld [vmem:[#allocation9 + $0x188] sm:$0xff] }
 0x231   : > { %1862 = vmatpush.msrb.mxu2 %v1266_v51  ;;  %1919 = vmatpush.msra.mxu1 %v1386_v52  ;;  %v1360_v45 = vld [vmem:[#allocation9 + $0x310] sm:$0xff]  ;;  %v1383_v50 = vld [vmem:[#allocation9 + $0x3c8] sm:$0xff]  ;;  %v1294_v51 = vld [vmem:[#allocation9 + $0x100] sm:$0xff] }
 0x232   : > { %1874 = vmatpush.msra.mxu3 %v1320_v49  ;;  %1905 = vmatpush.msrb.mxu0 %v1336_v53  ;;  %v1358_v52 = vld [vmem:[#allocation9 + $0x300] sm:$0xff]  ;;  %v1293_v49 = vld [vmem:[#allocation9 + $0xf8] sm:$0xff] }
 0x233   : > { %1863 = vmatpush.msrb.mxu2 %v1264_v13  ;;  %1920 = vmatpush.msra.mxu1 %v1384_v54  ;;  %v1381_v53 = vld [vmem:[#allocation9 + $0x3b8] sm:$0xff]  ;;  %v4202_v13 = vld [vmem:[#allocation3 + $0x8] sm:$0xff] }
 0x234   : > { %1875 = vmatpush.msra.mxu3 %v1318_v30  ;;  %1906 = vmatpush.msrb.mxu0 %v1334_v38  ;;  %v1357_v54 = vld [vmem:[#allocation9 + $0x2f8] sm:$0xff]  ;;  %v1291_v30 = vld [vmem:[#allocation9 + $0xe8] sm:$0xff] }
 0x235   : > { %1864 = vmatpush.msrb.mxu2 %v1262_v55  ;;  %1921 = vmatpush.msra.mxu1 %v1382_v36  ;;  %v4205_v38 = vld [vmem:[#allocation3 + $0x20] sm:$0xff]  ;;  %v1307_v55 = vld [vmem:[#allocation9 + $0x168] sm:$0xff] }
 0x236   : > { %1817 = vmatmul.f32.gmra.mxu0 %v4134_v35  ;;  %1876 = vmatpush.msra.mxu3 %v1316_v27  ;;  %v1400_v35 = vld [vmem:[#allocation9 + $0x450] sm:$0xff]  ;;  %v1379_v36 = vld [vmem:[#allocation9 + $0x3a8] sm:$0xff] }
 0x237   : > { %1907 = vmatpush.msrb.mxu0 %v1332_v57  ;;  %1949 = vmatpush.msra.mxu2 %v1404_v59  ;;  %v4207_v27 = vld [vmem:[#allocation3 + $0x18] sm:$0xff]  ;;  %v1355_v57 = vld [vmem:[#allocation9 + $0x2e8] sm:$0xff] }
 0x238   : > { %1748 = vmatmul.f32.gmra.mxu1 %v4162_v18  ;;  %1771 = vmatmul.f32.gmra.mxu2 %v4167_v19  ;;  %v1370_v18 = vld [vmem:[#allocation9 + $0x360] sm:$0xff]  ;;  %v1321_v19 = vld [vmem:[#allocation9 + $0x1d8] sm:$0xff] }
 0x239   : > { %1794 = vmatmul.f32.gmra.mxu3 %v4174_v21  ;;  %1922 = vmatpush.msra.mxu1 %v1380_v61  ;;  %v1392_v21 = vld [vmem:[#allocation9 + $0x410] sm:$0xff]  ;;  %v1289_v59 = vld [vmem:[#allocation9 + $0xd8] sm:$0xff] }
 0x23a   : > { %1877 = vmatpush.msra.mxu3 %v1314_v62  ;;  %1908 = vmatpush.msrb.mxu0 %v1330_v46  ;;  %v1305_v61 = vld [vmem:[#allocation9 + $0x158] sm:$0xff] }
 0x23b   : > { %1950 = vmatpush.msra.mxu2 %v1402_v63  ;;  %1923 = vmatpush.msra.mxu1 %v1378_v1  ;;  %v1377_v62 = vld [vmem:[#allocation9 + $0x398] sm:$0xff]  ;;  %v1287_v63 = vld [vmem:[#allocation9 + $0xc8] sm:$0xff] }
 0x23c   : > { %1878 = vmatpush.msra.mxu3 %v1312_v2  ;;  %1909 = vmatpush.msrb.mxu0 %v1328_v0  ;;  %v1353_v46 = vld [vmem:[#allocation9 + $0x2d8] sm:$0xff]  ;;  %v1303_v1 = vld [vmem:[#allocation9 + $0x148] sm:$0xff] }
 0x23d   : > { %1951 = vmatpush.msra.mxu2 %v1400_v35  ;;  %1924 = vmatpush.msra.mxu1 %v1376_v4  ;;  %v1375_v2 = vld [vmem:[#allocation9 + $0x388] sm:$0xff]  ;;  %v1285_v35 = vld [vmem:[#allocation9 + $0xb8] sm:$0xff] }
 0x23e   : > { %1879 = vmatpush.msra.mxu3 %v1310_v5  ;;  %1910 = vmatpush.msrb.mxu0 %v1326_v6  ;;  %v1351_v0 = vld [vmem:[#allocation9 + $0x2c8] sm:$0xff]  ;;  %v1301_v4 = vld [vmem:[#allocation9 + $0x138] sm:$0xff] }
 0x23f   : > { %1952 = vmatpush.msra.mxu2 %v1398_v56  ;;  %1925 = vmatpush.msra.mxu1 %v1374_v7  ;;  %v1373_v5 = vld [vmem:[#allocation9 + $0x378] sm:$0xff]  ;;  %v1283_v56 = vld [vmem:[#allocation9 + $0xa8] sm:$0xff] }
 0x240   : > { %1987 = vmatpush.msra.mxu0 %v1325_v8  ;;  %1880 = vmatpush.msra.mxu3 %v1308_v9  ;;  %v1349_v6 = vld [vmem:[#allocation9 + $0x2b8] sm:$0xff]  ;;  %v1299_v7 = vld [vmem:[#allocation9 + $0x128] sm:$0xff] }
 0x241   : > { %1911 = vmatmul.f32.vlgmr.msrb.gmra.mxu0 %v4190_v11  ;;  %1953 = vmatpush.msra.mxu2 %v1396_v10  ;;  %v1371_v8 = vld [vmem:[#allocation9 + $0x368] sm:$0xff]  ;;  %v1281_v10 = vld [vmem:[#allocation9 + $0x98] sm:$0xff] }
 0x242   : > { %3509 = vmatmul.msk.f32.vlgmr.msrb.gmra.mxu1 %vm1149_vm4, %v4157_v60  ;;  %1865 = vmatmul.f32.vlgmr.msrb.gmra.mxu2 %v4193_v15  ;;  %v1317_v60 = vld [vmem:[#allocation9 + $0x1b8] sm:$0xff]  ;;  %v1347_v9 = vld [vmem:[#allocation9 + $0x2a8] sm:$0xff] }
 0x243   : > { %1926 = vmatpush.msra.mxu1 %v1372_v12  ;;  %1988 = vmatpush.msra.mxu0 %v1323_v14  ;;  %v1297_v12 = vld [vmem:[#allocation9 + $0x118] sm:$0xff] }
 0x244   : > { %1881 = vmatpush.msra.mxu3 %v1306_v16  ;;  %1954 = vmatpush.msra.mxu2 %v1394_v17  ;;  %v1369_v14 = vld [vmem:[#allocation9 + $0x358] sm:$0xff]  ;;  %v1279_v17 = vld [vmem:[#allocation9 + $0x88] sm:$0xff] }
 0x245   : > { %1927 = vmatpush.msra.mxu1 %v1370_v18  ;;  %1989 = vmatpush.msra.mxu0 %v1321_v19  ;;  %v1345_v16 = vld [vmem:[#allocation9 + $0x298] sm:$0xff]  ;;  %v1295_v18 = vld [vmem:[#allocation9 + $0x108] sm:$0xff] }
 0x246   : > { %1882 = vmatpush.msra.mxu3 %v1304_v58  ;;  %1955 = vmatpush.msra.mxu2 %v1392_v21  ;;  %v1367_v19 = vld [vmem:[#allocation9 + $0x348] sm:$0xff]  ;;  %v2120_v21 = vld [vmem:[#allocation9 + $0x9f0] sm:$0xff] }
 0x247   : > { %1928 = vmatpush.msra.mxu1 %v1368_v23  ;;  %1990 = vmatpush.msra.mxu0 %v1319_v24  ;;  %v1343_v58 = vld [vmem:[#allocation9 + $0x288] sm:$0xff]  ;;  %v1277_v23 = vld [vmem:[#allocation9 + $0x78] sm:$0xff] }
 0x248   : > { %1883 = vmatpush.msra.mxu3 %v1302_v28  ;;  %1956 = vmatpush.msra.mxu2 %v1390_v31  ;;  %v1365_v24 = vld [vmem:[#allocation9 + $0x338] sm:$0xff]  ;;  %v2118_v31 = vld [vmem:[#allocation9 + $0x9e0] sm:$0xff] }
 0x249   : > { %1929 = vmatpush.msra.mxu1 %v1366_v32  ;;  %1991 = vmatpush.msra.mxu0 %v1317_v60  ;;  %v1341_v28 = vld [vmem:[#allocation9 + $0x278] sm:$0xff]  ;;  %v1275_v32 = vld [vmem:[#allocation9 + $0x68] sm:$0xff] }
 0x24a   : > { %2033 = vmatpush.msrb.mxu2 %v1389_v34  ;;  %1884 = vmatpush.msra.mxu3 %v1300_v20  ;;  %v1363_v60 = vld [vmem:[#allocation9 + $0x328] sm:$0xff]  ;;  %v2116_v20 = vld [vmem:[#allocation9 + $0x9d0] sm:$0xff] }
 0x24b   : > { %1914 = vmatmul.f32.gmra.mxu0 %v4108_v3  ;;  %3510 = vmatmul.msk.f32.gmra.mxu1 %vm1149_vm4, %v4178_v26  ;;  %v1309_v26 = vld [vmem:[#allocation9 + $0x178] sm:$0xff]  ;;  %v1339_v34 = vld [vmem:[#allocation9 + $0x268] sm:$0xff] }
 0x24c   : > { %1868 = vmatmul.f32.gmra.mxu2 %v4145_v47  ;;  %1930 = vmatpush.msra.mxu1 %v1364_v39  ;;  %v1273_v39 = vld [vmem:[#allocation9 + $0x58] sm:$0xff] }
 0x24d   : > { %1992 = vmatpush.msra.mxu0 %v1315_v40  ;;  %2034 = vmatpush.msrb.mxu2 %v1387_v29  ;;  %v1361_v40 = vld [vmem:[#allocation9 + $0x318] sm:$0xff] }
 0x24e   : > { %1885 = vmatpush.msra.mxu3 %v1298_v37  ;;  %1931 = vmatpush.msra.mxu1 %v1362_v42  ;;  %v1337_v29 = vld [vmem:[#allocation9 + $0x258] sm:$0xff]  ;;  %v2114_v37 = vld [vmem:[#allocation9 + $0x9c0] sm:$0xff]  ;;  %v1271_v42 = vld [vmem:[#allocation9 + $0x48] sm:$0xff] }
 0x24f   : > { %1993 = vmatpush.msra.mxu0 %v1313_v43  ;;  %2035 = vmatpush.msrb.mxu2 %v1385_v25  ;;  %v1359_v43 = vld [vmem:[#allocation9 + $0x308] sm:$0xff] }
 0x250   : > { %1886 = vmatpush.msra.mxu3 %v1296_v33  ;;  %1932 = vmatpush.msra.mxu1 %v1360_v45  ;;  %v1335_v25 = vld [vmem:[#allocation9 + $0x248] sm:$0xff]  ;;  %v2112_v33 = vld [vmem:[#allocation9 + $0x9b0] sm:$0xff] }
 0x251   : > { %1994 = vmatpush.msra.mxu0 %v1311_v48  ;;  %2036 = vmatpush.msrb.mxu2 %v1383_v50  ;;  %v2184_v45 = vld [vmem:[#allocation9 + $0xbf0] sm:$0xff]  ;;  %v1269_v48 = vld [vmem:[#allocation9 + $0x38] sm:$0xff] }
 0x252   : > { %1887 = vmatpush.msra.mxu3 %v1294_v51  ;;  %1933 = vmatpush.msra.mxu1 %v1358_v52  ;;  %v1333_v50 = vld [vmem:[#allocation9 + $0x238] sm:$0xff]  ;;  %v2110_v51 = vld [vmem:[#allocation9 + $0x9a0] sm:$0xff] }
 0x253   : > { %1888 = vmatmul.f32.vlgmr.msra.gmra.mxu3 %v4202_v13  ;;  %1995 = vmatpush.msra.mxu0 %v1309_v26  ;;  %v2182_v52 = vld [vmem:[#allocation9 + $0xbe0] sm:$0xff]  ;;  %v1267_v26 = vld [vmem:[#allocation9 + $0x28] sm:$0xff] }
 0x254   : > { %1964 = vmatpush.msrb.mxu3 %v1293_v49  ;;  %2037 = vmatpush.msrb.mxu2 %v1381_v53  ;;  %v1331_v49 = vld [vmem:[#allocation9 + $0x228] sm:$0xff]  ;;  %v2108_v53 = vld [vmem:[#allocation9 + $0x990] sm:$0xff] }
 0x255   : > { %2010 = vmatpush.msrb.mxu1 %v1357_v54  ;;  %3511 = vmatmul.msk.f32.vlgmr.msra.gmra.mxu2 %vm1149_vm4, %v4205_v38  ;;  %v1265_v54 = vld [vmem:[#allocation9 + $0x18] sm:$0xff] }
 0x256   : > { %1934 = vmatmul.f32.vlgmr.msra.gmra.mxu1 %v4207_v27  ;;  %1965 = vmatpush.msrb.mxu3 %v1291_v30  ;;  %v1329_v30 = vld [vmem:[#allocation9 + $0x218] sm:$0xff] }
 0x257   : > { %1996 = vmatpush.msra.mxu0 %v1307_v55  ;;  %2038 = vmatpush.msrb.mxu2 %v1379_v36  ;;  %v2178_v55 = vld [vmem:[#allocation9 + $0xbc0] sm:$0xff]  ;;  %v1263_v36 = vld [vmem:[#allocation9 + $0x8] sm:$0xff] }
 0x258   : > { %2011 = vmatpush.msrb.mxu1 %v1355_v57  ;;  %1966 = vmatpush.msrb.mxu3 %v1289_v59  ;;  %v1405_v57 = vld [vmem:[#allocation9 + $0x478] sm:$0xff]  ;;  %v2104_v59 = vld [vmem:[#allocation9 + $0x970] sm:$0xff] }
 0x259   : > { %1997 = vmatpush.msra.mxu0 %v1305_v61  ;;  %2039 = vmatpush.msrb.mxu2 %v1377_v62  ;;  %v2176_v61 = vld [vmem:[#allocation9 + $0xbb0] sm:$0xff]  ;;  %v1403_v62 = vld [vmem:[#allocation9 + $0x468] sm:$0xff] }
 0x25a   : > { %2012 = vmatpush.msrb.mxu1 %v1353_v46  ;;  %1967 = vmatpush.msrb.mxu3 %v1287_v63  ;;  %v2152_v46 = vld [vmem:[#allocation9 + $0xaf0] sm:$0xff]  ;;  %v2102_v63 = vld [vmem:[#allocation9 + $0x960] sm:$0xff] }
 0x25b   : > { %1998 = vmatpush.msra.mxu0 %v1303_v1  ;;  %2040 = vmatpush.msrb.mxu2 %v1375_v2  ;;  %v2174_v1 = vld [vmem:[#allocation9 + $0xba0] sm:$0xff]  ;;  %v1401_v2 = vld [vmem:[#allocation9 + $0x458] sm:$0xff] }
 0x25c   : > { %2013 = vmatpush.msrb.mxu1 %v1351_v0  ;;  %1891 = vmatmul.f32.gmra.mxu3 %v4123_v22  ;;  %v2150_v0 = vld [vmem:[#allocation9 + $0xae0] sm:$0xff] }
 0x25d   : > { %1968 = vmatpush.msrb.mxu3 %v1285_v35  ;;  %1999 = vmatpush.msra.mxu0 %v1301_v4  ;;  %v2100_v35 = vld [vmem:[#allocation9 + $0x950] sm:$0xff] }
 0x25e   : > { %2041 = vmatpush.msrb.mxu2 %v1373_v5  ;;  %2014 = vmatpush.msrb.mxu1 %v1349_v6  ;;  %v2172_v4 = vld [vmem:[#allocation9 + $0xb90] sm:$0xff]  ;;  %v2170_v6 = vld [vmem:[#allocation9 + $0xb80] sm:$0xff] }
 0x25f   : > { %1937 = vmatmul.f32.gmra.mxu1 %v4100_v41  ;;  %3512 = vmatmul.msk.f32.gmra.mxu2 %vm1149_vm4, %v4143_v44  ;;  %v2148_v5 = vld [vmem:[#allocation9 + $0xad0] sm:$0xff] }
 0x260   : > { %1969 = vmatpush.msrb.mxu3 %v1283_v56  ;;  %2000 = vmatpush.msra.mxu0 %v1299_v7  ;;  %v2146_v56 = vld [vmem:[#allocation9 + $0xac0] sm:$0xff]  ;;  %v1397_v7 = vld [vmem:[#allocation9 + $0x438] sm:$0xff] }
 0x261   : > { %2042 = vmatpush.msrb.mxu2 %v1371_v8  ;;  %2015 = vmatpush.msrb.mxu1 %v1347_v9  ;;  %v2168_v8 = vld [vmem:[#allocation9 + $0xb70] sm:$0xff]  ;;  %v1395_v9 = vld [vmem:[#allocation9 + $0x428] sm:$0xff] }
 0x262   : > { %1970 = vmatpush.msrb.mxu3 %v1281_v10  ;;  %2001 = vmatpush.msra.mxu0 %v1297_v12  ;;  %v2144_v10 = vld [vmem:[#allocation9 + $0xab0] sm:$0xff]  ;;  %v2094_v12 = vld [vmem:[#allocation9 + $0x920] sm:$0xff] }
 0x263   : > { %2043 = vmatpush.msrb.mxu2 %v1369_v14  ;;  %2016 = vmatpush.msrb.mxu1 %v1345_v16  ;;  %v2166_v14 = vld [vmem:[#allocation9 + $0xb60] sm:$0xff]  ;;  %v1393_v16 = vld [vmem:[#allocation9 + $0x418] sm:$0xff] }
 0x264   : > { %1971 = vmatpush.msrb.mxu3 %v1279_v17  ;;  %2002 = vmatpush.msra.mxu0 %v1295_v18  ;;  %v2142_v17 = vld [vmem:[#allocation9 + $0xaa0] sm:$0xff]  ;;  %v2092_v18 = vld [vmem:[#allocation9 + $0x910] sm:$0xff] }
 0x265   : > { %2044 = vmatpush.msrb.mxu2 %v1367_v19  ;;  %2003 = vmatmul.f32.vlgmr.msra.gmra.mxu0 %v4202_v13  ;;  %v2180_v13 = vld [vmem:[#allocation9 + $0xbd0] sm:$0xff]  ;;  %v2079_v19 = vld [vmem:[#allocation3] sm:$0xfc] }
 0x266   : > { %2017 = vmatpush.msrb.mxu1 %v1343_v58  ;;  %2282 = vmatpush.msrb.mxu0 %v2120_v21  ;;  %v2164_v58 = vld [vmem:[#allocation9 + $0xb50] sm:$0xff]  ;;  %v1391_v21 = vld [vmem:[#allocation9 + $0x408] sm:$0xff] }
 0x267   : > { %1972 = vmatpush.msrb.mxu3 %v1277_v23  ;;  %2045 = vmatpush.msrb.mxu2 %v1365_v24  ;;  %v2246_v23 = vrot.slane %v4145_v47, 2  ;;  %v2140_v24 = vld [vmem:[#allocation9 + $0xa90] sm:$0xff] }
 0x268   : > { %2018 = vmatpush.msrb.mxu1 %v1341_v28  ;;  %2283 = vmatpush.msrb.mxu0 %v2118_v31  ;;  %v2090_v28 = vld [vmem:[#allocation9 + $0x900] sm:$0xff] }
 0x269   : > { %1973 = vmatpush.msrb.mxu3 %v1275_v32  ;;  %2046 = vmatpush.msrb.mxu2 %v1363_v60  ;;  %v2162_v31 = vld [vmem:[#allocation9 + $0xb40] sm:$0xff]  ;;  %v2245_v32 = vrot.slane %v2079_v19, 2  ;;  %v2216_v60 = vld [vmem:[#allocation9 + $0xcf0] sm:$0xff] }
 0x26a   : > { %2019 = vmatpush.msrb.mxu1 %v1339_v34  ;;  %2284 = vmatpush.msrb.mxu0 %v2116_v20  ;;  %v2232_v20 = vld [vmem:[#allocation9 + $0xd70] sm:$0xff] }
 0x26b   : > { %1974 = vmatpush.msrb.mxu3 %v1273_v39  ;;  %2047 = vmatpush.msrb.mxu2 %v1361_v40  ;;  %v4226_v34 = vsel %vm2244_vm13, %v2245_v32, %v2246_v23  ;;  %v2136_v39 = vld [vmem:[#allocation9 + $0xa70] sm:$0xff]  ;;  %v2214_v40 = vld [vmem:[#allocation9 + $0xce0] sm:$0xff]  ;;  %v2215_v32 = vld [vmem:[#allocation9 + $0xce8] sm:$0xff] }
 0x26c   : > { %2020 = vmatpush.msrb.mxu1 %v1337_v29  ;;  %2285 = vmatpush.msrb.mxu0 %v2114_v37  ;;  %v2230_v29 = vld [vmem:[#allocation9 + $0xd60] sm:$0xff]  ;;  %v2084_v37 = vld [vmem:[#allocation3 + $0x50] sm:$0x3] }
 0x26d   : > { %1975 = vmatpush.msrb.mxu3 %v1271_v42  ;;  %2048 = vmatpush.msrb.mxu2 %v1359_v43  ;;  %v2158_v42 = vld [vmem:[#allocation9 + $0xb20] sm:$0xff]  ;;  %v4250_v19 = vld [vmem:[#allocation3 + $0x30] sm:$0xff] }
 0x26e   : > { %2006 = vmatmul.f32.gmra.mxu0 %v4123_v22  ;;  %2021 = vmatpush.msrb.mxu1 %v1335_v25  ;;  %v2106_v22 = vld [vmem:[#allocation9 + $0x980] sm:$0xff]  ;;  %v2081_v25 = vld [vmem:[#allocation3 + $0x10] sm:$0xfc] }
 0x26f   : > { %2049 = vmatmul.f32.vlgmr.msrb.gmra.mxu2 %v4207_v27  ;;  %2286 = vmatpush.msrb.mxu0 %v2112_v33  ;;  %v1327_v27 = vld [vmem:[#allocation9 + $0x208] sm:$0xff]  ;;  %v2134_v43 = vld [vmem:[#allocation9 + $0xa60] sm:$0xff]  ;;  %v2212_v33 = vld [vmem:[#allocation9 + $0xcd0] sm:$0xff] }
 0x270   : > { %2328 = vmatpush.msra.mxu2 %v2184_v45  ;;  %1976 = vmatpush.msrb.mxu3 %v1269_v48  ;;  %v2228_v45 = vld [vmem:[#allocation9 + $0xd50] sm:$0xff] }
 0x271   : > { %2022 = vmatpush.msrb.mxu1 %v1333_v50  ;;  %2287 = vmatpush.msrb.mxu0 %v2110_v51  ;;  %v2156_v48 = vld [vmem:[#allocation9 + $0xb10] sm:$0xff]  ;;  %v2260_v51 = vrot.slane %v2084_v37, 2 }
 0x272   : > { %2329 = vmatpush.msra.mxu2 %v2182_v52  ;;  %1977 = vmatpush.msrb.mxu3 %v1267_v26  ;;  %v2132_v50 = vld [vmem:[#allocation9 + $0xa50] sm:$0xff]  ;;  %v2210_v52 = vld [vmem:[#allocation9 + $0xcc0] sm:$0xff] }
 0x273   : > { %2023 = vmatpush.msrb.mxu1 %v1331_v49  ;;  %2288 = vmatpush.msrb.mxu0 %v2108_v53  ;;  %v2226_v26 = vld [vmem:[#allocation9 + $0xd40] sm:$0xff]  ;;  %v2251_v49 = vrot.slane %v2081_v25, 2  ;;  %v2088_v25 = vld [vmem:[#allocation3 + $0x70] sm:$0x3] }
 0x274   : > { %2330 = vmatpush.msra.mxu2 %v2180_v13  ;;  %1978 = vmatpush.msrb.mxu3 %v1265_v54  ;;  %v2130_v13 = vld [vmem:[#allocation9 + $0xa40] sm:$0xff]  ;;  %v4233_v54 = vld [vmem:[#allocation3 + $0x38] sm:$0xff] }
 0x275   : > { %2024 = vmatpush.msrb.mxu1 %v1329_v30  ;;  %2289 = vmatpush.msrb.mxu0 %v2106_v22  ;;  %v2252_v30 = vrot.slane %v4233_v54, 2  ;;  %v4237_v22 = vsel %vm2244_vm13, %v2246_v23, %v2260_v51  ;;  %v3639_v23 = vld [vmem:[#allocation3 + $0x48] sm:$0xff]  ;;  %v2268_v54 = vrot.slane %v2088_v25, 2 }
 0x276   : > { %2331 = vmatpush.msra.mxu2 %v2178_v55  ;;  %1979 = vmatpush.msrb.mxu3 %v1263_v36  ;;  %v2208_v55 = vld [vmem:[#allocation9 + $0xcb0] sm:$0xff] }
 0x277   : > { %1980 = vmatmul.f32.vlgmr.msrb.gmra.mxu3 %v4193_v15  ;;  %2025 = vmatpush.msrb.mxu1 %v1327_v27  ;;  %v1399_v15 = vld [vmem:[#allocation9 + $0x448] sm:$0xff]  ;;  %v2224_v36 = vld [vmem:[#allocation9 + $0xd30] sm:$0xff]  ;;  %v4243_v27 = vsel %vm2244_vm13, %v2251_v49, %v2252_v30  ;;  %v2194_v49 = vld [vmem:[#allocation9 + $0xc40] sm:$0xff] }
 0x278   : > { %2052 = vmatmul.f32.gmra.mxu2 %v4100_v41  ;;  %2064 = vmatpush.msra.mxu3 %v1405_v57  ;;  %v2098_v41 = vld [vmem:[#allocation9 + $0x940] sm:$0xff]  ;;  %v2153_v57 = vld [vmem:[#allocation9 + $0xaf8] sm:$0xff] }
 0x279   : > { %2290 = vmatpush.msrb.mxu0 %v2104_v59  ;;  %2332 = vmatpush.msra.mxu2 %v2176_v61  ;;  %v2128_v59 = vld [vmem:[#allocation9 + $0xa30] sm:$0xff]  ;;  %v2206_v61 = vld [vmem:[#allocation9 + $0xca0] sm:$0xff] }
 0x27a   : > { %2026 = vmatmul.f32.vlgmr.msrb.gmra.mxu1 %v4190_v11  ;;  %2065 = vmatpush.msra.mxu3 %v1403_v62  ;;  %v2096_v11 = vld [vmem:[#allocation9 + $0x930] sm:$0xff]  ;;  %v2222_v62 = vld [vmem:[#allocation9 + $0xd20] sm:$0xff] }
 0x27b   : > { %2305 = vmatpush.msra.mxu1 %v2152_v46  ;;  %2291 = vmatpush.msrb.mxu0 %v2102_v63  ;;  %v2151_v46 = vld [vmem:[#allocation9 + $0xae8] sm:$0xff]  ;;  %v2126_v63 = vld [vmem:[#allocation9 + $0xa20] sm:$0xff] }
 0x27c   : > { %2333 = vmatpush.msra.mxu2 %v2174_v1  ;;  %2066 = vmatpush.msra.mxu3 %v1401_v2  ;;  %v2204_v1 = vld [vmem:[#allocation9 + $0xc90] sm:$0xff]  ;;  %v2086_v2 = vld [vmem:[#allocation3 + $0x60] sm:$0x3] }
 0x27d   : > { %2306 = vmatpush.msra.mxu1 %v2150_v0  ;;  %2292 = vmatpush.msrb.mxu0 %v2100_v35  ;;  %v2220_v0 = vld [vmem:[#allocation9 + $0xd10] sm:$0xff]  ;;  %v2149_v35 = vld [vmem:[#allocation9 + $0xad8] sm:$0xff] }
 0x27e   : > { %2334 = vmatpush.msra.mxu2 %v2172_v4  ;;  %2067 = vmatpush.msra.mxu3 %v1399_v15  ;;  %v2083_v4 = vld [vmem:[#allocation3 + $0x20] sm:$0xfc] }
 0x27f   : > { %2307 = vmatpush.msra.mxu1 %v2148_v5  ;;  %2293 = vmatpush.msrb.mxu0 %v2098_v41  ;;  %v2124_v5 = vld [vmem:[#allocation9 + $0xa10] sm:$0xff]  ;;  %v2202_v41 = vld [vmem:[#allocation9 + $0xc80] sm:$0xff] }
 0x280   : > { %2335 = vmatpush.msra.mxu2 %v2170_v6  ;;  %1983 = vmatmul.f32.gmra.mxu3 %v4145_v47  ;;  %v2160_v47 = vld [vmem:[#allocation9 + $0xb30] sm:$0xff]  ;;  %v2080_v6 = vld [vmem:[#allocation3 + $0x8] sm:$0xfc] }
 0x281   : > { %2308 = vmatpush.msra.mxu1 %v2146_v56  ;;  %2068 = vmatpush.msra.mxu3 %v1397_v7 }
 0x282   : > { %2294 = vmatpush.msrb.mxu0 %v2096_v11  ;;  %2336 = vmatpush.msra.mxu2 %v2168_v8  ;;  %v2147_v11 = vld [vmem:[#allocation9 + $0xac8] sm:$0xff]  ;;  %v2264_v8 = vrot.slane %v2086_v2, 2 }
 0x283   : > { %2029 = vmatmul.f32.gmra.mxu1 %v4108_v3  ;;  %2069 = vmatpush.msra.mxu3 %v1395_v9  ;;  %v2138_v3 = vld [vmem:[#allocation9 + $0xa80] sm:$0xff]  ;;  %v2135_v2 = vld [vmem:[#allocation9 + $0xa68] sm:$0xff] }
 0x284   : > { %2309 = vmatpush.msra.mxu1 %v2144_v10  ;;  %2295 = vmatpush.msrb.mxu0 %v2094_v12  ;;  %v2217_v10 = vld [vmem:[#allocation9 + $0xcf8] sm:$0xff]  ;;  %v2122_v12 = vld [vmem:[#allocation9 + $0xa00] sm:$0xff] }
 0x285   : > { %2337 = vmatpush.msra.mxu2 %v2166_v14  ;;  %2070 = vmatpush.msra.mxu3 %v1393_v16  ;;  %v2257_v14 = vrot.slane %v2083_v4, 2  ;;  %v2111_v4 = vld [vmem:[#allocation9 + $0x9a8] sm:$0xff] }
 0x286   : > { %2310 = vmatpush.msra.mxu1 %v2142_v17  ;;  %2296 = vmatpush.msrb.mxu0 %v2092_v18  ;;  %v2200_v17 = vld [vmem:[#allocation9 + $0xc70] sm:$0xff]  ;;  %v2248_v18 = vrot.slane %v2080_v6, 2  ;;  %v2133_v6 = vld [vmem:[#allocation9 + $0xa58] sm:$0xff] }
 0x287   : > { %2338 = vmatpush.msra.mxu2 %v2164_v58  ;;  %2071 = vmatpush.msra.mxu3 %v1391_v21  ;;  %v2249_v58 = vrot.slane %v4250_v19, 2 }
 0x288   : > { %2311 = vmatpush.msra.mxu1 %v2140_v24  ;;  %2297 = vmatpush.msrb.mxu0 %v2090_v28  ;;  %v2258_v24 = vrot.slane %v3639_v23, 2  ;;  %v2145_v28 = vld [vmem:[#allocation9 + $0xab8] sm:$0xff] }
 0x289   : > { %2339 = vmatpush.msra.mxu2 %v2162_v31  ;;  %2298 = vmatmul.f32.vlgmr.msrb.gmra.mxu0 %v4226_v34  ;;  %v4256_v31 = vsel %vm2244_vm13, %v2252_v30, %v2264_v8  ;;  %v2115_v30 = vld [vmem:[#allocation9 + $0x9c8] sm:$0xff]  ;;  %v2186_v8 = vld [vmem:[#allocation9 + $0xc00] sm:$0xff]  ;;  %v2129_v23 = vld [vmem:[#allocation9 + $0xa38] sm:$0xff] }
 0x28a   : > { %2312 = vmatpush.msra.mxu1 %v2138_v3  ;;  %2351 = vmatpush.msrb.mxu3 %v2216_v60  ;;  %v4261_v60 = vsel %vm2244_vm13, %v2257_v14, %v2258_v24 }
 0x28b   : > { %2382 = vmatpush.msra.mxu0 %v2232_v20  ;;  %3513 = vmatmul.msk.f32.vlgmr.msra.gmra.mxu3 %vm1149_vm4, %v4205_v38  ;;  %v2154_v38 = vld [vmem:[#allocation9 + $0xb00] sm:$0xff]  ;;  %v2121_v20 = vld [vmem:[#allocation9 + $0x9f8] sm:$0xff] }
 0x28c   : > { %2340 = vmatpush.msra.mxu2 %v2160_v47  ;;  %2313 = vmatpush.msra.mxu1 %v2136_v39  ;;  %v2198_v47 = vld [vmem:[#allocation9 + $0xc60] sm:$0xff]  ;;  %v4268_v39 = vsel %vm2244_vm13, %v2248_v18, %v2249_v58  ;;  %v2185_v18 = vld [vmem:[#allocation9 + $0xbf8] sm:$0xff] }
 0x28d   : > { %2352 = vmatpush.msrb.mxu3 %v2214_v40  ;;  %2383 = vmatpush.msra.mxu0 %v2230_v29  ;;  %v2143_v40 = vld [vmem:[#allocation9 + $0xaa8] sm:$0xff]  ;;  %v2213_v29 = vld [vmem:[#allocation9 + $0xcd8] sm:$0xff] }
 0x28e   : > { %2341 = vmatpush.msra.mxu2 %v2158_v42  ;;  %2314 = vmatpush.msra.mxu1 %v2134_v43  ;;  %v4231_v53 = vpop.f32.mrf.mxu3  ;;  %v2119_v42 = vld [vmem:[#allocation9 + $0x9e8] sm:$0xff]  ;;  %v2196_v43 = vld [vmem:[#allocation9 + $0xc50] sm:$0xff] }
 0x28f   : > { %2353 = vmatpush.msrb.mxu3 %v2212_v33  ;;  %2384 = vmatpush.msra.mxu0 %v2228_v45  ;;  %v2141_v45 = vld [vmem:[#allocation9 + $0xa98] sm:$0xff] }
 0x290   : > { %2342 = vmatpush.msra.mxu2 %v2156_v48  ;;  %2315 = vmatpush.msra.mxu1 %v2132_v50  ;;  %v1654_v7 = vpop.f32.mrf.mxu1  ;;  %v2211_v48 = vld [vmem:[#allocation9 + $0xcc8] sm:$0xff]  ;;  %v2085_v50 = vld [vmem:[#allocation3 + $0x58] sm:$0x3] }
 0x291   : > { %2354 = vmatpush.msrb.mxu3 %v2210_v52  ;;  %2385 = vmatpush.msra.mxu0 %v2226_v26  ;;  %v2117_v26 = vld [vmem:[#allocation9 + $0x9d8] sm:$0xff] }
 0x292   : > { %2343 = vmatpush.msra.mxu2 %v2154_v38  ;;  %2301 = vmatmul.f32.gmra.mxu0 %v4237_v22  ;;  %v2139_v38 = vld [vmem:[#allocation9 + $0xa88] sm:$0xff] }
 0x293   : > { %2316 = vmatpush.msra.mxu1 %v2130_v13  ;;  %2344 = vmatmul.f32.vlgmr.msra.gmra.mxu2 %v4243_v27  ;;  %v2209_v13 = vld [vmem:[#allocation9 + $0xcb8] sm:$0xff] }
 0x294   : > { %2355 = vmatpush.msrb.mxu3 %v2208_v55  ;;  %2386 = vmatpush.msra.mxu0 %v2224_v36  ;;  %v2192_v55 = vld [vmem:[#allocation9 + $0xc30] sm:$0xff]  ;;  %v2262_v36 = vrot.slane %v2085_v50, 2  ;;  %v2123_v50 = vld [vmem:[#allocation9 + $0xa08] sm:$0xff] }
 0x295   : > { %2420 = vmatpush.msrb.mxu2 %v2153_v57  ;;  %3514 = vmatmul.msk.f32.gmra.mxu3 %vm1149_vm4, %v4143_v44  ;;  %v2218_v44 = vld [vmem:[#allocation9 + $0xd00] sm:$0xff]  ;;  %v1677_v16 = vpop.f32.mrf.mxu2  ;;  %v2137_v57 = vld [vmem:[#allocation9 + $0xa78] sm:$0xff] }
 0x296   : > { %2317 = vmatpush.msra.mxu1 %v2128_v59  ;;  %2356 = vmatpush.msrb.mxu3 %v2206_v61  ;;  %v2207_v59 = vld [vmem:[#allocation9 + $0xca8] sm:$0xff]  ;;  %v4274_v61 = vsel %vm2244_vm13, %v2258_v24, %v2268_v54  ;;  %v2193_v54 = vld [vmem:[#allocation9 + $0xc38] sm:$0xff] }
 0x297   : > { %v4248_v15 = vpop.f32.mrf.mxu3  ;;  %2387 = vmatpush.msra.mxu0 %v2222_v62  ;;  %2421 = vmatpush.msrb.mxu2 %v2151_v46  ;;  %v1631_v56 = vpop.f32.mrf.mxu0  ;;  %v2113_v62 = vld [vmem:[#allocation9 + $0x9b8] sm:$0xff]  ;;  %v2190_v46 = vld [vmem:[#allocation9 + $0xc20] sm:$0xff]  ;;  %v2183_v24 = vld [vmem:[#allocation9 + $0xbe8] sm:$0xff] }
 0x298   : > { %2318 = vmatpush.msra.mxu1 %v2126_v63  ;;  %2357 = vmatpush.msrb.mxu3 %v2204_v1  ;;  %v1655_v9 = vadd.f32 %v1654_v7, %v1631_v56  ;;  %v2082_v63 = vld [vmem:[#allocation3 + $0x18] sm:$0xfc]  ;;  %v4281_v1 = vsel %vm2244_vm13, %v2249_v58, %v2262_v36  ;;  %v2203_v56 = vld [vmem:[#allocation9 + $0xc88] sm:$0xff] }
 0x299   : > { %2388 = vmatpush.msra.mxu0 %v2220_v0  ;;  %2422 = vmatpush.msrb.mxu2 %v2149_v35  ;;  %v2205_v0 = vld [vmem:[#allocation9 + $0xc98] sm:$0xff]  ;;  %v2254_v7 = vrot.slane %v2082_v63, 2  ;;  %v2175_v36 = vld [vmem:[#allocation9 + $0xba8] sm:$0xff] }
 0x29a   : > { %2319 = vmatpush.msra.mxu1 %v2124_v5  ;;  %2358 = vmatpush.msrb.mxu3 %v2202_v41  ;;  %v1678_v21 = vadd.f32 %v1677_v16, %v1655_v9  ;;  %v2188_v5 = vld [vmem:[#allocation9 + $0xc10] sm:$0xff]  ;;  %v2093_v63 = vld [vmem:[#allocation9 + $0x918] sm:$0xff] }
 0x29b   : > { %2389 = vmatpush.msra.mxu0 %v2218_v44  ;;  %2423 = vmatpush.msrb.mxu2 %v2147_v11  ;;  %v2109_v11 = vld [vmem:[#allocation9 + $0x998] sm:$0xff] }
 0x29c   : > { %2320 = vmatpush.msra.mxu1 %v2122_v12  ;;  %v1701_v3 = vadd.f32 %v4231_v53, %v1678_v21  ;;  %2347 = vmatmul.f32.gmra.mxu2 %v4256_v31  ;;  %v3640_v12 = vld [vmem:[#allocation3 + $0x40] sm:$0xff] }
 0x29d   : > { %2466 = vmatpush.msrb.mxu0 %v2217_v10  ;;  %2359 = vmatpush.msrb.mxu3 %v2200_v17  ;;  %v2131_v10 = vld [vmem:[#allocation9 + $0xa48] sm:$0xff]  ;;  %v2255_v14 = vrot.slane %v3640_v12, 2  ;;  %v2201_v21 = vld [vmem:[#allocation9 + $0xc78] sm:$0xff] }
 0x29e   : > { %3515 = vmatmul.msk.f32.vlgmr.msra.gmra.mxu0 %vm1149_vm4, %v4261_v60  ;;  %2424 = vmatpush.msrb.mxu2 %v2145_v28  ;;  %v2107_v17 = vld [vmem:[#allocation9 + $0x988] sm:$0xff]  ;;  %v2165_v12 = vld [vmem:[#allocation9 + $0xb58] sm:$0xff] }
 0x29f   : > { %v1723_v37 = vpop.f32.mrf.mxu3  ;;  %2321 = vmatmul.f32.vlgmr.msra.gmra.mxu1 %v4268_v39  ;;  %2467 = vmatpush.msrb.mxu0 %v2215_v32  ;;  %v1634_v51 = vpop.f32.mrf.mxu0  ;;  %v4288_v58 = vsel %vm2244_vm13, %v2254_v7, %v2255_v14  ;;  %v2199_v28 = vld [vmem:[#allocation9 + $0xc68] sm:$0xff] }
 0x2a0   : > { %v4271_v33 = vadd.f32 %v1723_v37, %v1701_v3  ;;  %2397 = vmatpush.msrb.mxu1 %v2121_v20  ;;  %2360 = vmatpush.msrb.mxu3 %v2198_v47  ;;  %v1657_v52 = vpop.f32.mrf.mxu1  ;;  %v2127_v32 = vld [vmem:[#allocation9 + $0xa28] sm:$0xff]  ;;  %v2087_v3 = vld [vmem:[#allocation3 + $0x68] sm:$0x3]  ;;  %v2181_v47 = vld [vmem:[#allocation9 + $0xbd8] sm:$0xff] }
 0x2a1   : > { %2425 = vmatpush.msrb.mxu2 %v2143_v40  ;;  %2468 = vmatpush.msrb.mxu0 %v2213_v29  ;;  %v1658_v53 = vadd.f32 %v1657_v52, %v1634_v51  ;;  %v2103_v20 = vld [vmem:[#allocation9 + $0x968] sm:$0xff]  ;;  %v2197_v40 = vld [vmem:[#allocation9 + $0xc58] sm:$0xff]  ;;  %v2266_v25 = vrot.slane %v2087_v3, 2 }
 0x2a2   : > { %2398 = vmatpush.msrb.mxu1 %v2119_v42  ;;  %2361 = vmatpush.msrb.mxu3 %v2196_v43  ;;  %v2125_v29 = vld [vmem:[#allocation9 + $0xa18] sm:$0xff]  ;;  %v2179_v43 = vld [vmem:[#allocation9 + $0xbc8] sm:$0xff] }
 0x2a3   : > { %2426 = vmatpush.msrb.mxu2 %v2141_v45  ;;  %2469 = vmatpush.msrb.mxu0 %v2211_v48  ;;  %v2101_v42 = vld [vmem:[#allocation9 + $0x958] sm:$0xff]  ;;  %v2195_v48 = vld [vmem:[#allocation9 + $0xc48] sm:$0xff] }
 0x2a4   : > { %2399 = vmatpush.msrb.mxu1 %v2117_v26  ;;  %2362 = vmatpush.msrb.mxu3 %v2194_v49  ;;  %v2099_v52 = vld [vmem:[#allocation9 + $0x948] sm:$0xff]  ;;  %v2177_v49 = vld [vmem:[#allocation9 + $0xbb8] sm:$0xff] }
 0x2a5   : > { %2427 = vmatpush.msrb.mxu2 %v2139_v38  ;;  %2470 = vmatpush.msrb.mxu0 %v2209_v13  ;;  %v2267_v13 = vsel %vm2244_vm13, %v2255_v14, %v2266_v25  ;;  %v2229_v14 = vld [vmem:[#allocation9 + $0xd58] sm:$0xff] }
 0x2a6   : > { %2400 = vmatpush.msrb.mxu1 %v2115_v30  ;;  %2363 = vmatpush.msrb.mxu3 %v2192_v55  ;;  %v2097_v30 = vld [vmem:[#allocation9 + $0x938] sm:$0xff] }
 0x2a7   : > { %3516 = vmatmul.msk.f32.gmra.mxu0 %vm1149_vm4, %v4274_v61  ;;  %2428 = vmatpush.msrb.mxu2 %v2137_v57  ;;  %v1680_v35 = vpop.f32.mrf.mxu2  ;;  %v2191_v57 = vld [vmem:[#allocation9 + $0xc28] sm:$0xff] }
 0x2a8   : > { %2324 = vmatmul.f32.gmra.mxu1 %v4281_v1  ;;  %2471 = vmatpush.msrb.mxu0 %v2207_v59  ;;  %v1681_v41 = vadd.f32 %v1680_v35, %v1658_v53  ;;  %v1726_v44 = vpop.f32.mrf.mxu3  ;;  %v1815_v53 = vpop.f32.mrf.mxu0  ;;  %v2095_v59 = vld [vmem:[#allocation9 + $0x928] sm:$0xff] }
 0x2a9   : > { %2401 = vmatpush.msrb.mxu1 %v2113_v62  ;;  %2364 = vmatpush.msrb.mxu3 %v2190_v46  ;;  %v2173_v62 = vld [vmem:[#allocation9 + $0xb98] sm:$0xff]  ;;  %v2187_v35 = vld [vmem:[#allocation9 + $0xc08] sm:$0xff] }
 0x2aa   : > { %2429 = vmatpush.msrb.mxu2 %v2135_v2  ;;  %2472 = vmatpush.msrb.mxu0 %v2205_v0  ;;  %v1704_v9 = vadd.f32 %v4248_v15, %v1681_v41  ;;  %v1746_v16 = vpop.f32.mrf.mxu1  ;;  %v2105_v15 = vld [vmem:[#allocation9 + $0x978] sm:$0xff]  ;;  %v2171_v2 = vld [vmem:[#allocation9 + $0xb88] sm:$0xff] }
 0x2ab   : > { %2402 = vmatpush.msrb.mxu1 %v2111_v4  ;;  %2365 = vmatpush.msrb.mxu3 %v2188_v5  ;;  %v2189_v46 = vld [vmem:[#allocation9 + $0xc18] sm:$0xff]  ;;  %v2091_v4 = vld [vmem:[#allocation9 + $0x908] sm:$0xff] }
 0x2ac   : > { %2430 = vmatpush.msrb.mxu2 %v2133_v6  ;;  %2473 = vmatpush.msrb.mxu0 %v2203_v56  ;;  %v4285_v19 = vadd.f32 %v1726_v44, %v1704_v9  ;;  %v2169_v41 = vld [vmem:[#allocation9 + $0xb78] sm:$0xff] }
 0x2ad   : > { %2403 = vmatpush.msrb.mxu1 %v2109_v11  ;;  %2366 = vmatpush.msrb.mxu3 %v2186_v8  ;;  %v2233_v56 = vld [vmem:[#allocation9 + $0xd78] sm:$0xff]  ;;  %v2167_v11 = vld [vmem:[#allocation9 + $0xb68] sm:$0xff] }
 0x2ae   : > { %2431 = vmatpush.msrb.mxu2 %v2131_v10  ;;  %2367 = vmatmul.f32.vlgmr.msrb.gmra.mxu3 %v4288_v58  ;;  %v2231_v10 = vld [vmem:[#allocation9 + $0xd68] sm:$0xff] }
 0x2af   : > { %2404 = vmatpush.msrb.mxu1 %v2107_v17  ;;  %2443 = vmatpush.msra.mxu3 %v2185_v18  ;;  %v2227_v17 = vld [vmem:[#allocation9 + $0xd48] sm:$0xff]  ;;  %v2161_v18 = vld [vmem:[#allocation9 + $0xb38] sm:$0xff] }
 0x2b0   : > { %2474 = vmatpush.msrb.mxu0 %v2201_v21  ;;  %2432 = vmatpush.msrb.mxu2 %v2129_v23  ;;  %v1769_v37 = vpop.f32.mrf.mxu2 }
 0x2b1   : > { %2405 = vmatpush.msrb.mxu1 %v2105_v15  ;;  %2444 = vmatpush.msra.mxu3 %v2183_v24  ;;  %v1770_v45 = vadd.f32 %v1769_v37, %v1746_v16  ;;  %v2163_v16 = vld [vmem:[#allocation9 + $0xb48] sm:$0xff]  ;;  %v2157_v15 = vld [vmem:[#allocation9 + $0xb18] sm:$0xff] }
 0x2b2   : > { %2475 = vmatpush.msrb.mxu0 %v2199_v28  ;;  %2433 = vmatpush.msrb.mxu2 %v2127_v32  ;;  %v1792_v51 = vpop.f32.mrf.mxu3  ;;  %v2221_v24 = vld [vmem:[#allocation9 + $0xd18] sm:$0xff]  ;;  %v2155_v28 = vld [vmem:[#allocation9 + $0xb08] sm:$0xff] }
 0x2b3   : > { %2406 = vmatpush.msrb.mxu1 %v2103_v20  ;;  %2445 = vmatpush.msra.mxu3 %v2181_v47  ;;  %v1793_v26 = vadd.f32 %v1792_v51, %v1770_v45  ;;  %v1818_v7 = vpop.f32.mrf.mxu0  ;;  %v2219_v32 = vld [vmem:[#allocation9 + $0xd08] sm:$0xff] }
 0x2b4   : > { %2476 = vmatpush.msrb.mxu0 %v2197_v40  ;;  %2434 = vmatpush.msrb.mxu2 %v2125_v29 }
 0x2b5   : > { %2407 = vmatpush.msrb.mxu1 %v2101_v42  ;;  %2446 = vmatpush.msra.mxu3 %v2179_v43  ;;  %v1749_v38 = vpop.f32.mrf.mxu1  ;;  %v1816_v55 = vadd.f32 %v1815_v53, %v1793_v26 }
 0x2b6   : > { %2477 = vmatpush.msrb.mxu0 %v2195_v48  ;;  %2435 = vmatpush.msrb.mxu2 %v2123_v50 }
 0x2b7   : > { %2370 = vmatmul.f32.gmra.mxu3 %v2267_v13  ;;  %2408 = vmatpush.msrb.mxu1 %v2099_v52 }
 0x2b8   : > { %2436 = vmatmul.f32.vlgmr.msrb.gmra.mxu2 %v4268_v39  ;;  %2447 = vmatpush.msra.mxu3 %v2177_v49 }
 0x2b9   : > { %2478 = vmatpush.msrb.mxu0 %v2193_v54  ;;  %2409 = vmatpush.msrb.mxu1 %v2097_v30 }
 0x2ba   : > { %2448 = vmatpush.msra.mxu3 %v2175_v36 }
 0x2bb   : > { %2479 = vmatpush.msrb.mxu0 %v2191_v57  ;;  %2410 = vmatpush.msrb.mxu1 %v2095_v59  ;;  %v1772_v0 = vpop.f32.mrf.mxu2 }
 0x2bc   : > { %2449 = vmatpush.msra.mxu3 %v2173_v62  ;;  %v1773_v5 = vadd.f32 %v1772_v0, %v1749_v38  ;;  %v1795_v39 = vpop.f32.mrf.mxu3 }
 0x2bd   : > { %2480 = vmatpush.msrb.mxu0 %v2189_v46  ;;  %2411 = vmatpush.msrb.mxu1 %v2093_v63 }
 0x2be   : > { %2450 = vmatpush.msra.mxu3 %v2171_v2  ;;  %v1796_v6 = vadd.f32 %v1795_v39, %v1773_v5  ;;  %v1912_v20 = vpop.f32.mrf.mxu0  ;;  %v4321_v2 = vld [vmem:[#allocation10] sm:$0x3] }
 0x2bf   : > { %2481 = vmatpush.msrb.mxu0 %v2187_v35  ;;  %2412 = vmatpush.msrb.mxu1 %v2091_v4  ;;  %v1838_v44 = vpop.f32.mrf.mxu1  ;;  %v2518_v39 = vperm.slane %v4321_v2, 0 }
 0x2c0   : > { %2482 = vmatmul.f32.vlgmr.msrb.gmra.mxu0 %v4288_v58  ;;  %2439 = vmatmul.f32.gmra.mxu2 %v4281_v1  ;;  %v4295_v8 = vadd.f32 %v1838_v44, %v1816_v55  ;;  %v1819_v9 = vadd.f32 %v1818_v7, %v1796_v6  ;;  %v2225_v1 = vld [vmem:[#allocation9 + $0xd38] sm:$0xff]  ;;  %v2159_v58 = vld [vmem:[#allocation9 + $0xb28] sm:$0xff] }
 0x2c1   : > { %2451 = vmatpush.msra.mxu3 %v2169_v41  ;;  %2413 = vmatmul.f32.vlgmr.msrb.gmra.mxu1 %v4226_v34  ;;  %v2223_v34 = vld [vmem:[#allocation9 + $0xd28] sm:$0xff] }
 0x2c2   : > { %2497 = vmatpush.msra.mxu1 %v2233_v56 }
 0x2c3   : > { %2452 = vmatpush.msra.mxu3 %v2167_v11 }
 0x2c4   : > { %2498 = vmatpush.msra.mxu1 %v2231_v10 }
 0x2c5   : > { %2453 = vmatpush.msra.mxu3 %v2165_v12 }
 0x2c6   : > { %2499 = vmatpush.msra.mxu1 %v2229_v14 }
 0x2c7   : > { %2454 = vmatpush.msra.mxu3 %v2163_v16 }
 0x2c8   : > { %2485 = vmatmul.f32.gmra.mxu0 %v2267_v13  ;;  %2500 = vmatpush.msra.mxu1 %v2227_v17  ;;  %v1841_v21 = vpop.f32.mrf.mxu1  ;;  %v1915_v29 = vpop.f32.mrf.mxu0 }
 0x2c9   : > { %2455 = vmatpush.msra.mxu3 %v2161_v18  ;;  %2416 = vmatmul.f32.gmra.mxu1 %v4237_v22  ;;  %v4299_v23 = vadd.f32 %v1841_v21, %v1819_v9  ;;  %v1866_v22 = vpop.f32.mrf.mxu2 }
 0x2ca   : > { %2501 = vmatpush.msra.mxu1 %v2225_v1  ;;  %v1867_v26 = vadd.f32 %v1866_v22, %v4271_v33 }
 0x2cb   : > { %2456 = vmatpush.msra.mxu3 %v2159_v58 }
 0x2cc   : > { %2502 = vmatpush.msra.mxu1 %v2223_v34 }
 0x2cd   : > { %2457 = vmatpush.msra.mxu3 %v2157_v15 }
 0x2ce   : > { %2503 = vmatpush.msra.mxu1 %v2221_v24 }
 0x2cf   : > { %2458 = vmatpush.msra.mxu3 %v2155_v28 }
 0x2d0   : > { %2459 = vmatmul.f32.vlgmr.msra.gmra.mxu3 %v4243_v27  ;;  %2504 = vmatpush.msra.mxu1 %v2219_v32 }
 0x2d1   : > { %3517 = vmatmul.msk.f32.vlgmr.msra.gmra.mxu1 %vm1149_vm4, %v4261_v60  ;;  %v1869_v47 = vpop.f32.mrf.mxu2 }
 0x2d2   : > { %v1870_v57 = vadd.f32 %v1869_v47, %v4285_v19  ;;  %v2703_v47 = vld [vmem:[#allocation12 + $0x328] sm:$0xff] }
 0x2d3   : > { %v1935_v37 = vpop.f32.mrf.mxu1 }
 0x2d6   : > { %v1889_v3 = vpop.f32.mrf.mxu3 }
 0x2d7   : > { %v1890_v53 = vadd.f32 %v1889_v3, %v1867_v26 }
 0x2d8   : > { %2462 = vmatmul.f32.gmra.mxu3 %v4256_v31 }
 0x2d9   : > { %3518 = vmatmul.msk.f32.gmra.mxu1 %vm1149_vm4, %v4274_v61  ;;  %v1958_v42 = vpop.f32.mrf.mxu2  ;;  %v1913_v30 = vadd.f32 %v1912_v20, %v1890_v53  ;;  %v2705_v20 = vld [vmem:[#allocation12 + $0x338] sm:$0xff]  ;;  %vm2587_vm4 = vcmask 122880  }
 0x2da   : > { %2847 = vmatpush.msrb.mxu1 %v2705_v20  ;;  %v2690_v20 = vld [vmem:[#allocation12 + $0x2c0] sm:$0xff] }
 0x2db   : > { %v1936_v59 = vadd.f32 %v1935_v37, %v1913_v30 }
 0x2dc   : > { %v1938_v27 = vpop.f32.mrf.mxu1  ;;  %2848 = vmatpush.msrb.mxu1 %v2703_v47  ;;  %v2722_v47 = vld [vmem:[#allocation12 + $0x3c0] sm:$0xff] }
 0x2dd   : > { %v1959_v4 = vadd.f32 %v1958_v42, %v1936_v59  ;;  %v2701_v42 = vld [vmem:[#allocation12 + $0x318] sm:$0xff] }
 0x2de   : > { %2849 = vmatpush.msrb.mxu1 %v2701_v42  ;;  %v2686_v42 = vld [vmem:[#allocation12 + $0x2a0] sm:$0xff] }
 0x2df   : > { %v1892_v40 = vpop.f32.mrf.mxu3 }
 0x2e0   : > { %v1893_v46 = vadd.f32 %v1892_v40, %v1870_v57 }
 0x2e2   : > { %v2004_v25 = vpop.f32.mrf.mxu0  ;;  %v1961_v45 = vpop.f32.mrf.mxu2  ;;  %v1916_v41 = vadd.f32 %v1915_v29, %v1893_v46 }
 0x2e4   : > { %v1939_v11 = vadd.f32 %v1938_v27, %v1916_v41 }
 0x2e6   : > { %v1962_v14 = vadd.f32 %v1961_v45, %v1939_v11  ;;  %v2687_v11 = vld [vmem:[#allocation12 + $0x2a8] sm:$0xff] }
 0x2eb   : > { %v4307_v50 = vpop.f32.mrf.mxu0 }
 0x2f2   : > { %v4309_v31 = vpop.f32.mrf.mxu2 }
 0x2f7   : > { %v2027_v60 = vpop.f32.mrf.mxu1 }
 0x2fa   : > { %v1981_v43 = vpop.f32.mrf.mxu3 }
 0x2fb   : > { %v4316_v49 = vpop.f32.mrf.mxu2  ;;  %v1982_v15 = vadd.f32 %v1981_v43, %v4295_v8  ;;  %v2699_v43 = vld [vmem:[#allocation12 + $0x308] sm:$0xff] }
 0x2fc   : > { %2850 = vmatpush.msrb.mxu1 %v2699_v43  ;;  %v2649_v43 = vld [vmem:[#allocation12 + $0x1b0] sm:$0xff] }
 0x2fd   : > { %v2005_v22 = vadd.f32 %v2004_v25, %v1982_v15  ;;  %v2726_v15 = vld [vmem:[#allocation12 + $0x3e0] sm:$0xff] }
 0x2ff   : > { %v2028_v29 = vadd.f32 %v2027_v60, %v2005_v22  ;;  %v2519_v60 = vperm.slane %v4321_v2, 1  ;;  %v2724_v22 = vld [vmem:[#allocation12 + $0x3d0] sm:$0xff] }
 0x300   : > { %v4313_v52 = vpop.f32.mrf.mxu1 }
 0x301   : > { %v2051_v26 = vadd.f32 %v4309_v31, %v2028_v29  ;;  %v2688_v29 = vld [vmem:[#allocation12 + $0x2b0] sm:$0xff] }
 0x303   : > { %v1984_v48 = vpop.f32.mrf.mxu3 }
 0x304   : > { %v1985_v40 = vadd.f32 %v1984_v48, %v4299_v23 }
 0x306   : > { %v2299_v51 = vpop.f32.mrf.mxu0  ;;  %v2008_v25 = vadd.f32 %v4307_v50, %v1985_v40  ;;  %v2675_v40 = vld [vmem:[#allocation12 + $0x248] sm:$0xff] }
 0x30e   : > { %v4311_v61 = vpop.f32.mrf.mxu3 }
 0x30f   : > { %v2302_v38 = vpop.f32.mrf.mxu0  ;;  %v2074_v23 = vadd.f32 %v4311_v61, %v2051_v26 }
 0x316   : > { %v2345_v36 = vpop.f32.mrf.mxu2 }
 0x318   : > { %v4318_v54 = vpop.f32.mrf.mxu3 }
 0x31b   : > { %v2391_v0 = vpop.f32.mrf.mxu0 }
 0x31c   : > { %v2322_v13 = vpop.f32.mrf.mxu1 }
 0x31d   : > { %v2323_v55 = vadd.f32 %v2322_v13, %v2299_v51  ;;  %v2695_v13 = vld [vmem:[#allocation12 + $0x2e8] sm:$0xff] }
 0x31f   : > { %v2346_v62 = vadd.f32 %v2345_v36, %v2323_v55  ;;  %v2348_v7 = vpop.f32.mrf.mxu2  ;;  %v2031_v55 = vadd.f32 %v4313_v52, %v2008_v25  ;;  %v2645_v25 = vld [vmem:[#allocation12 + $0x190] sm:$0xff] }
 0x321   : > { %v2054_v46 = vadd.f32 %v4316_v49, %v2031_v55  ;;  %v2693_v49 = vld [vmem:[#allocation12 + $0x2d8] sm:$0xff]  ;;  %v2641_v55 = vld [vmem:[#allocation12 + $0x170] sm:$0xff] }
 0x324   : > { %v2394_v12 = vpop.f32.mrf.mxu0 }
 0x325   : > { %v2325_v33 = vpop.f32.mrf.mxu1 }
 0x326   : > { %v2326_v6 = vadd.f32 %v2325_v33, %v2302_v38  ;;  %v2697_v38 = vld [vmem:[#allocation12 + $0x2f8] sm:$0xff] }
 0x327   : > { %2851 = vmatpush.msrb.mxu1 %v2697_v38  ;;  %v2720_v38 = vld [vmem:[#allocation12 + $0x3b0] sm:$0xff] }
 0x328   : > { %v2349_v19 = vadd.f32 %v2348_v7, %v2326_v6  ;;  %v2691_v6 = vld [vmem:[#allocation12 + $0x2c8] sm:$0xff]  ;;  %v2702_v7 = vld [vmem:[#allocation12 + $0x320] sm:$0xff] }
 0x329   : > { %2852 = vmatpush.msrb.mxu1 %v2695_v13  ;;  %v2718_v13 = vld [vmem:[#allocation12 + $0x3a0] sm:$0xff] }
 0x32b   : > { %2853 = vmatpush.msrb.mxu1 %v2693_v49  ;;  %v2631_v49 = vld [vmem:[#allocation12 + $0x120] sm:$0xff] }
 0x32d   : > { %2854 = vmatpush.msrb.mxu1 %v2691_v6  ;;  %v2706_v6 = vld [vmem:[#allocation12 + $0x340] sm:$0xff] }
 0x331   : > { %v2368_v63 = vpop.f32.mrf.mxu3 }
 0x332   : > { %v2369_v35 = vadd.f32 %v2368_v63, %v2346_v62 }
 0x334   : > { %v2392_v5 = vadd.f32 %v2391_v0, %v2369_v35  ;;  %v2077_v0 = vadd.f32 %v4318_v54, %v2054_v46  ;;  %v2689_v54 = vld [vmem:[#allocation12 + $0x2b8] sm:$0xff]  ;;  %v2735_v46 = vld [vmem:[#allocation12 + $0x428] sm:$0xff] }
 0x335   : > { %2855 = vmatpush.msrb.mxu1 %v2689_v54  ;;  %v2727_v54 = vld [vmem:[#allocation12 + $0x3e8] sm:$0xff] }
 0x336   : > { %v2512_v56 = vadd.f32 %v2392_v5, %v1959_v4 }
 0x337   : > { %2856 = vmatpush.msrb.mxu1 %v2687_v11  ;;  %v2623_v11 = vld [vmem:[#allocation12 + $0xe0] sm:$0xff] }
 0x338   : > { %v2522_v44 = vadd.f32 %v2518_v39, %v2512_v56  ;;  %v2704_v56 = vld [vmem:[#allocation12 + $0x330] sm:$0xff] }
 0x339   : > { %2778 = vmatpush.msra.mxu2 %v2704_v56  ;;  %v2625_v56 = vld [vmem:[#allocation12 + $0xf0] sm:$0xff] }
 0x33a   : > { %v2371_v9 = vpop.f32.mrf.mxu3  ;;  %3628 = vtanh.f32 %v2522_v44  ;;  %v2736_v44 = vld [vmem:[#allocation12 + $0x430] sm:$0xff] }
 0x33b   : > { %v2372_v10 = vadd.f32 %v2371_v9, %v2349_v19  ;;  %v2437_v3 = vpop.f32.mrf.mxu2  ;;  %v2700_v19 = vld [vmem:[#allocation12 + $0x310] sm:$0xff]  ;;  %2801 = vmatpush.msrb.mxu3 %v2736_v44  ;;  %v2734_v9 = vld [vmem:[#allocation12 + $0x420] sm:$0xff]  ;;  %2779 = vmatpush.msra.mxu2 %v2702_v7  ;;  %v2725_v44 = vld [vmem:[#allocation12 + $0x3d8] sm:$0xff] }
 0x33c   : > { %v2629_v7 = vld [vmem:[#allocation12 + $0x110] sm:$0xff] }
 0x33d   : > { %v2395_v16 = vadd.f32 %v2394_v12, %v2372_v10  ;;  %v2483_v27 = vpop.f32.mrf.mxu0  ;;  %v2685_v10 = vld [vmem:[#allocation12 + $0x298] sm:$0xff]  ;;  %v2698_v12 = vld [vmem:[#allocation12 + $0x300] sm:$0xff]  ;;  %2802 = vmatpush.msrb.mxu3 %v2734_v9  ;;  %2780 = vmatpush.msra.mxu2 %v2700_v19  ;;  %v2723_v9 = vld [vmem:[#allocation12 + $0x3c8] sm:$0xff] }
 0x33e   : > { %v2414_v58 = vpop.f32.mrf.mxu1  ;;  %2857 = vmatpush.msrb.mxu1 %v2685_v10  ;;  %v2627_v19 = vld [vmem:[#allocation12 + $0x100] sm:$0xff]  ;;  %v2621_v10 = vld [vmem:[#allocation12 + $0xd0] sm:$0xff] }
 0x33f   : > { %v2514_v17 = vadd.f32 %v2395_v16, %v1962_v14  ;;  %v2438_v37 = vadd.f32 %v2437_v3, %v2414_v58  ;;  %v2732_v14 = vld [vmem:[#allocation12 + $0x410] sm:$0xff]  ;;  %v2730_v16 = vld [vmem:[#allocation12 + $0x400] sm:$0xff]  ;;  %2781 = vmatpush.msra.mxu2 %v2698_v12  ;;  %v2681_v58 = vld [vmem:[#allocation12 + $0x278] sm:$0xff] }
 0x340   : > { %v3629_v18 = vpop.eup %3628  ;;  %2803 = vmatpush.msrb.mxu3 %v2732_v14  ;;  %v2677_v3 = vld [vmem:[#allocation12 + $0x258] sm:$0xff] }
 0x341   : > { %v2524_v1 = vadd.f32 %v2518_v39, %v2514_v17  ;;  %v2544_v21 = vrot.slane %v3629_v18, 7  ;;  %v2683_v17 = vld [vmem:[#allocation12 + $0x288] sm:$0xff]  ;;  %v2696_v18 = vld [vmem:[#allocation12 + $0x2f0] sm:$0xff]  ;;  %v2721_v12 = vld [vmem:[#allocation12 + $0x3b8] sm:$0xff] }
 0x342   : > { %2804 = vmatpush.msrb.mxu3 %v2730_v16  ;;  %2858 = vmatpush.msrb.mxu1 %v2683_v17  ;;  %v2745_v14 = vld [vmem:[#allocation12 + $0x478] sm:$0xff]  ;;  %v2619_v16 = vld [vmem:[#allocation12 + $0xc0] sm:$0xff]  ;;  %v2743_v17 = vld [vmem:[#allocation12 + $0x468] sm:$0xff] }
 0x343   : > { %3630 = vtanh.f32 %v2524_v1  ;;  %2550 = vrot.lane.b32.xlu2 %v2544_v21, %s3859_s25  ;;  %v2440_v30 = vpop.f32.mrf.mxu2  ;;  %v2728_v1 = vld [vmem:[#allocation12 + $0x3f0] sm:$0xff]  ;;  %2782 = vmatpush.msra.mxu2 %v2696_v18  ;;  %v2719_v18 = vld [vmem:[#allocation12 + $0x3a8] sm:$0xff] }
 0x344   : > { %2805 = vmatpush.msrb.mxu3 %v2728_v1  ;;  %2859 = vmatpush.msrb.mxu1 %v2681_v58  ;;  %v2617_v1 = vld [vmem:[#allocation12 + $0xb0] sm:$0xff]  ;;  %v2717_v58 = vld [vmem:[#allocation12 + $0x398] sm:$0xff] }
 0x345   : > { %v2486_v31 = vpop.f32.mrf.mxu0 }
 0x346   : > { %v2417_v28 = vpop.f32.mrf.mxu1  ;;  %2806 = vmatpush.msrb.mxu3 %v2726_v15  ;;  %v2715_v15 = vld [vmem:[#allocation12 + $0x388] sm:$0xff] }
 0x347   : > { %v2441_v36 = vadd.f32 %v2440_v30, %v2417_v28  ;;  %v2679_v28 = vld [vmem:[#allocation12 + $0x268] sm:$0xff]  ;;  %v2738_v30 = vld [vmem:[#allocation12 + $0x440] sm:$0xff] }
 0x348   : > { %2860 = vmatpush.msrb.mxu1 %v2679_v28  ;;  %2807 = vmatpush.msrb.mxu3 %v2724_v22  ;;  %v2613_v28 = vld [vmem:[#allocation12 + $0x90] sm:$0xff]  ;;  %v3641_v22 = vld [vmem:[#allocation4 + $0x8] sm:$0xff] }
 0x349   : > { %v3631_v34 = vpop.eup %3630  ;;  %2539 = vst.msk [vmem:[#allocation4 + $0x40] sm:$0x3] %vm2538_vm15, %v3641_v22  ;;  %v2654_v22 = vld [vmem:[#allocation12 + $0x1d8] sm:$0xff] }
 0x34a   : > { %v2546_v24 = vrot.slane %v3631_v34, 7  ;;  %v2744_v34 = vld [vmem:[#allocation12 + $0x470] sm:$0xff]  ;;  %2861 = vmatpush.msrb.mxu1 %v2677_v3  ;;  %2808 = vmatpush.msrb.mxu3 %v2722_v47  ;;  %v2611_v3 = vld [vmem:[#allocation12 + $0x80] sm:$0xff] }
 0x34b   : > { %2836 = vmatpush.msra.mxu0 %v2744_v34  ;;  %v2615_v34 = vld [vmem:[#allocation12 + $0xa0] sm:$0xff] }
 0x34c   : > { %v2547_v32 = vsel %vm1170_vm3, %v2544_v21, %v2546_v24  ;;  %v2694_v21 = vld [vmem:[#allocation12 + $0x2e0] sm:$0xff]  ;;  %2862 = vmatpush.msrb.mxu1 %v2675_v40  ;;  %2809 = vmatpush.msrb.mxu3 %v2720_v38  ;;  %v2609_v40 = vld [vmem:[#allocation12 + $0x70] sm:$0xff] }
 0x34d   : > { %2554 = vrot.lane.b32.xlu0 %v2547_v32, %s3859_s25  ;;  %v2692_v32 = vld [vmem:[#allocation12 + $0x2d0] sm:$0xff]  ;;  %2783 = vmatpush.msra.mxu2 %v2694_v21  ;;  %v2741_v21 = vld [vmem:[#allocation12 + $0x458] sm:$0xff] }
 0x34e   : > { %v2506_v51 = vpop.f32.mrf.mxu1  ;;  %2810 = vmatpush.msrb.mxu3 %v2718_v13  ;;  %v2601_v38 = vld [vmem:[#allocation12 + $0x30] sm:$0xff] }
 0x34f   : > { %2784 = vmatpush.msra.mxu2 %v2692_v32  ;;  %v2713_v32 = vld [vmem:[#allocation12 + $0x378] sm:$0xff] }
 0x351   : > { %2785 = vmatpush.msra.mxu2 %v2690_v20  ;;  %v2711_v20 = vld [vmem:[#allocation12 + $0x368] sm:$0xff] }
 0x353   : > { %v2460_v45 = vpop.f32.mrf.mxu3  ;;  %2786 = vmatpush.msra.mxu2 %v2688_v29  ;;  %v2709_v29 = vld [vmem:[#allocation12 + $0x358] sm:$0xff] }
 0x354   : > { %v2461_v8 = vadd.f32 %v2460_v45, %v2438_v37  ;;  %v2657_v37 = vld [vmem:[#allocation12 + $0x1f0] sm:$0xff] }
 0x355   : > { %2558 = vrot.lane.b32.xlu0 %v2546_v24, %s3859_s25  ;;  %v2742_v24 = vld [vmem:[#allocation12 + $0x460] sm:$0xff]  ;;  %2944 = vmatpush.msra.mxu1 %v2657_v37  ;;  %v2653_v45 = vld [vmem:[#allocation12 + $0x1d0] sm:$0xff] }
 0x356   : > { %v2484_v53 = vadd.f32 %v2483_v27, %v2461_v8  ;;  %v2509_v61 = vpop.f32.mrf.mxu1  ;;  %2837 = vmatpush.msra.mxu0 %v2742_v24  ;;  %v2655_v27 = vld [vmem:[#allocation12 + $0x1e0] sm:$0xff]  ;;  %2787 = vmatpush.msra.mxu2 %v2686_v42  ;;  %v2739_v24 = vld [vmem:[#allocation12 + $0x448] sm:$0xff] }
 0x357   : > { %2945 = vmatpush.msra.mxu1 %v2655_v27  ;;  %v2651_v8 = vld [vmem:[#allocation12 + $0x1c0] sm:$0xff]  ;;  %v2707_v42 = vld [vmem:[#allocation12 + $0x348] sm:$0xff]  ;;  %v2605_v27 = vld [vmem:[#allocation12 + $0x50] sm:$0xff] }
 0x358   : > { %v2507_v48 = vadd.f32 %v2506_v51, %v2484_v53  ;;  %v2647_v51 = vld [vmem:[#allocation12 + $0x1a0] sm:$0xff]  ;;  %v2684_v53 = vld [vmem:[#allocation12 + $0x290] sm:$0xff] }
 0x359   : > { %2946 = vmatpush.msra.mxu1 %v2653_v45  ;;  %2788 = vmatpush.msra.mxu2 %v2684_v53  ;;  %v2607_v37 = vld [vmem:[#allocation12 + $0x60] sm:$0xff] }
 0x35a   : > { %v2513_v57 = vadd.f32 %v2507_v48, %v2074_v23  ;;  %v2740_v23 = vld [vmem:[#allocation12 + $0x450] sm:$0xff]  ;;  %v2643_v48 = vld [vmem:[#allocation12 + $0x180] sm:$0xff] }
 0x35b   : > { %v2463_v59 = vpop.f32.mrf.mxu3  ;;  %2947 = vmatpush.msra.mxu1 %v2651_v8  ;;  %2838 = vmatpush.msra.mxu0 %v2740_v23  ;;  %v3096_v23 = vld [vmem:[#allocation12 + $0x570] sm:$0xff] }
 0x35c   : > { %v2464_v50 = vadd.f32 %v2463_v59, %v2441_v36  ;;  %v2523_v62 = vadd.f32 %v2519_v60, %v2513_v57  ;;  %v2680_v36 = vld [vmem:[#allocation12 + $0x270] sm:$0xff]  ;;  %v2737_v59 = vld [vmem:[#allocation12 + $0x438] sm:$0xff] }
 0x35d   : > { %2948 = vmatpush.msra.mxu1 %v2649_v43  ;;  %v2716_v57 = vld [vmem:[#allocation12 + $0x390] sm:$0xff]  ;;  %2839 = vmatpush.msra.mxu0 %v2738_v30  ;;  %v2599_v30 = vld [vmem:[#allocation12 + $0x20] sm:$0xff] }
 0x35e   : > { %v2487_v63 = vadd.f32 %v2486_v31, %v2464_v50  ;;  %3632 = vtanh.f32 %v2523_v62  ;;  %v2639_v50 = vld [vmem:[#allocation12 + $0x160] sm:$0xff]  ;;  %2811 = vmatpush.msrb.mxu3 %v2716_v57 }
 0x35f   : > { %2949 = vmatpush.msra.mxu1 %v2647_v51  ;;  %v2678_v62 = vld [vmem:[#allocation12 + $0x260] sm:$0xff]  ;;  %2870 = vmatpush.msrb.mxu0 %v2737_v59  ;;  %v3092_v59 = vld [vmem:[#allocation12 + $0x550] sm:$0xff] }
 0x360   : > { %v2510_v2 = vadd.f32 %v2509_v61, %v2487_v63  ;;  %v2714_v31 = vld [vmem:[#allocation12 + $0x380] sm:$0xff]  ;;  %v2637_v63 = vld [vmem:[#allocation12 + $0x150] sm:$0xff] }
 0x361   : > { %2950 = vmatpush.msra.mxu1 %v2645_v25  ;;  %2812 = vmatpush.msrb.mxu3 %v2714_v31  ;;  %v2676_v61 = vld [vmem:[#allocation12 + $0x250] sm:$0xff]  ;;  %v2603_v51 = vld [vmem:[#allocation12 + $0x40] sm:$0xff] }
 0x362   : > { %v2515_v33 = vadd.f32 %v2510_v2, %v2077_v0  ;;  %2871 = vmatpush.msrb.mxu0 %v2735_v46  ;;  %v2712_v0 = vld [vmem:[#allocation12 + $0x370] sm:$0xff]  ;;  %v2733_v2 = vld [vmem:[#allocation12 + $0x418] sm:$0xff]  ;;  %v2663_v57 = vld [vmem:[#allocation12 + $0x220] sm:$0xff] }
 0x363   : > { %2951 = vmatpush.msra.mxu1 %v2643_v48  ;;  %2813 = vmatpush.msrb.mxu3 %v2712_v0  ;;  %v2665_v48 = vld [vmem:[#allocation12 + $0x230] sm:$0xff]  ;;  %v3090_v31 = vld [vmem:[#allocation12 + $0x540] sm:$0xff] }
 0x364   : > { %v3633_v35 = vpop.eup %3632  ;;  %v2525_v4 = vadd.f32 %v2519_v60, %v2515_v33  ;;  %v2682_v60 = vld [vmem:[#allocation12 + $0x280] sm:$0xff]  ;;  %2872 = vmatpush.msrb.mxu0 %v2733_v2  ;;  %v3088_v2 = vld [vmem:[#allocation12 + $0x530] sm:$0xff] }
 0x365   : > { %v2545_v5 = vrot.slane %v3633_v35, 7  ;;  %2789 = vmatpush.msra.mxu2 %v2682_v60  ;;  %2952 = vmatpush.msra.mxu1 %v2641_v55  ;;  %v2635_v33 = vld [vmem:[#allocation12 + $0x140] sm:$0xff] }
 0x366   : > { %3634 = vtanh.f32 %v2525_v4  ;;  %v2674_v35 = vld [vmem:[#allocation12 + $0x240] sm:$0xff] }
 0x367   : > { %2552 = vrot.lane.b32.xlu1 %v2545_v5, %s3859_s25  ;;  %2790 = vmatpush.msra.mxu2 %v2680_v36  ;;  %v2710_v4 = vld [vmem:[#allocation12 + $0x360] sm:$0xff] }
 0x368   : > { %2953 = vmatpush.msra.mxu1 %v2639_v50  ;;  %2814 = vmatpush.msrb.mxu3 %v2710_v4  ;;  %v3094_v36 = vld [vmem:[#allocation12 + $0x560] sm:$0xff]  ;;  %v2661_v50 = vld [vmem:[#allocation12 + $0x210] sm:$0xff] }
 0x369   : > { %2791 = vmatpush.msra.mxu2 %v2678_v62  ;;  %v2597_v62 = vld [vmem:[#allocation12 + $0x10] sm:$0xff] }
 0x36a   : > { %2954 = vmatpush.msra.mxu1 %v2637_v63  ;;  %v2659_v63 = vld [vmem:[#allocation12 + $0x200] sm:$0xff]  ;;  %v3084_v4 = vld [vmem:[#allocation12 + $0x510] sm:$0xff] }
 0x36b   : > { %2792 = vmatpush.msra.mxu2 %v2676_v61  ;;  %v2595_v61 = vld [vmem:[#allocation12] sm:$0xff] }
 0x36c   : > { %v3635_v52 = vpop.eup %3634  ;;  %2955 = vmatpush.msra.mxu1 %v2635_v33 }
 0x36d   : > { %v2548_v39 = vrot.slane %v3635_v52, 7  ;;  %2793 = vmatpush.msra.mxu2 %v2674_v35  ;;  %v2633_v52 = vld [vmem:[#allocation12 + $0x130] sm:$0xff]  ;;  %v3086_v35 = vld [vmem:[#allocation12 + $0x520] sm:$0xff] }
 0x36e   : > { %2956 = vmatpush.msra.mxu1 %v2633_v52 }
 0x36f   : > { %2560 = vrot.lane.b32.xlu1 %v2548_v39, %s3859_s25  ;;  %v2549_v41 = vsel %vm1170_vm3, %v2545_v5, %v2548_v39  ;;  %v2731_v5 = vld [vmem:[#allocation12 + $0x408] sm:$0xff]  ;;  %v2708_v39 = vld [vmem:[#allocation12 + $0x350] sm:$0xff]  ;;  %2905 = vmatpush.msrb.mxu2 %v2745_v14  ;;  %vm2578_vm3 = vcmask 130049   ;;  %v2626_v14 = vld [vmem:[#allocation12 + $0xf8] sm:$0xff] }
 0x370   : > { %2556 = vrot.lane.b32.xlu2 %v2549_v41, %s3859_s25  ;;  %v2729_v41 = vld [vmem:[#allocation12 + $0x3f8] sm:$0xff]  ;;  %2873 = vmatpush.msrb.mxu0 %v2731_v5  ;;  %v3082_v5 = vld [vmem:[#allocation12 + $0x500] sm:$0xff] }
 0x371   : > { %2815 = vmatpush.msrb.mxu3 %v2708_v39  ;;  %2957 = vmatpush.msra.mxu1 %v2631_v49  ;;  %v3080_v39 = vld [vmem:[#allocation12 + $0x4f0] sm:$0xff]  ;;  %v3078_v49 = vld [vmem:[#allocation12 + $0x4e0] sm:$0xff] }
 0x372   : > { %2874 = vmatpush.msrb.mxu0 %v2729_v41  ;;  %2906 = vmatpush.msrb.mxu2 %v2743_v17 }
 0x373   : > { %2816 = vmatpush.msrb.mxu3 %v2706_v6  ;;  %2958 = vmatpush.msra.mxu1 %v2629_v7  ;;  %v3076_v6 = vld [vmem:[#allocation12 + $0x4d0] sm:$0xff] }
 0x374   : > { %2875 = vmatpush.msrb.mxu0 %v2727_v54  ;;  %2907 = vmatpush.msrb.mxu2 %v2741_v21 }
 0x375   : > { %2921 = vmatpush.msra.mxu3 %v2625_v56  ;;  %2959 = vmatpush.msra.mxu1 %v2627_v19  ;;  %v3074_v56 = vld [vmem:[#allocation12 + $0x4c0] sm:$0xff]  ;;  %v3072_v19 = vld [vmem:[#allocation12 + $0x4b0] sm:$0xff] }
 0x376   : > { %2876 = vmatpush.msrb.mxu0 %v2725_v44  ;;  %2908 = vmatpush.msrb.mxu2 %v2739_v24  ;;  %v2666_v24 = vld [vmem:[#allocation12 + $0x238] sm:$0xff] }
 0x377   : > { %2922 = vmatpush.msra.mxu3 %v2623_v11 }
 0x378   : > { %2877 = vmatpush.msrb.mxu0 %v2723_v9 }
 0x379   : > { %2923 = vmatpush.msra.mxu3 %v2621_v10 }
 0x37a   : > { %2878 = vmatpush.msrb.mxu0 %v2721_v12 }
 0x37b   : > { %2924 = vmatpush.msra.mxu3 %v2619_v16  ;;  %v2658_v16 = vld [vmem:[#allocation12 + $0x1f8] sm:$0xff] }
 0x37c   : > { %2879 = vmatpush.msrb.mxu0 %v2719_v18 }
 0x37d   : > { %2925 = vmatpush.msra.mxu3 %v2617_v1 }
 0x37e   : > { %2880 = vmatpush.msrb.mxu0 %v2717_v58  ;;  %v3070_v58 = vld [vmem:[#allocation12 + $0x4a0] sm:$0xff] }
 0x37f   : > { %2926 = vmatpush.msra.mxu3 %v2615_v34  ;;  %v2624_v34 = vld [vmem:[#allocation12 + $0xe8] sm:$0xff] }
 0x380   : > { %2881 = vmatpush.msrb.mxu0 %v2715_v15  ;;  %v2656_v15 = vld [vmem:[#allocation12 + $0x1e8] sm:$0xff] }
 0x381   : > { %2927 = vmatpush.msra.mxu3 %v2613_v28  ;;  %v3068_v28 = vld [vmem:[#allocation12 + $0x490] sm:$0xff] }
 0x382   : > { %2882 = vmatpush.msrb.mxu0 %v2713_v32  ;;  %v2622_v32 = vld [vmem:[#allocation12 + $0xd8] sm:$0xff] }
 0x383   : > { %2928 = vmatpush.msra.mxu3 %v2611_v3  ;;  %v2664_v3 = vld [vmem:[#allocation12 + $0x228] sm:$0xff] }
 0x384   : > { %2883 = vmatpush.msrb.mxu0 %v2711_v20  ;;  %v2620_v20 = vld [vmem:[#allocation12 + $0xc8] sm:$0xff] }
 0x385   : > { %2929 = vmatpush.msra.mxu3 %v2609_v40 }
 0x386   : > { %2884 = vmatpush.msrb.mxu0 %v2709_v29 }
 0x387   : > { %2930 = vmatpush.msra.mxu3 %v2607_v37 }
 0x388   : > { %2885 = vmatpush.msrb.mxu0 %v2707_v42  ;;  %v2618_v42 = vld [vmem:[#allocation12 + $0xb8] sm:$0xff] }
 0x389   : > { %2931 = vmatpush.msra.mxu3 %v2605_v27  ;;  %v2650_v27 = vld [vmem:[#allocation12 + $0x1b8] sm:$0xff] }
 0x38b   : > { %2932 = vmatpush.msra.mxu3 %v2603_v51  ;;  %v3066_v51 = vld [vmem:[#allocation12 + $0x480] sm:$0xff] }
 0x38d   : > { %2933 = vmatpush.msra.mxu3 %v2601_v38  ;;  %v2648_v38 = vld [vmem:[#allocation12 + $0x1a8] sm:$0xff] }
 0x38f   : > { %2934 = vmatpush.msra.mxu3 %v2599_v30  ;;  %v2614_v30 = vld [vmem:[#allocation12 + $0x98] sm:$0xff] }
 0x391   : > { %2935 = vmatpush.msra.mxu3 %v2597_v62  ;;  %v2644_v62 = vld [vmem:[#allocation12 + $0x188] sm:$0xff] }
 0x393   : > { %2936 = vmatpush.msra.mxu3 %v2595_v61 }
 0x39d   : > { %v4341_v26 = vpop.permute.xlu2 %2550 }
 0x39e   : > { %2576 = vst.msk [vmem:[#allocation4] sm:$0xfe] %vm2575_vm14, %v4341_v26 }
 0x3a5   : > { %v2667_v45 = vld [vmem:[#allocation4] sm:$0xfe] }
 0x3a6   : > { %v2755_v25 = vrot.slane %v2667_v45, 1 }
 0x3bf   : > { %v2555_v47 = vpop.permute.xlu0 %2554 }
 0x3c0   : > { %2581 = vst.msk [vmem:[#allocation4 + $0x18] sm:$0xff] %vm2580_vm0, %v2555_v47 }
 0x3c7   : > { %v4344_v8 = vpop.permute.xlu0 %2558  ;;  %v4346_v43 = vld [vmem:[#allocation4 + $0x18] sm:$0xff] }
 0x3c8   : > { %2585 = vst.msk [vmem:[#allocation4 + $0x30] sm:$0x1] %vm2584_vm1, %v4344_v8  ;;  %v2756_v53 = vrot.slane %v4346_v43, 1 }
 0x3ca   : > { %v2557_v60 = vpop.permute.xlu2 %2556  ;;  %v2757_v13 = vsel %vm1576_vm10, %v2755_v25, %v2756_v53 }
 0x3cb   : > { %v4352_v55 = vsel %vm2562_vm2, %v2555_v47, %v2557_v60  ;;  %2583 = vst.msk [vmem:[#allocation4 + $0x28] sm:$0xff] %vm2562_vm2, %v2557_v60  ;;  %2794 = vmatmul.f32.vlgmr.msra.gmra.mxu2 %v2757_v13  ;;  %2863 = vmatmul.f32.vlgmr.msrb.gmra.mxu1 %v2757_v13  ;;  %v2652_v47 = vld [vmem:[#allocation12 + $0x1c8] sm:$0xff]  ;;  %v2662_v60 = vld [vmem:[#allocation12 + $0x218] sm:$0xff] }
 0x3cc   : > { %3167 = vmatpush.msrb.mxu1 %v3096_v23  ;;  %2979 = vmatpush.msra.mxu2 %v2665_v48  ;;  %v2759_v18 = vrot.slane %v4352_v55, 1  ;;  %v3059_v23 = vld [vmem:[#allocation4] sm:$0xfc]  ;;  %v3145_v48 = vrot.slane %v4346_v43, 2 }
 0x3cd   : > { %v3137_v13 = vld [vmem:[#allocation12 + $0x6b8] sm:$0xff] }
 0x3ce   : > { %3168 = vmatpush.msrb.mxu1 %v3094_v36  ;;  %2980 = vmatpush.msra.mxu2 %v2663_v57  ;;  %v2646_v36 = vld [vmem:[#allocation12 + $0x198] sm:$0xff]  ;;  %v3144_v57 = vrot.slane %v3059_v23, 2  ;;  %v3108_v23 = vld [vmem:[#allocation12 + $0x5d0] sm:$0xff] }
 0x3cf   : > { %v2670_v46 = vld [vmem:[#allocation4 + $0x30] sm:$0x1] }
 0x3d0   : > { %v2764_v0 = vrot.slane %v2670_v46, 1  ;;  %3169 = vmatpush.msrb.mxu1 %v3092_v59  ;;  %2981 = vmatpush.msra.mxu2 %v2661_v50  ;;  %v2660_v59 = vld [vmem:[#allocation12 + $0x208] sm:$0xff]  ;;  %v2610_v46 = vld [vmem:[#allocation12 + $0x78] sm:$0xff]  ;;  %v3062_v61 = vld [vmem:[#allocation4 + $0x30] sm:$0x3] }
 0x3d1   : > { %v2612_v50 = vld [vmem:[#allocation12 + $0x88] sm:$0xff] }
 0x3d2   : > { %v2765_v33 = vsel %vm1576_vm10, %v2756_v53, %v2764_v0  ;;  %3170 = vmatpush.msrb.mxu1 %v3090_v31  ;;  %2982 = vmatpush.msra.mxu2 %v2659_v63  ;;  %v4358_v54 = vld [vmem:[#allocation4 + $0x28] sm:$0xff]  ;;  %v2616_v53 = vld [vmem:[#allocation12 + $0xa8] sm:$0xff]  ;;  %v4384_v31 = vsel %vm2244_vm13, %v3144_v57, %v3145_v48 }
 0x3d3   : > { %2797 = vmatmul.f32.gmra.mxu2 %v2765_v33  ;;  %2866 = vmatmul.f32.gmra.mxu1 %v2765_v33  ;;  %v2762_v11 = vrot.slane %v4358_v54, 1  ;;  %v2642_v63 = vld [vmem:[#allocation12 + $0x178] sm:$0xff]  ;;  %v2608_v33 = vld [vmem:[#allocation12 + $0x68] sm:$0xff] }
 0x3d4   : > { %3171 = vmatpush.msrb.mxu1 %v3088_v2  ;;  %v3135_v2 = vld [vmem:[#allocation12 + $0x6a8] sm:$0xff]  ;;  %v3125_v57 = vld [vmem:[#allocation12 + $0x658] sm:$0xff] }
 0x3d6   : > { %3172 = vmatpush.msrb.mxu1 %v3086_v35  ;;  %v2640_v35 = vld [vmem:[#allocation12 + $0x168] sm:$0xff] }
 0x3d8   : > { %3173 = vmatpush.msrb.mxu1 %v3084_v4  ;;  %v4392_v4 = vld [vmem:[#allocation4] sm:$0xff] }
 0x3d9   : > { %v2553_v52 = vpop.permute.xlu1 %2552 }
 0x3da   : > { %v2563_v41 = vsel %vm2562_vm2, %v4341_v26, %v2553_v52  ;;  %2579 = vst.msk [vmem:[#allocation4 + $0x10] sm:$0xfe] %vm2578_vm3, %v2553_v52  ;;  %3174 = vmatpush.msrb.mxu1 %v3082_v5  ;;  %v3128_v5 = vld [vmem:[#allocation12 + $0x670] sm:$0xff]  ;;  %v3153_v52 = vrot.slane %v3062_v61, 2 }
 0x3db   : > { %2577 = vst [vmem:[#allocation4 + $0x8] sm:$0xfe] %v2563_v41  ;;  %v2606_v41 = vld [vmem:[#allocation12 + $0x58] sm:$0xff]  ;;  %v3100_v61 = vld [vmem:[#allocation12 + $0x590] sm:$0xff] }
 0x3dc   : > { %3175 = vmatpush.msrb.mxu1 %v3080_v39  ;;  %v3133_v39 = vld [vmem:[#allocation12 + $0x698] sm:$0xff] }
 0x3de   : > { %3176 = vmatpush.msrb.mxu1 %v3078_v49  ;;  %v2638_v49 = vld [vmem:[#allocation12 + $0x158] sm:$0xff] }
 0x3e0   : > { %3177 = vmatpush.msrb.mxu1 %v3076_v6  ;;  %v3126_v6 = vld [vmem:[#allocation12 + $0x660] sm:$0xff] }
 0x3e1   : > { %v2561_v7 = vpop.permute.xlu1 %2560  ;;  %v2669_v44 = vld [vmem:[#allocation4 + $0x10] sm:$0xfe] }
 0x3e2   : > { %v2565_v26 = vsel %vm2562_vm2, %v4344_v8, %v2561_v7  ;;  %2588 = vst.msk [vmem:[#allocation4 + $0x40] sm:$0x1] %vm2587_vm4, %v2561_v7  ;;  %v4363_v9 = vld [vmem:[#allocation4 + $0x8] sm:$0xff]  ;;  %v2761_v10 = vrot.slane %v2669_v44, 1  ;;  %3178 = vmatpush.msrb.mxu1 %v3074_v56  ;;  %v4387_v0 = vld [vmem:[#allocation4 + $0x10] sm:$0xff]  ;;  %v4396_v44 = vsel %vm2244_vm13, %v3145_v48, %v3153_v52 }
 0x3e3   : > { %v2668_v12 = vld [vmem:[#allocation4 + $0x8] sm:$0xfe]  ;;  %2586 = vst [vmem:[#allocation4 + $0x38] sm:$0x1] %v2565_v26  ;;  %2960 = vmatmul.f32.vlgmr.msra.gmra.mxu1 %v4363_v9  ;;  %v2604_v56 = vld [vmem:[#allocation12 + $0x48] sm:$0xff] }
 0x3e4   : > { %v2758_v17 = vrot.slane %v2668_v12, 1  ;;  %v2763_v1 = vsel %vm1576_vm10, %v2761_v10, %v2762_v11  ;;  %3179 = vmatpush.msrb.mxu1 %v3072_v19  ;;  %v2636_v7 = vld [vmem:[#allocation12 + $0x148] sm:$0xff]  ;;  %v2602_v19 = vld [vmem:[#allocation12 + $0x38] sm:$0xff]  ;;  %v3122_v10 = vld [vmem:[#allocation12 + $0x640] sm:$0xff] }
 0x3e5   : > { %3519 = vmatmul.msk.f32.vlgmr.msra.gmra.mxu0 %vm1207_vm5, %v2763_v1  ;;  %3521 = vmatmul.msk.f32.vlgmr.msrb.gmra.mxu2 %vm1207_vm5, %v2763_v1  ;;  %v2634_v26 = vld [vmem:[#allocation12 + $0x138] sm:$0xff]  ;;  %v3061_v12 = vld [vmem:[#allocation4 + $0x10] sm:$0xfc] }
 0x3e6   : > { %v4371_v21 = vsel %vm1576_vm10, %v2758_v17, %v2759_v18  ;;  %2990 = vmatpush.msra.mxu0 %v2626_v14  ;;  %3013 = vmatpush.msrb.mxu2 %v2658_v16  ;;  %v2600_v14 = vld [vmem:[#allocation12 + $0x28] sm:$0xff]  ;;  %v3120_v17 = vld [vmem:[#allocation12 + $0x630] sm:$0xff]  ;;  %v3117_v52 = vld [vmem:[#allocation12 + $0x618] sm:$0xff] }
 0x3e7   : > { %2817 = vmatmul.f32.vlgmr.msrb.gmra.mxu3 %v4371_v21  ;;  %3180 = vmatpush.msrb.mxu1 %v3070_v58  ;;  %v2632_v16 = vld [vmem:[#allocation12 + $0x128] sm:$0xff]  ;;  %v3150_v58 = vrot.slane %v3061_v12, 2  ;;  %v3069_v12 = vld [vmem:[#allocation12 + $0x498] sm:$0xff] }
 0x3e8   : > { %2991 = vmatpush.msra.mxu0 %v2624_v34  ;;  %3014 = vmatpush.msrb.mxu2 %v2656_v15  ;;  %v3131_v1 = vld [vmem:[#allocation12 + $0x688] sm:$0xff]  ;;  %v3118_v34 = vld [vmem:[#allocation12 + $0x620] sm:$0xff] }
 0x3e9   : > { %v2672_v40 = vld [vmem:[#allocation4 + $0x40] sm:$0x1]  ;;  %3048 = vmatpush.msrb.mxu3 %v2666_v24  ;;  %3181 = vmatpush.msrb.mxu1 %v3068_v28  ;;  %v2596_v15 = vld [vmem:[#allocation12 + $0x8] sm:$0xff]  ;;  %v3151_v24 = vrot.slane %v4358_v54, 2 }
 0x3ea   : > { %2992 = vmatpush.msra.mxu0 %v2622_v32  ;;  %3015 = vmatpush.msrb.mxu2 %v2654_v22  ;;  %v2768_v29 = vrot.slane %v2672_v40, 1  ;;  %v2671_v37 = vld [vmem:[#allocation4 + $0x38] sm:$0x1]  ;;  %v3116_v32 = vld [vmem:[#allocation12 + $0x610] sm:$0xff]  ;;  %v3134_v40 = vld [vmem:[#allocation12 + $0x6a0] sm:$0xff] }
 0x3eb   : > { %2963 = vmatmul.f32.gmra.mxu1 %v4352_v55  ;;  %v2766_v45 = vrot.slane %v2671_v37, 1  ;;  %3049 = vmatpush.msrb.mxu3 %v2664_v3  ;;  %v2628_v28 = vld [vmem:[#allocation12 + $0x108] sm:$0xff]  ;;  %v4405_v22 = vsel %vm2244_vm13, %v3150_v58, %v3151_v24  ;;  %v3136_v3 = vld [vmem:[#allocation12 + $0x6b0] sm:$0xff] }
 0x3ec   : > { %2993 = vmatpush.msra.mxu0 %v2620_v20  ;;  %3016 = vmatpush.msrb.mxu2 %v2652_v47  ;;  %v2769_v8 = vsel %vm1576_vm10, %v2762_v11, %v2768_v29  ;;  %v3124_v11 = vld [vmem:[#allocation12 + $0x650] sm:$0xff]  ;;  %v3097_v20 = vld [vmem:[#allocation12 + $0x578] sm:$0xff]  ;;  %v3114_v47 = vld [vmem:[#allocation12 + $0x600] sm:$0xff] }
 0x3ed   : > { %3520 = vmatmul.msk.f32.gmra.mxu0 %vm1207_vm5, %v2769_v8  ;;  %3522 = vmatmul.msk.f32.gmra.mxu2 %vm1207_vm5, %v2769_v8  ;;  %v4379_v25 = vsel %vm1576_vm10, %v2759_v18, %v2766_v45  ;;  %v2598_v18 = vld [vmem:[#allocation12 + $0x18] sm:$0xff]  ;;  %v3095_v29 = vld [vmem:[#allocation12 + $0x568] sm:$0xff]  ;;  %v3064_v37 = vld [vmem:[#allocation4 + $0x40] sm:$0x3] }
 0x3ee   : > { %2994 = vmatpush.msra.mxu0 %v2618_v42  ;;  %3017 = vmatpush.msrb.mxu2 %v2650_v27  ;;  %v3112_v42 = vld [vmem:[#allocation12 + $0x5f0] sm:$0xff]  ;;  %v3093_v45 = vld [vmem:[#allocation12 + $0x558] sm:$0xff]  ;;  %v3110_v8 = vld [vmem:[#allocation12 + $0x5e0] sm:$0xff] }
 0x3ef   : > { %2820 = vmatmul.f32.gmra.mxu3 %v4379_v25  ;;  %3182 = vmatpush.msrb.mxu1 %v3066_v51  ;;  %v3132_v27 = vld [vmem:[#allocation12 + $0x690] sm:$0xff]  ;;  %v3130_v51 = vld [vmem:[#allocation12 + $0x680] sm:$0xff]  ;;  %v3099_v58 = vld [vmem:[#allocation12 + $0x588] sm:$0xff] }
 0x3f0   : > { %2995 = vmatpush.msra.mxu0 %v2616_v53  ;;  %3018 = vmatpush.msrb.mxu2 %v2648_v38  ;;  %v3091_v53 = vld [vmem:[#allocation12 + $0x548] sm:$0xff]  ;;  %v3129_v38 = vld [vmem:[#allocation12 + $0x678] sm:$0xff] }
 0x3f1   : > { %3050 = vmatpush.msrb.mxu3 %v2662_v60  ;;  %3294 = vmatpush.msra.mxu1 %v3137_v13  ;;  %v3106_v60 = vld [vmem:[#allocation12 + $0x5c0] sm:$0xff]  ;;  %v3127_v13 = vld [vmem:[#allocation12 + $0x668] sm:$0xff] }
 0x3f2   : > { %2996 = vmatpush.msra.mxu0 %v2614_v30  ;;  %3019 = vmatpush.msrb.mxu2 %v2646_v36  ;;  %v3087_v30 = vld [vmem:[#allocation12 + $0x528] sm:$0xff]  ;;  %v3104_v36 = vld [vmem:[#allocation12 + $0x5b0] sm:$0xff] }
 0x3f3   : > { %3183 = vmatmul.f32.vlgmr.msrb.gmra.mxu1 %v4384_v31  ;;  %3051 = vmatpush.msrb.mxu3 %v2660_v59  ;;  %v3085_v59 = vld [vmem:[#allocation12 + $0x518] sm:$0xff] }
 0x3f4   : > { %2997 = vmatpush.msra.mxu0 %v2612_v50  ;;  %3020 = vmatpush.msrb.mxu2 %v2644_v62  ;;  %v3102_v50 = vld [vmem:[#allocation12 + $0x5a0] sm:$0xff] }
 0x3f5   : > { %2886 = vmatmul.f32.vlgmr.msrb.gmra.mxu0 %v4371_v21  ;;  %3523 = vmatmul.msk.f32.vlgmr.msra.gmra.mxu2 %vm1207_vm5, %v4387_v0  ;;  %v2630_v21 = vld [vmem:[#allocation12 + $0x118] sm:$0xff] }
 0x3f6   : > { %2998 = vmatpush.msra.mxu0 %v2610_v46  ;;  %3021 = vmatpush.msrb.mxu2 %v2642_v63  ;;  %v3060_v62 = vld [vmem:[#allocation4 + $0x8] sm:$0xfc]  ;;  %v3123_v46 = vld [vmem:[#allocation12 + $0x648] sm:$0xff] }
 0x3f7   : > { %2937 = vmatmul.f32.vlgmr.msra.gmra.mxu3 %v4392_v4  ;;  %3295 = vmatpush.msra.mxu1 %v3135_v2  ;;  %v3083_v63 = vld [vmem:[#allocation12 + $0x508] sm:$0xff]  ;;  %v3081_v2 = vld [vmem:[#allocation12 + $0x4f8] sm:$0xff] }
 0x3f8   : > { %2999 = vmatpush.msra.mxu0 %v2608_v33  ;;  %3022 = vmatpush.msrb.mxu2 %v2640_v35  ;;  %v3098_v33 = vld [vmem:[#allocation12 + $0x580] sm:$0xff]  ;;  %v3119_v35 = vld [vmem:[#allocation12 + $0x628] sm:$0xff] }
 0x3f9   : > { %3190 = vmatpush.msra.mxu3 %v3128_v5  ;;  %3296 = vmatpush.msra.mxu1 %v3133_v39  ;;  %v3077_v39 = vld [vmem:[#allocation12 + $0x4d8] sm:$0xff] }
 0x3fa   : > { %3000 = vmatpush.msra.mxu0 %v2606_v41  ;;  %3023 = vmatpush.msrb.mxu2 %v2638_v49  ;;  %v3063_v41 = vld [vmem:[#allocation4 + $0x38] sm:$0x3] }
 0x3fb   : > { %3191 = vmatpush.msra.mxu3 %v3126_v6  ;;  %3186 = vmatmul.f32.gmra.mxu1 %v4396_v44  ;;  %v3115_v49 = vld [vmem:[#allocation12 + $0x608] sm:$0xff] }
 0x3fc   : > { %3001 = vmatpush.msra.mxu0 %v2604_v56  ;;  %3024 = vmatpush.msrb.mxu2 %v2636_v7  ;;  %v3075_v6 = vld [vmem:[#allocation12 + $0x4c8] sm:$0xff]  ;;  %v3113_v56 = vld [vmem:[#allocation12 + $0x5f8] sm:$0xff] }
 0x3fd   : > { %3192 = vmatpush.msra.mxu3 %v3124_v11  ;;  %2889 = vmatmul.f32.gmra.mxu0 %v4379_v25  ;;  %v3157_v25 = vrot.slane %v3064_v37, 2  ;;  %v3073_v7 = vld [vmem:[#allocation12 + $0x4b8] sm:$0xff]  ;;  %v3111_v11 = vld [vmem:[#allocation12 + $0x5e8] sm:$0xff] }
 0x3fe   : > { %3524 = vmatmul.msk.f32.gmra.mxu2 %vm1207_vm5, %v4358_v54  ;;  %3002 = vmatpush.msra.mxu0 %v2602_v19  ;;  %v3071_v19 = vld [vmem:[#allocation12 + $0x4a8] sm:$0xff] }
 0x3ff   : > { %3025 = vmatpush.msrb.mxu2 %v2634_v26  ;;  %3193 = vmatpush.msra.mxu3 %v3122_v10  ;;  %v3158_v48 = vsel %vm2244_vm13, %v3151_v24, %v3157_v25  ;;  %v3109_v10 = vld [vmem:[#allocation12 + $0x5d8] sm:$0xff] }
 0x400   : > { %2940 = vmatmul.f32.gmra.mxu3 %v4346_v43  ;;  %3003 = vmatpush.msra.mxu0 %v2600_v14  ;;  %v3107_v14 = vld [vmem:[#allocation12 + $0x5c8] sm:$0xff] }
 0x401   : > { %3026 = vmatpush.msrb.mxu2 %v2632_v16  ;;  %3194 = vmatpush.msra.mxu3 %v3120_v17  ;;  %v3067_v16 = vld [vmem:[#allocation12 + $0x488] sm:$0xff]  ;;  %v3105_v17 = vld [vmem:[#allocation12 + $0x5b8] sm:$0xff] }
 0x402   : > { %3004 = vmatpush.msra.mxu0 %v2598_v18  ;;  %3297 = vmatpush.msra.mxu1 %v3131_v1  ;;  %v3103_v18 = vld [vmem:[#allocation12 + $0x5a8] sm:$0xff]  ;;  %v3101_v1 = vld [vmem:[#allocation12 + $0x598] sm:$0xff] }
 0x403   : > { %3027 = vmatpush.msrb.mxu2 %v2630_v21  ;;  %3195 = vmatpush.msra.mxu3 %v3118_v34 }
 0x404   : > { %3005 = vmatpush.msra.mxu0 %v2596_v15  ;;  %3529 = vmatmul.msk.f32.vlgmr.msra.gmra.mxu1 %vm1207_vm5, %v4405_v22 }
 0x405   : > { %3028 = vmatpush.msrb.mxu2 %v2628_v28  ;;  %3196 = vmatpush.msra.mxu3 %v3116_v32 }
 0x406   : > { %3225 = vmatpush.msrb.mxu0 %v3136_v3  ;;  %3029 = vmatmul.f32.vlgmr.msrb.gmra.mxu2 %v4363_v9  ;;  %v3089_v9 = vld [vmem:[#allocation12 + $0x538] sm:$0xff] }
 0x407   : > { %3236 = vmatpush.msra.mxu2 %v3097_v20  ;;  %3006 = vmatmul.f32.vlgmr.msra.gmra.mxu0 %v4392_v4  ;;  %v3079_v4 = vld [vmem:[#allocation12 + $0x4e8] sm:$0xff] }
 0x408   : > { %3197 = vmatpush.msra.mxu3 %v3114_v47  ;;  %3226 = vmatpush.msrb.mxu0 %v3134_v40 }
 0x409   : > { %3525 = vmatmul.msk.f32.vlgmr.msrb.gmra.mxu3 %vm1207_vm5, %v4387_v0  ;;  %3237 = vmatpush.msra.mxu2 %v3095_v29  ;;  %v3147_v0 = vrot.slane %v3060_v62, 2 }
 0x40a   : > { %3198 = vmatpush.msra.mxu3 %v3112_v42  ;;  %3227 = vmatpush.msrb.mxu0 %v3132_v27 }
 0x40b   : > { %3238 = vmatpush.msra.mxu2 %v3093_v45 }
 0x40c   : > { %3199 = vmatpush.msra.mxu3 %v3110_v8  ;;  %3228 = vmatpush.msrb.mxu0 %v3130_v51 }
 0x40d   : > { %3239 = vmatpush.msra.mxu2 %v3091_v53  ;;  %3530 = vmatmul.msk.f32.gmra.mxu1 %vm1207_vm5, %v3158_v48 }
 0x40e   : > { %3259 = vmatpush.msra.mxu0 %v3129_v38  ;;  %3200 = vmatpush.msra.mxu3 %v3108_v23 }
 0x40f   : > { %3240 = vmatpush.msra.mxu2 %v3089_v9  ;;  %3009 = vmatmul.f32.gmra.mxu0 %v4346_v43  ;;  %v3121_v43 = vld [vmem:[#allocation12 + $0x638] sm:$0xff] }
 0x410   : > { %3032 = vmatmul.f32.gmra.mxu2 %v4352_v55  ;;  %3201 = vmatpush.msra.mxu3 %v3106_v60 }
 0x411   : > { %3260 = vmatpush.msra.mxu0 %v3127_v13  ;;  %3526 = vmatmul.msk.f32.gmra.mxu3 %vm1207_vm5, %v4358_v54  ;;  %v3148_v54 = vrot.slane %v4352_v55, 2  ;;  %v3155_v55 = vrot.slane %v3063_v41, 2 }
 0x412   : > { %3241 = vmatpush.msra.mxu2 %v3087_v30  ;;  %3202 = vmatpush.msra.mxu3 %v3104_v36 }
 0x413   : > { %3261 = vmatpush.msra.mxu0 %v3125_v57  ;;  %v3149_v5 = vsel %vm2244_vm13, %v3147_v0, %v3148_v54  ;;  %v3156_v26 = vsel %vm2244_vm13, %v3148_v54, %v3155_v55 }
 0x414   : > { %3242 = vmatpush.msra.mxu2 %v3085_v59  ;;  %3203 = vmatpush.msra.mxu3 %v3102_v50  ;;  %v3309_v59 = vld [vmem:[#allocation13] sm:$0x3] }
 0x415   : > { %3262 = vmatpush.msra.mxu0 %v3123_v46 }
 0x416   : > { %3243 = vmatpush.msra.mxu2 %v3083_v63  ;;  %3204 = vmatpush.msra.mxu3 %v3100_v61 }
 0x417   : > { %3263 = vmatpush.msra.mxu0 %v3121_v43  ;;  %v3311_v43 = vperm.slane %v3309_v59, 0 }
 0x418   : > { %3244 = vmatpush.msra.mxu2 %v3081_v2  ;;  %3205 = vmatpush.msra.mxu3 %v3098_v33 }
 0x419   : > { %3527 = vmatmul.msk.f32.vlgmr.msrb.gmra.mxu0 %vm1207_vm5, %v4405_v22  ;;  %3206 = vmatmul.f32.vlgmr.msra.gmra.mxu3 %v3149_v5 }
 0x41a   : > { %3264 = vmatpush.msra.mxu0 %v3119_v35  ;;  %3245 = vmatpush.msra.mxu2 %v3079_v4 }
 0x41c   : > { %3265 = vmatpush.msra.mxu0 %v3117_v52  ;;  %3246 = vmatpush.msra.mxu2 %v3077_v39 }
 0x41e   : > { %3266 = vmatpush.msra.mxu0 %v3115_v49  ;;  %3247 = vmatpush.msra.mxu2 %v3075_v6 }
 0x420   : > { %3267 = vmatpush.msra.mxu0 %v3113_v56  ;;  %3248 = vmatpush.msra.mxu2 %v3073_v7 }
 0x421   : > { %3528 = vmatmul.msk.f32.gmra.mxu0 %vm1207_vm5, %v3158_v48  ;;  %3209 = vmatmul.f32.gmra.mxu3 %v3156_v26 }
 0x422   : > { %3268 = vmatpush.msra.mxu0 %v3111_v11  ;;  %3249 = vmatpush.msra.mxu2 %v3071_v19 }
 0x424   : > { %3269 = vmatpush.msra.mxu0 %v3109_v10  ;;  %3250 = vmatpush.msra.mxu2 %v3069_v12 }
 0x426   : > { %3270 = vmatpush.msra.mxu0 %v3107_v14  ;;  %3251 = vmatpush.msra.mxu2 %v3067_v16 }
 0x427   : > { %3252 = vmatmul.f32.vlgmr.msra.gmra.mxu2 %v4384_v31 }
 0x428   : > { %3271 = vmatpush.msra.mxu0 %v3105_v17 }
 0x42a   : > { %3272 = vmatpush.msra.mxu0 %v3103_v18 }
 0x42c   : > { %3273 = vmatpush.msra.mxu0 %v3101_v1 }
 0x42e   : > { %3274 = vmatpush.msra.mxu0 %v3099_v58 }
 0x42f   : > { %3275 = vmatmul.f32.vlgmr.msra.gmra.mxu0 %v3149_v5  ;;  %3255 = vmatmul.f32.gmra.mxu2 %v4396_v44 }
 0x437   : > { %3278 = vmatmul.f32.gmra.mxu0 %v3156_v26 }
 0x448   : > { %v2864_v22 = vpop.f32.mrf.mxu1 }
 0x44e   : > { %v2795_v21 = vpop.f32.mrf.mxu2 }
 0x450   : > { %v2867_v40 = vpop.f32.mrf.mxu1 }
 0x456   : > { %v2798_v15 = vpop.f32.mrf.mxu2 }
 0x460   : > { %v2961_v42 = vpop.f32.mrf.mxu1 }
 0x462   : > { %v2841_v34 = vpop.f32.mrf.mxu0 }
 0x468   : > { %v2910_v32 = vpop.f32.mrf.mxu2  ;;  %v2964_v44 = vpop.f32.mrf.mxu1 }
 0x46a   : > { %v2818_v24 = vpop.f32.mrf.mxu3  ;;  %v2844_v28 = vpop.f32.mrf.mxu0 }
 0x46b   : > { %v2819_v53 = vadd.f32 %v2818_v24, %v2795_v21 }
 0x46d   : > { %v2842_v23 = vadd.f32 %v2841_v34, %v2819_v53 }
 0x470   : > { %v2913_v20 = vpop.f32.mrf.mxu2  ;;  %v3184_v48 = vpop.f32.mrf.mxu1 }
 0x472   : > { %v2821_v3 = vpop.f32.mrf.mxu3  ;;  %v2887_v31 = vpop.f32.mrf.mxu0 }
 0x473   : > { %v2822_v13 = vadd.f32 %v2821_v3, %v2798_v15  ;;  %v2888_v54 = vadd.f32 %v2887_v31, %v2864_v22  ;;  %v3312_v15 = vperm.slane %v3309_v59, 1 }
 0x475   : > { %v2845_v50 = vadd.f32 %v2844_v28, %v2822_v13  ;;  %v2911_v6 = vadd.f32 %v2910_v32, %v2888_v54 }
 0x478   : > { %v2984_v27 = vpop.f32.mrf.mxu2  ;;  %v3187_v2 = vpop.f32.mrf.mxu1 }
 0x47a   : > { %v2938_v47 = vpop.f32.mrf.mxu3  ;;  %v2890_v29 = vpop.f32.mrf.mxu0 }
 0x47b   : > { %v2939_v9 = vadd.f32 %v2938_v47, %v2842_v23  ;;  %v2891_v19 = vadd.f32 %v2890_v29, %v2867_v40 }
 0x47d   : > { %v2962_v36 = vadd.f32 %v2961_v42, %v2939_v9  ;;  %v2914_v1 = vadd.f32 %v2913_v20, %v2891_v19 }
 0x47f   : > { %v2985_v46 = vadd.f32 %v2984_v27, %v2962_v36 }
 0x481   : > { %v2987_v51 = vpop.f32.mrf.mxu2  ;;  %v3299_v14 = vpop.f32.mrf.mxu1 }
 0x483   : > { %v2941_v37 = vpop.f32.mrf.mxu3 }
 0x484   : > { %v3007_v45 = vpop.f32.mrf.mxu0  ;;  %v2942_v63 = vadd.f32 %v2941_v37, %v2845_v50 }
 0x485   : > { %v3008_v7 = vadd.f32 %v3007_v45, %v2911_v6 }
 0x486   : > { %v2965_v35 = vadd.f32 %v2964_v44, %v2942_v63 }
 0x488   : > { %v2988_v49 = vadd.f32 %v2987_v51, %v2965_v35 }
 0x489   : > { %v3030_v60 = vpop.f32.mrf.mxu2 }
 0x48a   : > { %v3031_v10 = vadd.f32 %v3030_v60, %v3008_v7  ;;  %v3302_v29 = vpop.f32.mrf.mxu1 }
 0x48c   : > { %v3053_v8 = vpop.f32.mrf.mxu3  ;;  %v3010_v25 = vpop.f32.mrf.mxu0 }
 0x48d   : > { %v3054_v58 = vadd.f32 %v3053_v8, %v3031_v10  ;;  %v3011_v24 = vadd.f32 %v3010_v25, %v2914_v1 }
 0x493   : > { %v3033_v33 = vpop.f32.mrf.mxu2 }
 0x494   : > { %v3056_v38 = vpop.f32.mrf.mxu3  ;;  %v3034_v22 = vadd.f32 %v3033_v33, %v3011_v24 }
 0x496   : > { %v3230_v30 = vpop.f32.mrf.mxu0  ;;  %v3057_v37 = vadd.f32 %v3056_v38, %v3034_v22 }
 0x49c   : > { %v3207_v57 = vpop.f32.mrf.mxu3 }
 0x49d   : > { %v3208_v62 = vadd.f32 %v3207_v57, %v3184_v48 }
 0x49e   : > { %v3233_v5 = vpop.f32.mrf.mxu0 }
 0x49f   : > { %v3231_v61 = vadd.f32 %v3230_v30, %v3208_v62 }
 0x4a1   : > { %v3305_v0 = vadd.f32 %v3231_v61, %v2985_v46 }
 0x4a3   : > { %v3315_v4 = vadd.f32 %v3311_v43, %v3305_v0 }
 0x4a4   : > { %v3210_v52 = vpop.f32.mrf.mxu3 }
 0x4a5   : > { %v3319_v39 = vmax.f32 %v3315_v4, 0.0  ;;  %v3211_v41 = vadd.f32 %v3210_v52, %v3187_v2 }
 0x4a7   : > { %v3323_v55 = vmin.f32 %v3319_v39, 1.0  ;;  %v3234_v56 = vadd.f32 %v3233_v5, %v3211_v41 }
 0x4a9   : > { %3327 = vst [vmem:[%s4431_s8] sm:$0xff] %v3323_v55  ;;  %v3307_v11 = vadd.f32 %v3234_v56, %v2988_v49 }
 0x4aa   : > { %v3253_v26 = vpop.f32.mrf.mxu2 }
 0x4ab   : > { %v3317_v12 = vadd.f32 %v3311_v43, %v3307_v11 }
 0x4ac   : > { %v3276_v16 = vpop.f32.mrf.mxu0 }
 0x4ad   : > { %v3321_v17 = vmax.f32 %v3317_v12, 0.0  ;;  %v3277_v18 = vadd.f32 %v3276_v16, %v3253_v26 }
 0x4af   : > { %v3325_v21 = vmin.f32 %v3321_v17, 1.0  ;;  %v3300_v34 = vadd.f32 %v3299_v14, %v3277_v18 }
 0x4b1   : > { %3329 = vst [vmem:[%s4431_s8 + $0x10] sm:$0xff] %v3325_v21  ;;  %v3306_v28 = vadd.f32 %v3300_v34, %v3054_v58 }
 0x4b2   : > { %v3256_v32 = vpop.f32.mrf.mxu2 }
 0x4b3   : > { %v3316_v3 = vadd.f32 %v3312_v15, %v3306_v28 }
 0x4b4   : > { %v3279_v31 = vpop.f32.mrf.mxu0 }
 0x4b5   : > { %v3320_v47 = vmax.f32 %v3316_v3, 0.0  ;;  %v3280_v40 = vadd.f32 %v3279_v31, %v3256_v32 }
 0x4b7   : > { %v3324_v42 = vmin.f32 %v3320_v47, 1.0  ;;  %v3303_v27 = vadd.f32 %v3302_v29, %v3280_v40 }
 0x4b9   : > { %3328 = vst [vmem:[%s4431_s8 + $0x8] sm:$0xff] %v3324_v42  ;;  %v3308_v20 = vadd.f32 %v3303_v27, %v3057_v37 }
 0x4bb   : > { %v3318_v45 = vadd.f32 %v3312_v15, %v3308_v20 }
 0x4bd   : > { %v3322_v8 = vmax.f32 %v3318_v45, 0.0 }
 0x4bf   : > { %v3326_v44 = vmin.f32 %v3322_v8, 1.0 }
 0x4c1   : > { %3330 = vst [vmem:[%s4431_s8 + $0x18] sm:$0xff] %v3326_v44 }
 0x4c2 PF: > { %s21_s24 = sadd.s32 1, %s3844_s24  }
 0x4c3   : > { %p18_p7 = scmp.ge.s32.totalorder %s21_s24, 4  }
 0x4c5   :  { %20 = sbr.rel (!%p18_p7) target bundleno = 4 (0x4), region = 111 }
 0x4ca   :  { %3352 = vsyncpa [#allocation6], 1 }
 0x4cb   :  { %3354 = vsyncpa [#allocation6 + $0x1], 1 }
 0x4cc   :  { %3355 = vsyncpa [#allocation8], 1 }
 0x4cd   :  { %3356 = vsyncpa [#allocation11], 1 }
 0x4ce   :  { %3357 = vsyncpa [#allocation14], 1 }

</bundles_post_ra>
